<compile_context>
chip_gen: v7x
topology: tpu7x:2x2x1
jax: 0.10.0
libtpu: 0.0.40
codegen_flags: <defaults>
</compile_context>

<pallas_src>
import functools

import jax
import jax.numpy as jnp
from jax.experimental import pallas as pl
from jax.experimental.pallas import tpu as pltpu


def _round_up(x, m):
    return (x + m - 1) // m * m


def _cdiv(a, b):
    return -(-a // b)


# ----------------------------- Pallas kernel ---------------------------------

def mlp_render_pe_kernel(x_ref, e_ref, wsc_ref, wx_ref, b1_ref, w2_ref, b2_ref,
                         w3_ref, b3_ref, out_ref, *, dpe):
    f32 = jnp.float32
    bf16 = jnp.bfloat16

    x = x_ref[...]                              # (Dx, T) f32, rows=[feat|view|pts]
    x_hi = x.astype(bf16)                       # bf16 hi part
    x_lo = (x - x_hi.astype(f32)).astype(bf16)  # bf16 lo residual

    # --- positional-encoding arguments ---------------------------------------
    # pe rows [0:dpe)   = sin arguments (pts PE then view PE)
    # pe rows [dpe:2dpe)= same arguments; +pi/2 turns sin into cos.
    # E entries are exact powers of two -> 2-pass bf16 hi/lo split is lossless
    # up to ~2^-17 relative; pi/2 is added in f32 on the VPU.
    e = e_ref[...]                              # (2*Dpe, Dx) bf16
    pe = (jnp.dot(e, x_hi, preferred_element_type=f32)
          + jnp.dot(e, x_lo, preferred_element_type=f32))        # (2*Dpe, T) f32
    offs = jnp.where(
        jax.lax.broadcasted_iota(jnp.int32, (2 * dpe, 1), 0) >= dpe,
        jnp.pi / 2, 0.0).astype(f32)
    sc = jnp.sin(pe + offs)                     # [sin_pts, sin_view, cos_pts, cos_view]

    # --- layer 1 (sc path + direct [feat|view] path), f32 bias, ReLU ----------
    h = (jnp.dot(wsc_ref[...], sc.astype(bf16), preferred_element_type=f32)
         + jnp.dot(wx_ref[...], x_hi, preferred_element_type=f32)
         + b1_ref[...])                         # (featureC, T)
    h = jnp.maximum(h, 0.0)

    # --- layer 2 + ReLU --------------------------------------------------------
    h = jnp.maximum(
        jnp.dot(w2_ref[...], h.astype(bf16), preferred_element_type=f32)
        + b2_ref[...], 0.0)

    # --- layer 3 + sigmoid (exp + approx reciprocal, both on the EUP) ----------
    rgb = (jnp.dot(w3_ref[...], h.astype(bf16), preferred_element_type=f32)
           + b3_ref[...])                       # (3, T)  lane-dense
    out_ref[...] = pl.reciprocal(1.0 + jnp.exp(-rgb), approx=True)


# ------------------------------- wrapper --------------------------------------

def mlp_render_pe_pallas(pts, viewdirs, features, params, *, viewpe, pospe,
                         tile_n=2048):
    assert pospe > 0 and viewpe > 0, "kernel assumes both PEs are enabled"
    N = pts.shape[0]
    Cf = features.shape[1]
    featureC = params["w2"].shape[0]
    dpe = 3 * pospe + 3 * viewpe
    Dx = Cf + 6                                  # [feat | view | pts]

    f32, bf16 = jnp.float32, jnp.bfloat16

    # ---- feature-major packed input (rays along the lane axis): (Dx, N) ------
    x_t = jnp.concatenate(
        [features.T, viewdirs.T, pts.T], axis=0).astype(f32)

    # ---- PE expansion (transposed): (2*Dpe, Dx), entries are powers of two ---
    def pe_expand(freqs):                        # (3, 3*freqs): row d has 2^f at d*freqs+f
        fb = 2.0 ** jnp.arange(freqs, dtype=f32)
        return (jnp.eye(3, dtype=f32)[:, :, None] * fb[None, None, :]
                ).reshape(3, 3 * freqs)

    e_pos, e_view = pe_expand(pospe), pe_expand(viewpe)
    blk = jnp.concatenate([
        jnp.zeros((Cf, dpe), f32),                                      # feat rows
        jnp.concatenate([jnp.zeros((3, 3 * pospe), f32), e_view], 1),   # view rows
        jnp.concatenate([e_pos, jnp.zeros((3, 3 * viewpe), f32)], 1),   # pts rows
    ], axis=0)                                                          # (Dx, Dpe)
    e_t = jnp.concatenate([blk, blk], axis=1).T.astype(bf16)            # (2*Dpe, Dx)

    # ---- split layer-1 weight rows along the torch concat order --------------
    # torch order: [feat(Cf), view(3), sin_pts, cos_pts, sin_view, cos_view]
    w1 = params["w1"]
    o = 0
    w1f = w1[o:o + Cf]; o += Cf
    w1v = w1[o:o + 3]; o += 3
    w1ps = w1[o:o + 3 * pospe]; o += 3 * pospe
    w1pc = w1[o:o + 3 * pospe]; o += 3 * pospe
    w1vs = w1[o:o + 3 * viewpe]; o += 3 * viewpe
    w1vc = w1[o:o + 3 * viewpe]; o += 3 * viewpe
    assert o == w1.shape[0], (o, w1.shape)

    # sc-path weight rows match sc row order [sin_pts, sin_view, cos_pts, cos_view]
    wsc_t = jnp.concatenate([w1ps, w1vs, w1pc, w1vc], axis=0).T.astype(bf16)  # (featureC, 2*Dpe)
    # direct-path weight rows match x rows [feat, view, pts(unused -> 0)]
    wx_t = jnp.concatenate(
        [w1f, w1v, jnp.zeros((3, featureC), f32)], axis=0).T.astype(bf16)     # (featureC, Dx)

    w2_t = params["w2"].T.astype(bf16)            # (featureC, featureC)
    w3_t = params["w3"].T.astype(bf16)            # (3, featureC)
    b1 = params["b1"].reshape(featureC, 1).astype(f32)
    b2 = params["b2"].reshape(featureC, 1).astype(f32)
    b3 = params["b3"].reshape(3, 1).astype(f32)

    # ---- tiling: multiple of 128; >=2 grid steps when possible (v7x 2 cores) --
    tile = max(128, min(tile_n, _round_up(_cdiv(N, 2), 128)))
    grid = (_cdiv(N, tile),)                      # ragged last block handled by Pallas

    kernel = functools.partial(mlp_render_pe_kernel, dpe=dpe)

    def full(a):
        return pl.BlockSpec(a.shape, lambda i: (0, 0))

    out_t = pl.pallas_call(
        kernel,
        out_shape=jax.ShapeDtypeStruct((3, N), jnp.float32),
        grid=grid,
        in_specs=[
            pl.BlockSpec((Dx, tile), lambda i: (0, i)),   # packed per-ray inputs
            full(e_t), full(wsc_t), full(wx_t), full(b1),
            full(w2_t), full(b2), full(w3_t), full(b3),
        ],
        out_specs=pl.BlockSpec((3, tile), lambda i: (0, i)),
        compiler_params=pltpu.CompilerParams(
            dimension_semantics=("parallel",),
            allow_input_fusion=[True] + [False] * 8,
        ),
    )(x_t, e_t, wsc_t, wx_t, b1, w2_t, b2, w3_t, b3)

    return out_t.T                                # (N, 3)


# ---------------- pure-JAX reference (mirrors the PyTorch forward) -------------

def positional_encoding_ref(positions, freqs):
    freq_bands = 2.0 ** jnp.arange(freqs, dtype=jnp.float32)
    pts = (positions[..., None] * freq_bands).reshape(
        positions.shape[:-1] + (freqs * positions.shape[-1],))
    return jnp.concatenate([jnp.sin(pts), jnp.cos(pts)], axis=-1)


def mlp_render_pe_ref(pts, viewdirs, features, params, *, viewpe, pospe):
    indata = [features, viewdirs,
              positional_encoding_ref(pts, pospe),
              positional_encoding_ref(viewdirs, viewpe)]
    x = jnp.concatenate(indata, axis=-1)
    h = jnp.maximum(x @ params["w1"] + params["b1"], 0.0)
    h = jnp.maximum(h @ params["w2"] + params["b2"], 0.0)
    rgb = h @ params["w3"] + params["b3"]
    return jax.nn.sigmoid(rgb)


# ---------------- parameter init (deterministic, PyTorch-Linear-style) ---------

def init_params(key, in_dim, featureC):
    ks = jax.random.split(key, 5)

    def linear(kw, kb, fan_in, fan_out, zero_bias=False):
        bound = 1.0 / jnp.sqrt(jnp.float32(fan_in))
        w = jax.random.uniform(kw, (fan_in, fan_out), jnp.float32, -bound, bound)
        if zero_bias:
            b = jnp.zeros((fan_out,), jnp.float32)
        else:
            b = jax.random.uniform(kb, (fan_out,), jnp.float32, -bound, bound)
        return w, b

    w1, b1 = linear(ks[0], ks[1], in_dim, featureC)
    w2, b2 = linear(ks[2], ks[3], featureC, featureC)
    w3, b3 = linear(ks[4], ks[4], featureC, 3, zero_bias=True)  # bias init to 0
    return {"w1": w1, "b1": b1, "w2": w2, "b2": b2, "w3": w3, "b3": b3}


if __name__ == "__main__":
    N = 300          # number of rays (deliberately not a multiple of 8/128)
    inChanel = 8     # appearance feature channels
    viewpe = 6
    pospe = 6
    featureC = 128

    # dimension actually consumed by the forward pass (see NOTE above)
    in_dim = inChanel + 3 + 2 * pospe * 3 + 2 * viewpe * 3

    key = jax.random.PRNGKey(0)
    k_pts, k_view, k_feat, k_par = jax.random.split(key, 4)

    pts = jax.random.uniform(k_pts, (N, 3), jnp.float32, -1.0, 1.0)
    viewdirs_raw = jax.random.normal(k_view, (N, 3), jnp.float32)
    viewdirs = viewdirs_raw / jnp.linalg.norm(viewdirs_raw, axis=-1, keepdims=True)
    features = jax.random.normal(k_feat, (N, inChanel), jnp.float32)

    params = init_params(k_par, in_dim, featureC)

    run = jax.jit(functools.partial(
        mlp_render_pe_pallas, viewpe=viewpe, pospe=pospe, tile_n=2048))
    out = jax.block_until_ready(run(pts, viewdirs, features, params))

    ref = jax.block_until_ready(
        mlp_render_pe_ref(pts, viewdirs, features, params,
                          viewpe=viewpe, pospe=pospe))

    assert out.shape == (N, 3) and out.dtype == jnp.float32
    # bf16 MXU operands (f32 accumulation) + approx-reciprocal sigmoid
    # -> tolerance relaxed vs. pure-f32.
    max_err = float(jnp.max(jnp.abs(out - ref)))
    assert jnp.allclose(out, ref, atol=2e-2, rtol=2e-2), max_err
    print("KERNEL_OK")
</pallas_src>

<mosaic_0001>
module attributes {stable_mosaic.version = 11 : i64} {
  func.func @mlp_render_pe_kernel(%arg0: i32, %arg1: memref<14x256xf32, #tpu.memory_space<vmem>>, %arg2: memref<72x14xbf16, #tpu.memory_space<vmem>>, %arg3: memref<128x72xbf16, #tpu.memory_space<vmem>>, %arg4: memref<128x14xbf16, #tpu.memory_space<vmem>>, %arg5: memref<128x1xf32, #tpu.memory_space<vmem>>, %arg6: memref<128x128xbf16, #tpu.memory_space<vmem>>, %arg7: memref<128x1xf32, #tpu.memory_space<vmem>>, %arg8: memref<3x128xbf16, #tpu.memory_space<vmem>>, %arg9: memref<3x1xf32, #tpu.memory_space<vmem>>, %arg10: memref<3x256xf32, #tpu.memory_space<vmem>>) attributes {dimension_semantics = [#tpu.dimension_semantics<parallel>], iteration_bounds = array<i64: 2>, scalar_prefetch = 0 : i64, scratch_operands = 0 : i64, tpu.core_type = #tpu.core_type<tc>, window_params = [{transform_indices = @transform_0, window_bounds = array<i64: 14, 256>}, {pipeline_mode = #tpu.pipeline_mode<synchronous>, transform_indices = @transform_1, window_bounds = array<i64: 72, 14>}, {pipeline_mode = #tpu.pipeline_mode<synchronous>, transform_indices = @transform_2, window_bounds = array<i64: 128, 72>}, {pipeline_mode = #tpu.pipeline_mode<synchronous>, transform_indices = @transform_3, window_bounds = array<i64: 128, 14>}, {pipeline_mode = #tpu.pipeline_mode<synchronous>, transform_indices = @transform_4, window_bounds = array<i64: 128, 1>}, {pipeline_mode = #tpu.pipeline_mode<synchronous>, transform_indices = @transform_5, window_bounds = array<i64: 128, 128>}, {pipeline_mode = #tpu.pipeline_mode<synchronous>, transform_indices = @transform_6, window_bounds = array<i64: 128, 1>}, {pipeline_mode = #tpu.pipeline_mode<synchronous>, transform_indices = @transform_7, window_bounds = array<i64: 3, 128>}, {pipeline_mode = #tpu.pipeline_mode<synchronous>, transform_indices = @transform_8, window_bounds = array<i64: 3, 1>}, {transform_indices = @transform_9, window_bounds = array<i64: 3, 256>}]} {
    %c0 = arith.constant 0 : index
    %c0_0 = arith.constant 0 : index
    %0 = vector.load %arg1[%c0, %c0_0] : memref<14x256xf32, #tpu.memory_space<vmem>>, vector<14x256xf32>
    %1 = arith.truncf %0 : vector<14x256xf32> to vector<14x256xbf16>
    %2 = arith.extf %1 : vector<14x256xbf16> to vector<14x256xf32>
    %3 = arith.subf %0, %2 : vector<14x256xf32>
    %4 = arith.truncf %3 : vector<14x256xf32> to vector<14x256xbf16>
    %c0_1 = arith.constant 0 : index
    %c0_2 = arith.constant 0 : index
    %5 = vector.load %arg2[%c0_1, %c0_2] : memref<72x14xbf16, #tpu.memory_space<vmem>>, vector<72x14xbf16>
    %cst = arith.constant dense<0.000000e+00> : vector<72x256xf32>
    %6 = tpu.matmul %5, %1, %cst {dimension_numbers = #tpu.dot_dimension_numbers<[1], [0], [0], [1], [0, 0, 1, 1], [], []>} : vector<72x14xbf16>, vector<14x256xbf16>, vector<72x256xf32> -> vector<72x256xf32>
    %cst_3 = arith.constant dense<0.000000e+00> : vector<72x256xf32>
    %7 = tpu.matmul %5, %4, %cst_3 {dimension_numbers = #tpu.dot_dimension_numbers<[1], [0], [0], [1], [0, 0, 1, 1], [], []>} : vector<72x14xbf16>, vector<14x256xbf16>, vector<72x256xf32> -> vector<72x256xf32>
    %8 = arith.addf %6, %7 : vector<72x256xf32>
    %9 = tpu.iota {dimensions = array<i32: 0>} : vector<72x1xi32>
    %c36_i32 = arith.constant 36 : i32
    %10 = vector.broadcast %c36_i32 : i32 to vector<72x1xi32>
    %11 = arith.cmpi sge, %9, %10 : vector<72x1xi32>
    %cst_4 = arith.constant 1.57079637 : f32
    %cst_5 = arith.constant 0.000000e+00 : f32
    %12 = vector.broadcast %cst_4 : f32 to vector<72x1xf32>
    %13 = vector.broadcast %cst_5 : f32 to vector<72x1xf32>
    %14 = arith.select %11, %12, %13 : vector<72x1xi1>, vector<72x1xf32>
    %15 = vector.broadcast %14 : vector<72x1xf32> to vector<72x256xf32>
    %16 = arith.addf %8, %15 : vector<72x256xf32>
    %17 = math.sin %16 : vector<72x256xf32>
    %c0_6 = arith.constant 0 : index
    %c0_7 = arith.constant 0 : index
    %18 = vector.load %arg3[%c0_6, %c0_7] : memref<128x72xbf16, #tpu.memory_space<vmem>>, vector<128x72xbf16>
    %19 = arith.truncf %17 : vector<72x256xf32> to vector<72x256xbf16>
    %cst_8 = arith.constant dense<0.000000e+00> : vector<128x256xf32>
    %20 = tpu.matmul %18, %19, %cst_8 {dimension_numbers = #tpu.dot_dimension_numbers<[1], [0], [0], [1], [0, 0, 1, 1], [], []>} : vector<128x72xbf16>, vector<72x256xbf16>, vector<128x256xf32> -> vector<128x256xf32>
    %c0_9 = arith.constant 0 : index
    %c0_10 = arith.constant 0 : index
    %21 = vector.load %arg4[%c0_9, %c0_10] : memref<128x14xbf16, #tpu.memory_space<vmem>>, vector<128x14xbf16>
    %cst_11 = arith.constant dense<0.000000e+00> : vector<128x256xf32>
    %22 = tpu.matmul %21, %1, %cst_11 {dimension_numbers = #tpu.dot_dimension_numbers<[1], [0], [0], [1], [0, 0, 1, 1], [], []>} : vector<128x14xbf16>, vector<14x256xbf16>, vector<128x256xf32> -> vector<128x256xf32>
    %23 = arith.addf %20, %22 : vector<128x256xf32>
    %c0_12 = arith.constant 0 : index
    %c0_13 = arith.constant 0 : index
    %24 = vector.load %arg5[%c0_12, %c0_13] : memref<128x1xf32, #tpu.memory_space<vmem>>, vector<128x1xf32>
    %25 = vector.broadcast %24 : vector<128x1xf32> to vector<128x256xf32>
    %26 = arith.addf %23, %25 : vector<128x256xf32>
    %cst_14 = arith.constant 0.000000e+00 : f32
    %27 = vector.broadcast %cst_14 : f32 to vector<128x256xf32>
    %28 = arith.maximumf %26, %27 : vector<128x256xf32>
    %c0_15 = arith.constant 0 : index
    %c0_16 = arith.constant 0 : index
    %29 = vector.load %arg6[%c0_15, %c0_16] : memref<128x128xbf16, #tpu.memory_space<vmem>>, vector<128x128xbf16>
    %30 = arith.truncf %28 : vector<128x256xf32> to vector<128x256xbf16>
    %cst_17 = arith.constant dense<0.000000e+00> : vector<128x256xf32>
    %31 = tpu.matmul %29, %30, %cst_17 {dimension_numbers = #tpu.dot_dimension_numbers<[1], [0], [0], [1], [0, 0, 1, 1], [], []>} : vector<128x128xbf16>, vector<128x256xbf16>, vector<128x256xf32> -> vector<128x256xf32>
    %c0_18 = arith.constant 0 : index
    %c0_19 = arith.constant 0 : index
    %32 = vector.load %arg7[%c0_18, %c0_19] : memref<128x1xf32, #tpu.memory_space<vmem>>, vector<128x1xf32>
    %33 = vector.broadcast %32 : vector<128x1xf32> to vector<128x256xf32>
    %34 = arith.addf %31, %33 : vector<128x256xf32>
    %cst_20 = arith.constant 0.000000e+00 : f32
    %35 = vector.broadcast %cst_20 : f32 to vector<128x256xf32>
    %36 = arith.maximumf %34, %35 : vector<128x256xf32>
    %c0_21 = arith.constant 0 : index
    %c0_22 = arith.constant 0 : index
    %37 = vector.load %arg8[%c0_21, %c0_22] : memref<3x128xbf16, #tpu.memory_space<vmem>>, vector<3x128xbf16>
    %38 = arith.truncf %36 : vector<128x256xf32> to vector<128x256xbf16>
    %cst_23 = arith.constant dense<0.000000e+00> : vector<3x256xf32>
    %39 = tpu.matmul %37, %38, %cst_23 {dimension_numbers = #tpu.dot_dimension_numbers<[1], [0], [0], [1], [0, 0, 1, 1], [], []>} : vector<3x128xbf16>, vector<128x256xbf16>, vector<3x256xf32> -> vector<3x256xf32>
    %c0_24 = arith.constant 0 : index
    %c0_25 = arith.constant 0 : index
    %40 = vector.load %arg9[%c0_24, %c0_25] : memref<3x1xf32, #tpu.memory_space<vmem>>, vector<3x1xf32>
    %41 = vector.broadcast %40 : vector<3x1xf32> to vector<3x256xf32>
    %42 = arith.addf %39, %41 : vector<3x256xf32>
    %cst_26 = arith.constant 0.000000e+00 : f32
    %43 = vector.broadcast %cst_26 : f32 to vector<3x256xf32>
    %44 = arith.subf %43, %42 : vector<3x256xf32>
    %45 = math.exp %44 : vector<3x256xf32>
    %cst_27 = arith.constant 1.000000e+00 : f32
    %46 = vector.broadcast %cst_27 : f32 to vector<3x256xf32>
    %47 = arith.addf %46, %45 : vector<3x256xf32>
    %48 = tpu.reciprocal %47 {approx = true} : vector<3x256xf32> -> vector<3x256xf32>
    %c0_28 = arith.constant 0 : index
    %c0_29 = arith.constant 0 : index
    %49 = vector.load %arg10[%c0_28, %c0_29] : memref<3x256xf32, #tpu.memory_space<vmem>>, vector<3x256xf32>
    tpu.vector_store %arg10[%c0_28, %c0_29], %48 {strides = array<i32>} : memref<3x256xf32, #tpu.memory_space<vmem>>, vector<3x256xf32>,
    return
  }
  func.func @transform_0(%arg0: i32) -> (i32, i32) {
    %c0_i32 = arith.constant 0 : i32
    %c0_i32_0 = arith.constant 0 : i32
    return %c0_i32, %arg0 : i32, i32
  }
  func.func @transform_1(%arg0: i32) -> (i32, i32) {
    %c0_i32 = arith.constant 0 : i32
    %c0_i32_0 = arith.constant 0 : i32
    %c0_i32_1 = arith.constant 0 : i32
    return %c0_i32, %c0_i32_0 : i32, i32
  }
  func.func @transform_2(%arg0: i32) -> (i32, i32) {
    %c0_i32 = arith.constant 0 : i32
    %c0_i32_0 = arith.constant 0 : i32
    %c0_i32_1 = arith.constant 0 : i32
    return %c0_i32, %c0_i32_0 : i32, i32
  }
  func.func @transform_3(%arg0: i32) -> (i32, i32) {
    %c0_i32 = arith.constant 0 : i32
    %c0_i32_0 = arith.constant 0 : i32
    %c0_i32_1 = arith.constant 0 : i32
    return %c0_i32, %c0_i32_0 : i32, i32
  }
  func.func @transform_4(%arg0: i32) -> (i32, i32) {
    %c0_i32 = arith.constant 0 : i32
    %c0_i32_0 = arith.constant 0 : i32
    %c0_i32_1 = arith.constant 0 : i32
    return %c0_i32, %c0_i32_0 : i32, i32
  }
  func.func @transform_5(%arg0: i32) -> (i32, i32) {
    %c0_i32 = arith.constant 0 : i32
    %c0_i32_0 = arith.constant 0 : i32
    %c0_i32_1 = arith.constant 0 : i32
    return %c0_i32, %c0_i32_0 : i32, i32
  }
  func.func @transform_6(%arg0: i32) -> (i32, i32) {
    %c0_i32 = arith.constant 0 : i32
    %c0_i32_0 = arith.constant 0 : i32
    %c0_i32_1 = arith.constant 0 : i32
    return %c0_i32, %c0_i32_0 : i32, i32
  }
  func.func @transform_7(%arg0: i32) -> (i32, i32) {
    %c0_i32 = arith.constant 0 : i32
    %c0_i32_0 = arith.constant 0 : i32
    %c0_i32_1 = arith.constant 0 : i32
    return %c0_i32, %c0_i32_0 : i32, i32
  }
  func.func @transform_8(%arg0: i32) -> (i32, i32) {
    %c0_i32 = arith.constant 0 : i32
    %c0_i32_0 = arith.constant 0 : i32
    %c0_i32_1 = arith.constant 0 : i32
    return %c0_i32, %c0_i32_0 : i32, i32
  }
  func.func @transform_9(%arg0: i32) -> (i32, i32) {
    %c0_i32 = arith.constant 0 : i32
    %c0_i32_0 = arith.constant 0 : i32
    return %c0_i32, %arg0 : i32, i32
  }
}

</mosaic_0001>

<bundles_post_ra>
// kernel: mlp_render_pe_pallas.2
= control target key start
LH: loop header
LB: loop body
LE: loop exit
PB: predicated region body
PF: predicated region fallthrough
CT: control target
= control target key end

     0   :  { %s6763_s0 = inlined_call_operand.vmem [shape: bf16[72,14], index: 0, kind: input, shape index: {}]   ;;  %s6764_s1 = inlined_call_operand.vmem [shape: bf16[128,72], index: 1, kind: input, shape index: {}]   ;;  %s6765_s2 = inlined_call_operand.vmem [shape: bf16[128,14], index: 2, kind: input, shape index: {}]   ;;  %s6766_s3 = inlined_call_operand.vmem [shape: f32[128,1], index: 3, kind: input, shape index: {}]   ;;  %s6767_s4 = inlined_call_operand.vmem [shape: bf16[128,128], index: 4, kind: input, shape index: {}]   ;;  %s6768_s5 = inlined_call_operand.vmem [shape: f32[128,1], index: 5, kind: input, shape index: {}]   ;;  %s6769_s6 = inlined_call_operand.vmem [shape: bf16[3,128], index: 6, kind: input, shape index: {}]   ;;  %s6770_s7 = inlined_call_operand.vmem [shape: f32[3,1], index: 7, kind: input, shape index: {}]   ;;  %s6771_s8 = inlined_call_operand.vmem [shape: f32[3,300], index: 8, kind: input, shape index: {}]   ;;  %s6772_s9 = inlined_call_operand.<no memory space> [shape: f32[], index: 9, kind: input, shape index: {}]   ;;  %s6773_s10 = inlined_call_operand.vmem [shape: f32[3,300], index: 10, kind: input, shape index: {}]   ;;  %s6774_s11 = inlined_call_operand.vmem [shape: f32[8,300], index: 11, kind: input, shape index: {}]   ;;  %s6775_s12 = inlined_call_operand.hbm [shape: f32[3,300], index: 12, kind: output, shape index: {}]  }
   0x1   :  { %v4599_v0 = vstv %s6772_s9 }
   0x2   :  { %6864 = vst [vmem:[#allocation21_spill] sm:$0xff] %v4599_v0 }
   0x3   :  { %20 = vsyncpa [#allocation18], 0 }
   0x4   :  { %22 = vsyncpa [#allocation18 + $0x1], 0  ;;  %s4601_s23 = smov 0   ;;  %s4603_s24 = smov 0  }
   0x5   :  { %s4605_s25 = smov 0   ;;  %s4607_s26 = smov 0  }
   0x6 LB: > { %6866 = sst [smem:[#allocation22_spill]] %s4508_s23  ;;  %s4622_s9 = sadd.s32 4294967295, %s4520_s26   ;;  %s4508_s23 = sphi %s4601_s23, %s7039_s23   ;;  %s4520_s26 = sphi %s4607_s26, %s7036_s26   ;;  %s4516_s25 = sphi %s4605_s25, %s7038_s25   ;;  %s4512_s24 = sphi %s4603_s24, %s7040_s24  }
   0x7   : > { %6867 = sst [smem:[#allocation23_spill]] %s4516_s25  ;;  %s3999_s27 = sadd.s32 4294967294, %s4520_s26  }
   0x8   : > { %s4626_s28 = sadd.s32 1, %s4520_s26   ;;  %s289_s29 = sadd.s32 1, %s4516_s25 }
   0x9   : > { %v6865_v0 = vld [vmem:[#allocation21_spill] sm:$0xff]  ;;  %6868 = sst [smem:[#allocation24_spill]] %s4626_s28  ;;  %s286_s30 = ssub.s32 %s4520_s26, %s4626_s28 }
   0xa   : > { %p299_p0 = scmp.ne.s32.totalorder %s4516_s25, %s4512_s24  ;;  %p287_p1 = scmp.eq.s32.totalorder %s286_s30, 0 }
   0xb   : > { %p300_p2 = scmp.eq.s32.totalorder %s4622_s9, 1  ;;  %p305_p3 = scmp.ne.s32.totalorder %s4512_s24, %s4508_s23 }
   0xc   : > { %p306_p4 = scmp.eq.s32.totalorder %s3999_s27, 1  ;;  %p4002_p7 = scmp.ge.s32.totalorder %s4520_s26, 1 }
   0xd   : > { %s4637_s13 = scalar_select %p287_p1, %s4516_s25, %s289_s29  }
   0xe   : > { %p4639_p5 = por %p300_p2, %p299_p0  ;;  %p4643_p6 = por %p306_p4, %p305_p3 }
   0xf   : > { %6869 = sst [smem:[#allocation25_spill]] %s4637_s13  ;;  %p419_p8 = scmp.lt.s32.totalorder %s4520_s26, 3 }
  0x10   : > { %s6871_s15 = scalar_select %p4643_p6, 1, 0 }
  0x11   : > { %p420_p9 = pnand %p4002_p7, %p419_p8 }
  0x12   : > { %6872 = sst [smem:[#allocation26_spill]] %s6871_s15 }
  0x13   : > { %423 = sbr.rel (%p420_p9) target bundleno = 1624 (0x658), region = 64 }
  0x1a   : > { %s4650_s16 = sshll.u32 %s4622_s9, 1  ;;  %s4165_s17 = sshll.u32 %s4622_s9, 8  ;;  %v578_v1 = vlaneseq  ;;  %v6781_v2 = vmov 0   ;;  %vm626_vm0 = vcmask 1044480   ;;  %vm826_vm7 = vcmask 1046528  }
  0x1b   : > { %p505_p10 = scmp.lt.s32.totalorder %s4650_s16, 2  ;;  %s595_s18 = sadd.s32 1, %s4650_s16  ;;  %865 = vmatprep.mubr.bf16.mxu0 %v6781_v2  ;;  %3057 = vmatprep.mubr.bf16.mxu1 %v6781_v2  ;;  %v580_v5 = vstv %s4165_s17  ;;  %vm810_vm8 = vcmask 113664  }
  0x1c   : > { %v579_v3 = vand.u32 127, %v578_v1  ;;  %s597_s19 = ssub.s32 2, %s595_s18  ;;  %s4167_s20 = sadd.s32 128, %s4165_s17  ;;  %v4657_v4 = vshrl.u32 %v578_v1, 7  ;;  %4347 = vset.pattern.permute.xlu0 %v6781_v2  ;;  %4348 = vset.pattern.permute.xlu1 %v6781_v2 }
  0x1d   : > { %s506_s21 = scalar_select %p505_p10, %s4650_s16, 2  ;;  %v619_v6 = vstv %s4167_s20  ;;  %v649_v7 = vstv %s597_s19 }
  0x1e   : > { %p599_p11 = scmp.lt.s32.totalorder %s597_s19, 0  ;;  %s606_s22 = sor.u32 4294967294, %s597_s19  ;;  %v673_v8 = vadd.s32 16, %v4657_v4  ;;  %v688_v9 = vadd.s32 8, %v4657_v4  ;;  %v620_v11 = vadd.s32 %v619_v6, %v579_v3  ;;  %v581_v12 = vadd.s32 %v580_v5, %v579_v3  ;;  %v4349_v3 = vld [vmem:[%s6763_s0] sm:$0xff]   ;;  %v4350_v5 = vld [vmem:[%s6763_s0 + $0x8] sm:$0xff]  }
  0x1f   : > { %s4005_s27 = sshll.u32 %s506_s21, 2  ;;  %s4011_s29 = sshll.u32 %s506_s21, 3  ;;  %v607_v10 = vstv %s606_s22  ;;  %vm4673_vm3 = vcmp.lt.s32.totalorder %v649_v7, 0  ;;  %v4351_v6 = vld [vmem:[%s6763_s0 + $0x10] sm:$0xff]   ;;  %v4352_v7 = vld [vmem:[%s6763_s0 + $0x18] sm:$0xff]  }
  0x20   : > { %s510_s18 = scalar_lea.vmem %s6771_s8, %s4005_s27  ;;  %s534_s20 = scalar_lea.vmem %s6773_s10, %s4005_s27  ;;  %vm674_vm1 = vcmp.lt.s32.totalorder %v673_v8, 19  ;;  %vm689_vm2 = vcmp.lt.s32.totalorder %v688_v9, 11  ;;  %vm582_vm4 = vcmp.lt.s32.totalorder %v581_v12, 300  ;;  %vm608_vm5 = vcmp.lt.s32.totalorder %v607_v10, 0  ;;  %v4353_v8 = vld [vmem:[%s6763_s0 + $0x20] ss:$0 sps:$4 sm:$0xff]  }
  0x21   : > { %s551_s23 = scalar_lea.vmem %s6774_s11, %s4011_s29  ;;  %v567_v14 = vld [vmem:[%s510_s18] sm:$0x7]  ;;  %vm621_vm6 = vcmp.lt.s32.totalorder %v620_v11, 300  ;;  %s3892_s22 = ssub.s32 (%p4639_p5), 3, %s4650_s16 }
  0x22   : > { %v574_v15 = vld [vmem:[%s534_s20] sm:$0x7]  ;;  %s600_s21 = scalar_select %p599_p11, 0, 255  ;;  %v675_v17 = vsel %vm674_vm1, %v567_v14, %v6865_v0 }
  0x23   : > { %v576_v16 = vld [vmem:[%s551_s23] sm:$0xff]  ;;  %v690_v18 = vsel %vm689_vm2, %v574_v15, %v6865_v0  ;;  %v682_v20 = vsel %vm582_vm4, %v675_v17, %v6865_v0  ;;  %p3893_p12 = scmp.lt.s32.totalorder (%p4639_p5), %s3892_s22, 2 }
  0x24   : > { %v583_v19 = vsel %vm582_vm4, %v576_v16, %v6865_v0  ;;  %v697_v21 = vsel %vm582_vm4, %v690_v18, %v6865_v0  ;;  %s601_s25 = sand.u32 15, %s600_s21  ;;  %v4019_v22 = vld [vmem:[%s551_s23 + $0x8] sm:%s600_s21]  ;;  %v684_v24 = vsel %vm626_vm0, %v682_v20, %v6865_v0  ;;  %s492_s23 = sand.u32 1, %s4512_s24  }
  0x25   : > { %v586_v23 = vmax.f32 %v583_v19, %v6865_v0  ;;  %v700_v25 = vmax.f32 %v6865_v0, %v697_v21  ;;  %s602_s28 = sand.u32 7, %s601_s25  ;;  %v651_v26 = vsel %vm4673_vm3, %v6865_v0, %v4019_v22  ;;  %v685_v27 = vrot.slane %v684_v24, 5  ;;  %s4003_s13 = sshll.u32 %s492_s23, 3 }
  0x26   : > { %v4016_v28 = vld [vmem:[%s510_s18 + $0x4] sm:%s602_s28]  ;;  %v659_v30 = vsel %vm621_vm6, %v651_v26, %v6865_v0  ;;  %s494_s15 = scalar_lea.vmem [#allocation17], %s4003_s13  ;;  %s6709_s19 = scalar_lea.sflag [#allocation18], %s492_s23 }
  0x27   : > { %v4018_v29 = vld [vmem:[%s534_s20 + $0x4] sm:%s602_s28]  ;;  %v590_v31 = vmax.f32 %v586_v23, %v6865_v0  ;;  %v609_v32 = vsel %vm608_vm5, %v6865_v0, %v4016_v28  ;;  %v662_v33 = vmax.f32 %v659_v30, %v6865_v0  ;;  %v714_v34 = vsel %vm4673_vm3, %v6865_v0, %v4016_v28 }
  0x28   : > { %v736_v35 = vsel %vm4673_vm3, %v6865_v0, %v4018_v29  ;;  %v622_v36 = vsel %vm621_vm6, %v609_v32, %v6865_v0  ;;  %v719_v37 = vsel %vm674_vm1, %v714_v34, %v6865_v0  ;;  %v704_v39 = vmax.f32 %v700_v25, %v685_v27 }
  0x29   : > { %v741_v38 = vsel %vm689_vm2, %v736_v35, %v6865_v0  ;;  %v627_v40 = vsel %vm626_vm0, %v6865_v0, %v622_v36  ;;  %v727_v41 = vsel %vm621_vm6, %v719_v37, %v6865_v0 }
  0x2a   : > { %v749_v42 = vsel %vm621_vm6, %v741_v38, %v6865_v0  ;;  %v628_v43 = vrot.slane %v627_v40, 5  ;;  %v729_v44 = vsel %vm626_vm0, %v727_v41, %v6865_v0  ;;  %708 = vst [vmem:[#allocation19 + $0x10] sm:$0xff] %v704_v39 }
  0x2b   : > { %v752_v45 = vmax.f32 %v6865_v0, %v749_v42  ;;  %v730_v46 = vrot.slane %v729_v44, 5 }
  0x2c   : > { %v666_v47 = vmax.f32 %v662_v33, %v628_v43 }
  0x2d   : > { %v756_v48 = vmax.f32 %v752_v45, %v730_v46 }
  0x2f   : > { %760 = vst [vmem:[#allocation19 + $0x18] sm:$0xff] %v756_v48 }
  0x31   : > { %v764_v49 = vld [vmem:[#allocation19 + $0x10] sm:$0x3f] }
  0x32   : > { %v766_v50 = vpack.c.bf16 %v764_v49, %v590_v31 }
  0x34   : > { %v768_v51 = vunpack.c.l.bf16 %v766_v50  ;;  %v770_v52 = vunpack.c.h.bf16 %v766_v50  ;;  %v915_v60 = vsel %vm826_vm7, %v766_v50, 0 }
  0x36   : > { %v765_v53 = vld [vmem:[#allocation19 + $0x18] sm:$0x3f]  ;;  %v772_v54 = vsub.f32 %v590_v31, %v768_v51  ;;  %v774_v55 = vsub.f32 %v764_v49, %v770_v52  ;;  %v6794_v51 = vmov 2475754826  }
  0x37   : > { %v767_v56 = vpack.c.bf16 %v765_v53, %v666_v47 }
  0x38   : > { %v776_v59 = vpack.c.bf16 %v774_v55, %v772_v54  ;;  %v6790_v55 = vmov 2102212464  }
  0x39   : > { %v769_v57 = vunpack.c.l.bf16 %v767_v56  ;;  %v771_v58 = vunpack.c.h.bf16 %v767_v56  ;;  %4122 = vmatprep.subr.msk.bf16.mxu1 %vm826_vm7, %v767_v56 }
  0x3a   : > { %3026 = vmatpush1.bf16.msra.mxu1 %v915_v60  ;;  %v828_v1 = vsel %vm826_vm7, %v776_v59, 0 }
  0x3b   : > { %v773_v61 = vsub.f32 %v666_v47, %v769_v57  ;;  %v775_v62 = vsub.f32 %v765_v53, %v771_v58  ;;  %v6796_v47 = vmov 683565275   ;;  %v6792_v53 = vmov 2131351028  }
  0x3c   : > { %v6785_v57 = vmov 920167782  }
  0x3d   : > { %v777_v63 = vpack.c.bf16 %v775_v62, %v773_v61 }
  0x3f   : > { %4030 = vmatprep.subr.msk.bf16.mxu0 %vm826_vm7, %v777_v63 }
  0x40   : > { %834 = vmatpush1.bf16.msra.mxu0 %v828_v1  ;;  %v6787_v1 = vmov 1326507024  }
  0x41   : > { %4036 = vmatprep.subr.msk.bf16.mxu0 %vm826_vm7, %v767_v56 }
  0x43   : > { %4031 = vmatmul.mubr.msk.bf16.vlgmr.msra.gmra.mrb[0].mxu0 %vm810_vm8, %v4349_v3 }
  0x44   : > { %875 = vmatprep.mubr.bf16.mxu0 %v6781_v2  ;;  %921 = vmatpush1.bf16.msra.mxu0 %v915_v60 }
  0x4b   : > { %4032 = vmatmul.mubr.msk.bf16.gmra.mrb[4].mxu0 %vm810_vm8, %v4350_v5 }
  0x4c   : > { %885 = vmatprep.mubr.bf16.mxu0 %v6781_v2 }
  0x53   : > { %4033 = vmatmul.mubr.msk.bf16.gmra.mrb[8].mxu0 %vm810_vm8, %v4351_v6 }
  0x54   : > { %895 = vmatprep.mubr.bf16.mxu0 %v6781_v2 }
  0x5b   : > { %4034 = vmatmul.mubr.msk.bf16.gmra.mrb[12].mxu0 %vm810_vm8, %v4352_v7 }
  0x5c   : > { %905 = vmatprep.mubr.bf16.mxu0 %v6781_v2 }
  0x63   : > { %4035 = vmatmul.mubr.msk.bf16.gmra.mrb[16].mxu0 %vm810_vm8, %v4353_v8 }
  0x64   : > { %952 = vmatprep.mubr.bf16.mxu0 %v6781_v2 }
  0x6b   : > { %4037 = vmatmul.mubr.msk.bf16.vlgmr.msra.gmra.mrb[0].mxu0 %vm810_vm8, %v4349_v3 }
  0x6c   : > { %962 = vmatprep.mubr.bf16.mxu0 %v6781_v2 }
  0x73   : > { %4038 = vmatmul.mubr.msk.bf16.gmra.mrb[4].mxu0 %vm810_vm8, %v4350_v5 }
  0x74   : > { %972 = vmatprep.mubr.bf16.mxu0 %v6781_v2 }
  0x7b   : > { %4039 = vmatmul.mubr.msk.bf16.gmra.mrb[8].mxu0 %vm810_vm8, %v4351_v6 }
  0x7c   : > { %982 = vmatprep.mubr.bf16.mxu0 %v6781_v2 }
  0x83   : > { %4040 = vmatmul.mubr.msk.bf16.gmra.mrb[12].mxu0 %vm810_vm8, %v4352_v7 }
  0x84   : > { %992 = vmatprep.mubr.bf16.mxu0 %v6781_v2 }
  0x8b   : > { %4041 = vmatmul.mubr.msk.bf16.gmra.mrb[20].mxu0 %vm810_vm8, %v4353_v8 }
  0x8c   : > { %3691 = vmatprep.mubr.bf16.mxu0 %v6781_v2 }
 0x136   : > { %v4754_v9 = vpop.f32.mrb[16].mxu0 }
 0x137   : > { %v4756_v10 = vpop.f32.mrb[17].mxu0 }
 0x138   : > { %v911_v11 = vpop.f32.mrb[18].mxu0 }
 0x139   : > { %v912_v12 = vpop.f32.mrb[19].mxu0 }
 0x13e   : > { %v4758_v13 = vpop.f32.mrb[0].mxu0 }
 0x13f   : > { %6875 = vst [vmem:[#allocation27_spill] sm:$0xff] %v4758_v13  ;;  %v1047_v14 = vand.u32 2147483647, %v4758_v13  ;;  %v1050_v15 = vand.u32 2139095040, %v4758_v13  ;;  %v4762_v16 = vpop.f32.mrb[1].mxu0 }
 0x140   : > { %6876 = vst [vmem:[#allocation28_spill] sm:$0xff] %v4762_v16  ;;  %v1151_v17 = vand.u32 2147483647, %v4762_v16  ;;  %v1154_v18 = vand.u32 2139095040, %v4762_v16  ;;  %v4766_v19 = vpop.f32.mrb[2].mxu0 }
 0x141   : > { %6877 = vst [vmem:[#allocation29_spill] sm:$0xff] %v4766_v19  ;;  %v1051_v20 = vshrl.u32 %v1050_v15, 23  ;;  %v1054_v21 = vand.u32 8388607, %v1047_v14  ;;  %v1258_v24 = vand.u32 2139095040, %v4766_v19  ;;  %v4773_v26 = vpop.f32.mrb[3].mxu0 }
 0x142   : > { %v1155_v22 = vshrl.u32 %v1154_v18, 23  ;;  %v1158_v23 = vand.u32 8388607, %v1151_v17  ;;  %v1255_v44 = vand.u32 2147483647, %v4766_v19 }
 0x143   : > { %v4042_v25 = vadd.s32 4294967169, %v1051_v20  ;;  %v1259_v28 = vshrl.u32 %v1258_v24, 23  ;;  %v1055_v30 = vor.u32 8388608, %v1054_v21 }
 0x144   : > { %v4046_v27 = vadd.s32 4294967169, %v1155_v22  ;;  %v1159_v31 = vor.u32 8388608, %v1158_v23 }
 0x145   : > { %v1057_v29 = vadd.s32 1, %v4042_v25  ;;  %v4050_v33 = vadd.s32 4294967169, %v1259_v28  ;;  %v4783_v42 = vshll.u32 %v1055_v30, 8 }
 0x146   : > { %v1161_v32 = vadd.s32 1, %v4046_v27  ;;  %v4775_v34 = vpop.f32.mrb[4].mxu0  ;;  %v4785_v43 = vshll.u32 %v1159_v31, 8 }
 0x147   : > { %6878 = vst [vmem:[#allocation30_spill] sm:$0xff] %v4775_v34  ;;  %vm1058_vm9 = vcmp.gt.s32.totalorder %v1057_v29, 0  ;;  %v4777_v35 = vpop.f32.mrb[5].mxu0  ;;  %v4788_v45 = vadd.s32 1, %v4050_v33 }
 0x148   : > { %6879 = vst [vmem:[#allocation31_spill] sm:$0xff] %v4777_v35  ;;  %v1059_v36 = vsel %vm1058_vm9, %v1057_v29, 0  ;;  %vm1162_vm10 = vcmp.gt.s32.totalorder %v1161_v32, 0  ;;  %v4779_v37 = vpop.f32.mrb[6].mxu0 }
 0x149   : > { %6880 = vst [vmem:[#allocation32_spill] sm:$0xff] %v4779_v37  ;;  %v1060_v38 = vshrl.u32 %v1059_v36, 5  ;;  %v1061_v39 = vand.u32 31, %v1059_v36  ;;  %v1163_v40 = vsel %vm1162_vm10, %v1161_v32, 0  ;;  %v4781_v41 = vpop.f32.mrb[7].mxu0  ;;  %vm1266_vm15 = vcmp.gt.s32.totalorder %v4788_v45, 0 }
 0x14a   : > { %v4791_v49 = vshrl.u32 %v1163_v40, 5  ;;  %v1165_v50 = vand.u32 31, %v1163_v40 }
 0x14b   : > { %v1062_v46 = vsub.s32 32, %v1061_v39  ;;  %v1064_v48 = vshll.u32 %v6796_v47, %v1061_v39  ;;  %v1067_v52 = vshll.u32 %v6794_v51, %v1061_v39  ;;  %v1070_v54 = vshll.u32 %v6792_v53, %v1061_v39 }
 0x14c   : > { %v1073_v56 = vshll.u32 %v6790_v55, %v1061_v39  ;;  %v1076_v58 = vshll.u32 %v6785_v57, %v1061_v39  ;;  %vm1079_vm11 = vcmp.lt.s32.totalorder %v1060_v38, 1  ;;  %vm1080_vm12 = vcmp.lt.s32.totalorder %v1060_v38, 2 }
 0x14d   : > { %v1065_v59 = vshrl.u32 %v6794_v51, %v1062_v46  ;;  %v1068_v60 = vshrl.u32 %v6792_v53, %v1062_v46  ;;  %v1071_v61 = vshrl.u32 %v6790_v55, %v1062_v46  ;;  %v1063_v62 = vshrl.u32 %v6796_v47, %v1062_v46 }
 0x14e   : > { %v1074_v63 = vshrl.u32 %v6785_v57, %v1062_v46  ;;  %v1077_v3 = vshrl.u32 %v6787_v1, %v1062_v46  ;;  %v1166_v8 = vsub.s32 32, %v1165_v50  ;;  %vm1081_vm13 = vcmp.lt.s32.totalorder %v1060_v38, 3 }
 0x14f   : > { %v1066_v5 = vor.u32 %v1065_v59, %v1064_v48  ;;  %v1069_v6 = vor.u32 %v1068_v60, %v1067_v52  ;;  %v1072_v7 = vor.u32 %v1071_v61, %v1070_v54  ;;  %vm1082_vm14 = vcmp.lt.s32.totalorder %v1060_v38, 4 }
 0x150   : > { %v1075_v11 = vor.u32 %v1074_v63, %v1073_v56  ;;  %v1078_v12 = vor.u32 %v1077_v3, %v1076_v58  ;;  %v1168_v25 = vshll.u32 %v6796_v47, %v1165_v50  ;;  %v1169_v29 = vshrl.u32 %v6794_v51, %v1166_v8 }
 0x151   : > { %v1083_v15 = vsel %vm1079_vm11, %v1063_v62, %v1066_v5  ;;  %v1084_v18 = vsel %vm1082_vm14, %v1072_v7, 2102212464  ;;  %v1087_v20 = vsel %vm1079_vm11, %v1066_v5, %v1069_v6  ;;  %v1091_v21 = vsel %vm1079_vm11, %v1069_v6, %v1072_v7  ;;  %v4832_v5 = vpop.f32.mrb[8].mxu0 }
 0x152   : > { %v1085_v22 = vsel %vm1081_vm13, %v1069_v6, %v1084_v18  ;;  %v1088_v23 = vsel %vm1082_vm14, %v1075_v11, 920167782  ;;  %v1092_v24 = vsel %vm1082_vm14, %v1078_v12, 1326507024  ;;  %v1171_v30 = vshll.u32 %v6794_v51, %v1165_v50 }
 0x153   : > { %v1089_v27 = vsel %vm1081_vm13, %v1072_v7, %v1088_v23  ;;  %v1093_v28 = vsel %vm1081_vm13, %v1075_v11, %v1092_v24  ;;  %v1086_v31 = vsel %vm1080_vm12, %v1083_v15, %v1085_v22  ;;  %v1172_v36 = vshrl.u32 %v6792_v53, %v1166_v8 }
 0x154   : > { %v1090_v32 = vsel %vm1080_vm12, %v1087_v20, %v1089_v27  ;;  %v1094_v33 = vsel %vm1080_vm12, %v1091_v21, %v1093_v28  ;;  %v1170_v52 = vor.u32 %v1169_v29, %v1168_v25  ;;  %v1174_v56 = vshll.u32 %v6792_v53, %v1165_v50 }
 0x155   : > { %v4815_v39 = vmul.u32.u64.low %v4783_v42, %v1094_v33  ;;  %v4816_v40 = vmul.u32.u64.high %v4783_v42, %v1094_v33, %v4815_v39  ;;  %v4819_v46 = vmul.u32.u64.low %v4783_v42, %v1090_v32  ;;  %v4820_v48 = vmul.u32.u64.high %v4783_v42, %v1090_v32, %v4819_v46 }
 0x156   : > { %v1173_v54 = vor.u32 %v1172_v36, %v1171_v30  ;;  %v1175_v58 = vshrl.u32 %v6790_v55, %v1166_v8  ;;  %v1167_v38 = vshrl.u32 %v6796_v47, %v1166_v8  ;;  %v1177_v59 = vshll.u32 %v6790_v55, %v1165_v50 }
 0x157   : > { %v1178_v60 = vshrl.u32 %v6785_v57, %v1166_v8  ;;  %v1181_v61 = vshrl.u32 %v6787_v1, %v1166_v8  ;;  %v1102_v62 = vmul.u32 %v4783_v42, %v1086_v31  ;;  %v1180_v3 = vshll.u32 %v6785_v57, %v1165_v50 }
 0x158   : > { %v1176_v63 = vor.u32 %v1175_v58, %v1174_v56  ;;  %vm1183_vm0 = vcmp.lt.s32.totalorder %v4791_v49, 1  ;;  %vm1104_vm1 = vc.u32 %v4816_v40, %v4819_v46  ;;  %v1105_v6 = vadd.s32 1, %v4820_v48 }
 0x159   : > { %v1179_v7 = vor.u32 %v1178_v60, %v1177_v59  ;;  %vm1184_vm2 = vcmp.lt.s32.totalorder %v4791_v49, 2  ;;  %v1182_v11 = vor.u32 %v1181_v61, %v1180_v3  ;;  %vm1185_vm3 = vcmp.lt.s32.totalorder %v4791_v49, 3 }
 0x15a   : > { %vm1186_vm4 = vcmp.lt.s32.totalorder %v4791_v49, 4  ;;  %v1191_v42 = vsel %vm1183_vm0, %v1170_v52, %v1173_v54  ;;  %v1106_v50 = vsel %vm1104_vm1, %v1105_v6, %v4820_v48  ;;  %v1195_v15 = vsel %vm1183_vm0, %v1173_v54, %v1176_v63 }
 0x15b   : > { %v1188_v8 = vsel %vm1186_vm4, %v1176_v63, 2102212464  ;;  %v1192_v12 = vsel %vm1186_vm4, %v1179_v7, 920167782  ;;  %v1107_v18 = vadd.s32 %v1106_v50, %v1102_v62  ;;  %v1187_v20 = vsel %vm1183_vm0, %v1167_v38, %v1170_v52 }
 0x15c   : > { %v1193_v21 = vsel %vm1185_vm3, %v1176_v63, %v1192_v12  ;;  %v1196_v22 = vsel %vm1186_vm4, %v1182_v11, 1326507024  ;;  %v1189_v23 = vsel %vm1185_vm3, %v1173_v54, %v1188_v8  ;;  %v1267_v27 = vsel %vm1266_vm15, %v4788_v45, 0 }
 0x15d   : > { %v1194_v24 = vsel %vm1184_vm2, %v1191_v42, %v1193_v21  ;;  %v1197_v25 = vsel %vm1185_vm3, %v1179_v7, %v1196_v22  ;;  %v1108_v28 = vadd.s32 536870912, %v1107_v18  ;;  %v1262_v36 = vand.u32 8388607, %v1255_v44 }
 0x15e   : > { %v1198_v29 = vsel %vm1184_vm2, %v1195_v15, %v1197_v25  ;;  %v4849_v30 = vmul.u32.u64.low %v4785_v43, %v1194_v24  ;;  %v4850_v31 = vmul.u32.u64.high %v4785_v43, %v1194_v24, %v4849_v30  ;;  %v1190_v45 = vsel %vm1184_vm2, %v1187_v20, %v1189_v23 }
 0x15f   : > { %v4854_v32 = vmul.u32.u64.low %v4785_v43, %v1198_v29  ;;  %v4855_v33 = vmul.u32.u64.high %v4785_v43, %v1198_v29, %v4854_v32  ;;  %v4859_v39 = vshrl.u32 %v1108_v28, 30  ;;  %v1269_v48 = vand.u32 31, %v1267_v27 }
 0x160   : > { %v1362_v52 = vand.u32 2139095040, %v4773_v26  ;;  %v1209_v56 = vadd.s32 1, %v4850_v31  ;;  %v1206_v38 = vmul.u32 %v4785_v43, %v1190_v45  ;;  %v1263_v59 = vor.u32 8388608, %v1262_v36  ;;  %v4886_v32 = vpop.f32.mrb[9].mxu0 }
 0x161   : > { %v1110_v54 = vshll.u32 %v4859_v39, 30  ;;  %v1270_v58 = vsub.s32 32, %v1269_v48  ;;  %vm1208_vm5 = vc.u32 %v4855_v33, %v4849_v30  ;;  %v1272_v49 = vshll.u32 %v6796_v47, %v1269_v48 }
 0x162   : > { %v1210_v61 = vsel %vm1208_vm5, %v1209_v56, %v4850_v31  ;;  %v1363_v62 = vshrl.u32 %v1362_v52, 23  ;;  %v1275_v6 = vshll.u32 %v6794_v51, %v1269_v48  ;;  %v1268_v11 = vshrl.u32 %v1267_v27, 5 }
 0x163   : > { %v4869_v60 = vsub.s32 %v1107_v18, %v1110_v54  ;;  %v1211_v63 = vadd.s32 %v1210_v61, %v1206_v38  ;;  %v1273_v3 = vshrl.u32 %v6794_v51, %v1270_v58  ;;  %v1276_v7 = vshrl.u32 %v6792_v53, %v1270_v58 }
 0x164   : > { %v1278_v42 = vshll.u32 %v6792_v53, %v1269_v48  ;;  %v1279_v50 = vshrl.u32 %v6790_v55, %v1270_v58  ;;  %v1281_v21 = vshll.u32 %v6790_v55, %v1269_v48  ;;  %v1282_v22 = vshrl.u32 %v6785_v57, %v1270_v58 }
 0x165   : > { %v1113_v43 = vsub.s32 0, %v4869_v60  ;;  %v1212_v8 = vadd.s32 536870912, %v1211_v63  ;;  %v1274_v12 = vor.u32 %v1273_v3, %v1272_v49  ;;  %v1277_v15 = vor.u32 %v1276_v7, %v1275_v6 }
 0x166   : > { %v1280_v20 = vor.u32 %v1279_v50, %v1278_v42  ;;  %v1284_v24 = vshll.u32 %v6785_v57, %v1269_v48  ;;  %v1285_v25 = vshrl.u32 %v6787_v1, %v1270_v58  ;;  %v1303_v27 = vshll.u32 %v1263_v59, 8 }
 0x167   : > { %v4043_v18 = vmin.u32 %v1113_v43, %v4869_v60  ;;  %v4882_v23 = vshrl.u32 %v1212_v8, 30  ;;  %v1283_v29 = vor.u32 %v1282_v22, %v1281_v21  ;;  %vm1287_vm6 = vcmp.lt.s32.totalorder %v1268_v11, 1 }
 0x168   : > { %v4054_v31 = vadd.s32 4294967169, %v1363_v62  ;;  %v1286_v45 = vor.u32 %v1285_v25, %v1284_v24  ;;  %vm1289_vm7 = vcmp.lt.s32.totalorder %v1268_v11, 3  ;;  %vm1290_vm9 = vcmp.lt.s32.totalorder %v1268_v11, 4 }
 0x169   : > { %v1115_v28 = vclz %v4043_v18  ;;  %v1214_v36 = vshll.u32 %v4882_v23, 30  ;;  %v1295_v54 = vsel %vm1287_vm6, %v1274_v12, %v1277_v15  ;;  %v1296_v56 = vsel %vm1290_vm9, %v1283_v29, 920167782 }
 0x16a   : > { %v1299_v48 = vsel %vm1287_vm6, %v1277_v15, %v1280_v20  ;;  %vm1288_vm10 = vcmp.lt.s32.totalorder %v1268_v11, 2  ;;  %v1297_v59 = vsel %vm1289_vm7, %v1280_v20, %v1296_v56  ;;  %v1300_v61 = vsel %vm1290_vm9, %v1286_v45, 1326507024 }
 0x16b   : > { %v4044_v52 = vadd.s32 4294967294, %v1115_v28  ;;  %v4891_v38 = vsub.s32 %v1211_v63, %v1214_v36  ;;  %v1271_v49 = vshrl.u32 %v6796_v47, %v1270_v58  ;;  %v1292_v62 = vsel %vm1290_vm9, %v1280_v20, 2102212464 }
 0x16c   : > { %v1301_v3 = vsel %vm1289_vm7, %v1283_v29, %v1300_v61  ;;  %v1298_v43 = vsel %vm1288_vm10, %v1295_v54, %v1297_v59  ;;  %v1293_v18 = vsel %vm1289_vm7, %v1277_v15, %v1292_v62  ;;  %v6784_v25 = vand.u32 2147483647, %v4773_v26 }
 0x16d   : > { %vm4045_vm11 = vcmp.lt.s32.totalorder %v4044_v52, 0  ;;  %v1217_v7 = vsub.s32 0, %v4891_v38  ;;  %v1302_v42 = vsel %vm1288_vm10, %v1299_v48, %v1301_v3  ;;  %v1291_v63 = vsel %vm1287_vm6, %v1271_v49, %v1274_v12 }
 0x16e   : > { %v1118_v6 = vsel %vm4045_vm11, 0, %v4044_v52  ;;  %v4902_v21 = vmul.u32.u64.low %v1303_v27, %v1302_v42  ;;  %v4903_v22 = vmul.u32.u64.high %v1303_v27, %v1302_v42, %v4902_v21  ;;  %v1369_v28 = vadd.s32 1, %v4054_v31  ;;  %v4923_v42 = vpop.f32.mrb[10].mxu0 }
 0x16f   : > { %v1123_v50 = vsub.s32 4294967266, %v1118_v6  ;;  %v4047_v8 = vmin.u32 %v1217_v7, %v4891_v38  ;;  %v4905_v58 = vmul.u32.u64.low %v1303_v27, %v1298_v43  ;;  %v4906_v20 = vmul.u32.u64.high %v1303_v27, %v1298_v43, %v4905_v58 }
 0x170   : > { %v1294_v36 = vsel %vm1288_vm10, %v1291_v63, %v1293_v18  ;;  %vm1370_vm13 = vcmp.gt.s32.totalorder %v1369_v28, 0  ;;  %v1119_v12 = vsub.s32 32, %v1118_v6  ;;  %v1366_v56 = vand.u32 8388607, %v6784_v25 }
 0x171   : > { %v1219_v24 = vclz %v4047_v8  ;;  %v1124_v29 = vadd.s32 127, %v1123_v50  ;;  %vm1312_vm12 = vc.u32 %v4903_v22, %v4905_v58  ;;  %v1313_v45 = vadd.s32 1, %v4906_v20 }
 0x172   : > { %v1371_v52 = vsel %vm1370_vm13, %v1369_v28, 0  ;;  %v1310_v54 = vmul.u32 %v1303_v27, %v1294_v36  ;;  %v1103_v31 = vadd.s32 %v4819_v46, %v4816_v40  ;;  %v1133_v11 = vsub.s32 4, %v4859_v39 }
 0x173   : > { %v4048_v15 = vadd.s32 4294967294, %v1219_v24  ;;  %v1373_v48 = vand.u32 31, %v1371_v52  ;;  %v1125_v59 = vshll.u32 %v1124_v29, 23  ;;  %v1314_v61 = vsel %vm1312_vm12, %v1313_v45, %v4906_v20 }
 0x174   : > { %v1315_v49 = vadd.s32 %v1314_v61, %v1310_v54  ;;  %v1121_v62 = vshrl.u32 %v1103_v31, %v1119_v12  ;;  %v1237_v3 = vsub.s32 4, %v4882_v23  ;;  %vm1049_vm15 = vcmp.lt.s32.totalorder %v4758_v13, 0 }
 0x175   : > { %vm4049_vm14 = vcmp.lt.s32.totalorder %v4048_v15, 0  ;;  %v1374_v7 = vsub.s32 32, %v1373_v48  ;;  %vm1153_vm0 = vcmp.lt.s32.totalorder %v4762_v16, 0  ;;  %v1367_v43 = vor.u32 8388608, %v1366_v56 }
 0x176   : > { %v1316_v27 = vadd.s32 536870912, %v1315_v49  ;;  %v1120_v40 = vshll.u32 %v4869_v60, %v1118_v6  ;;  %v1126_v46 = vor.u32 4788187, %v1125_v59  ;;  %v4929_v50 = vsel %vm1049_vm15, %v1133_v11, %v4859_v39 }
 0x177   : > { %v1207_v63 = vadd.s32 %v4849_v30, %v4855_v33  ;;  %v4933_v8 = vsel %vm4049_vm14, 0, %v4048_v15  ;;  %v1377_v21 = vshrl.u32 %v6794_v51, %v1374_v7  ;;  %v1380_v20 = vshrl.u32 %v6792_v53, %v1374_v7 }
 0x178   : > { %v4935_v18 = vshrl.u32 %v1316_v27, 30  ;;  %v1122_v24 = vor.u32 %v1121_v62, %v1120_v40  ;;  %v4942_v60 = vsel %vm1153_vm0, %v1237_v3, %v4882_v23  ;;  %v1383_v39 = vshrl.u32 %v6790_v55, %v1374_v7 }
 0x179   : > { %v1466_v6 = vand.u32 2139095040, %v4775_v34  ;;  %v1372_v33 = vshrl.u32 %v1371_v52, 5  ;;  %v1376_v28 = vshll.u32 %v6796_v47, %v1373_v48  ;;  %v1379_v29 = vshll.u32 %v6794_v51, %v1373_v48 }
 0x17a   : > { %v1318_v30 = vshll.u32 %v4935_v18, 30  ;;  %v1227_v36 = vsub.s32 4294967266, %v4933_v8  ;;  %v1382_v12 = vshll.u32 %v6792_v53, %v1373_v48  ;;  %v1385_v15 = vshll.u32 %v6790_v55, %v1373_v48 }
 0x17b   : > { %v1386_v23 = vshrl.u32 %v6785_v57, %v1374_v7  ;;  %v1127_v45 = vand.u32 2147483647, %v1126_v46  ;;  %v1378_v56 = vor.u32 %v1377_v21, %v1376_v28  ;;  %v1381_v31 = vor.u32 %v1380_v20, %v1379_v29 }
 0x17c   : > { %v4953_v54 = vsub.s32 %v1315_v49, %v1318_v30  ;;  %v1384_v59 = vor.u32 %v1383_v39, %v1382_v12  ;;  %v1388_v52 = vshll.u32 %v6785_v57, %v1373_v48  ;;  %v1389_v61 = vshrl.u32 %v6787_v1, %v1374_v7 }
 0x17d   : > { %v1387_v11 = vor.u32 %v1386_v23, %v1385_v15  ;;  %v1129_v62 = vcvt.s32.f32 %v1122_v24  ;;  %v1407_v27 = vshll.u32 %v1367_v43, 8  ;;  %v1467_v40 = vshrl.u32 %v1466_v6, 23 }
 0x17e   : > { %v1321_v3 = vsub.s32 0, %v4953_v54  ;;  %v1223_v2 = vsub.s32 32, %v4933_v8  ;;  %v1224_v46 = vshll.u32 %v4891_v38, %v4933_v8  ;;  %v1228_v49 = vadd.s32 127, %v1227_v36 }
 0x17f   : > { %v1390_v30 = vor.u32 %v1389_v61, %v1388_v52  ;;  %v1130_v21 = vmul.f32 %v1129_v62, %v1127_v45  ;;  %vm1391_vm1 = vcmp.lt.s32.totalorder %v1372_v33, 1  ;;  %vm1394_vm2 = vcmp.lt.s32.totalorder %v1372_v33, 4 }
 0x180   : > { %v4051_v20 = vmin.u32 %v1321_v3, %v4953_v54  ;;  %vm1393_vm3 = vcmp.lt.s32.totalorder %v1372_v33, 3  ;;  %v1396_v48 = vsel %vm1394_vm2, %v1384_v59, 2102212464  ;;  %v1399_v39 = vsel %vm1391_vm1, %v1378_v56, %v1381_v31 }
 0x181   : > { %v1400_v24 = vsel %vm1394_vm2, %v1387_v11, 920167782  ;;  %v1375_v43 = vshrl.u32 %v6796_v47, %v1374_v7  ;;  %vm1392_vm4 = vcmp.lt.s32.totalorder %v1372_v33, 2  ;;  %v1229_v29 = vshll.u32 %v1228_v49, 23 }
 0x182   : > { %v1323_v28 = vclz %v4051_v20  ;;  %v1401_v6 = vsel %vm1393_vm3, %v1384_v59, %v1400_v24  ;;  %v1403_v38 = vsel %vm1391_vm1, %v1381_v31, %v1384_v59  ;;  %v1404_v8 = vsel %vm1394_vm2, %v1390_v30, 1326507024 }
 0x183   : > { %v1402_v12 = vsel %vm1392_vm4, %v1399_v39, %v1401_v6  ;;  %v1395_v15 = vsel %vm1391_vm1, %v1375_v43, %v1378_v56  ;;  %v1397_v23 = vsel %vm1393_vm3, %v1381_v31, %v1396_v48  ;;  %v1405_v45 = vsel %vm1393_vm3, %v1387_v11, %v1404_v8 }
 0x184   : > { %v4052_v36 = vadd.s32 4294967294, %v1323_v28  ;;  %v1225_v52 = vshrl.u32 %v1207_v63, %v1223_v2  ;;  %v1406_v61 = vsel %vm1392_vm4, %v1403_v38, %v1405_v45  ;;  %v4058_v49 = vadd.s32 4294967169, %v1467_v40  ;;  %v5003_v38 = vpop.f32.mrb[11].mxu0 }
 0x185   : > { %v4965_v62 = vmul.u32.u64.low %v1407_v27, %v1402_v12  ;;  %v4966_v3 = vmul.u32.u64.high %v1407_v27, %v1402_v12, %v4965_v62  ;;  %v4969_v7 = vmul.u32.u64.low %v1407_v27, %v1406_v61  ;;  %v4970_v20 = vmul.u32.u64.high %v1407_v27, %v1406_v61, %v4969_v7 }
 0x186   : > { %vm4053_vm5 = vcmp.lt.s32.totalorder %v4052_v36, 0  ;;  %v1131_v24 = vxor.u32 2147483648, %v1130_v21  ;;  %v1230_v39 = vor.u32 4788187, %v1229_v29  ;;  %v1398_v56 = vsel %vm1392_vm4, %v1395_v15, %v1397_v23 }
 0x187   : > { %v4972_v59 = vsel %vm4053_vm5, 0, %v4052_v36  ;;  %v6783_v2 = vand.u32 2147483647, %v4775_v34  ;;  %v1473_v63 = vadd.s32 1, %v4058_v49  ;;  %vm4979_vm6 = vcmp.le.f32.partialorder %v1047_v14, 0.7853982 }
 0x188   : > { %v1331_v31 = vsub.s32 4294967266, %v4972_v59  ;;  %vm4985_vm7 = vcmp.le.f32.partialorder %v1151_v17, 0.7853982  ;;  %v1226_v30 = vor.u32 %v1225_v52, %v1224_v46  ;;  %v1417_v33 = vadd.s32 1, %v4966_v3 }
 0x189   : > { %v1136_v48 = vsel %vm4979_vm6, 0, %v4929_v50  ;;  %v1240_v14 = vsel %vm4985_vm7, 0, %v4942_v60  ;;  %v1414_v28 = vmul.u32 %v1407_v27, %v1398_v56  ;;  %vm1416_vm9 = vc.u32 %v4970_v20, %v4965_v62 }
 0x18a   : > { %v1132_v17 = vsel %vm1049_vm15, %v1131_v24, %v1130_v21  ;;  %v1231_v43 = vand.u32 2147483647, %v1230_v39  ;;  %v1418_v46 = vsel %vm1416_vm9, %v1417_v33, %v4966_v3  ;;  %vm1474_vm10 = vcmp.gt.s32.totalorder %v1473_v63, 0 }
 0x18b   : > { %v1332_v6 = vadd.s32 127, %v1331_v31  ;;  %v1419_v29 = vadd.s32 %v1418_v46, %v1414_v28  ;;  %v1470_v50 = vand.u32 8388607, %v6783_v2  ;;  %v1475_v12 = vsel %vm1474_vm10, %v1473_v63, 0 }
 0x18c   : > { %v5005_v60 = vadd.s32 3, %v1136_v48  ;;  %v1233_v27 = vcvt.s32.f32 %v1226_v30  ;;  %vm1257_vm11 = vcmp.lt.s32.totalorder %v4766_v19, 0  ;;  %v1477_v8 = vand.u32 31, %v1475_v12 }
 0x18d   : > { %v5011_v21 = vsel %vm4979_vm6, %v4758_v13, %v1132_v17  ;;  %v5013_v36 = vadd.s32 3, %v1240_v14  ;;  %v1311_v15 = vadd.s32 %v4905_v58, %v4903_v22  ;;  %v1420_v23 = vadd.s32 536870912, %v1419_v29 }
 0x18e   : > { %v5017_v45 = vmul.f32 %v1233_v27, %v1231_v43  ;;  %v1327_v52 = vsub.s32 32, %v4972_v59  ;;  %v1341_v61 = vsub.s32 4, %v4935_v18  ;;  %v1478_v3 = vsub.s32 32, %v1477_v8 }
 0x18f   : > { %v1333_v7 = vshll.u32 %v1332_v6, 23  ;;  %v5021_v49 = vshrl.u32 %v1420_v23, 30  ;;  %v1471_v24 = vor.u32 8388608, %v1470_v50  ;;  %v1570_v39 = vand.u32 2139095040, %v4777_v35 }
 0x190   : > { %v1480_v56 = vshll.u32 %v6796_v47, %v1477_v8  ;;  %v1481_v31 = vshrl.u32 %v6794_v51, %v1478_v3  ;;  %v1484_v22 = vshrl.u32 %v6792_v53, %v1478_v3  ;;  %v1487_v58 = vshrl.u32 %v6790_v55, %v1478_v3 }
 0x191   : > { %v1422_v63 = vshll.u32 %v5021_v49, 30  ;;  %v1483_v11 = vshll.u32 %v6794_v51, %v1477_v8  ;;  %v1486_v30 = vshll.u32 %v6792_v53, %v1477_v8  ;;  %v1490_v33 = vshrl.u32 %v6785_v57, %v1478_v3 }
 0x192   : > { %v1476_v48 = vshrl.u32 %v1475_v12, 5  ;;  %v1489_v14 = vshll.u32 %v6790_v55, %v1477_v8  ;;  %v1492_v28 = vshll.u32 %v6785_v57, %v1477_v8  ;;  %v1493_v17 = vshrl.u32 %v6787_v1, %v1478_v3 }
 0x193   : > { %v5035_v43 = vsub.s32 %v1419_v29, %v1422_v63  ;;  %v1482_v46 = vor.u32 %v1481_v31, %v1480_v56  ;;  %v1485_v6 = vor.u32 %v1484_v22, %v1483_v11  ;;  %v1488_v50 = vor.u32 %v1487_v58, %v1486_v30 }
 0x194   : > { %v1235_v27 = vxor.u32 2147483648, %v5017_v45  ;;  %v1328_v23 = vshll.u32 %v4953_v54, %v4972_v59  ;;  %v1342_v12 = vsel %vm1257_vm11, %v1341_v61, %v4935_v18  ;;  %v1491_v2 = vor.u32 %v1490_v33, %v1489_v14 }
 0x195   : > { %v1329_v25 = vshrl.u32 %v1311_v15, %v1327_v52  ;;  %v1425_v8 = vsub.s32 0, %v5035_v43  ;;  %v1494_v57 = vor.u32 %v1493_v17, %v1492_v28  ;;  %v1511_v1 = vshll.u32 %v1471_v24, 8 }
 0x196   : > { %vm5046_vm12 = vcmp.le.f32.partialorder %v1255_v44, 0.7853982  ;;  %v1334_v56 = vor.u32 4788187, %v1333_v7  ;;  %vm1495_vm13 = vcmp.lt.s32.totalorder %v1476_v48, 1  ;;  %vm1498_vm14 = vcmp.lt.s32.totalorder %v1476_v48, 4 }
 0x197   : > { %v1571_v54 = vshrl.u32 %v1570_v39, 23  ;;  %v4055_v59 = vmin.u32 %v1425_v8, %v5035_v43  ;;  %v1479_v18 = vshrl.u32 %v6796_v47, %v1478_v3  ;;  %v1500_v61 = vsel %vm1498_vm14, %v1488_v50, 2102212464 }
 0x198   : > { %v1503_v15 = vsel %vm1495_vm13, %v1482_v46, %v1485_v6  ;;  %vm1496_vm15 = vcmp.lt.s32.totalorder %v1476_v48, 2  ;;  %vm1497_vm1 = vcmp.lt.s32.totalorder %v1476_v48, 3  ;;  %v1504_v52 = vsel %vm1498_vm14, %v1491_v2, 920167782 }
 0x199   : > { %v1507_v24 = vsel %vm1495_vm13, %v1485_v6, %v1488_v50  ;;  %v1427_v31 = vclz %v4055_v59  ;;  %v1499_v22 = vsel %vm1495_vm13, %v1479_v18, %v1482_v46  ;;  %v1505_v44 = vsel %vm1497_vm1, %v1488_v50, %v1504_v52 }
 0x19a   : > { %v1508_v58 = vsel %vm1498_vm14, %v1494_v57, 1326507024  ;;  %v1501_v63 = vsel %vm1497_vm1, %v1485_v6, %v1500_v61  ;;  %v1506_v7 = vsel %vm1496_vm15, %v1503_v15, %v1505_v44  ;;  %v4062_v30 = vadd.s32 4294967169, %v1571_v54 }
 0x19b   : > { %v1509_v11 = vsel %vm1497_vm1, %v1491_v2, %v1508_v58  ;;  %v4056_v39 = vadd.s32 4294967294, %v1427_v31  ;;  %v5054_v14 = vmul.u32.u64.low %v1511_v1, %v1506_v7  ;;  %v5055_v3 = vmul.u32.u64.high %v1511_v1, %v1506_v7, %v5054_v14 }
 0x19c   : > { %v1510_v33 = vsel %vm1496_vm15, %v1507_v24, %v1509_v11  ;;  %v6789_v8 = vand.u32 2147483647, %v4777_v35  ;;  %v1577_v46 = vadd.s32 1, %v4062_v30  ;;  %v5063_v57 = vand.u32 3, %v5005_v60 }
 0x19d   : > { %v5058_v28 = vmul.u32.u64.low %v1511_v1, %v1510_v33  ;;  %v5059_v17 = vmul.u32.u64.high %v1511_v1, %v1510_v33, %v5058_v28  ;;  %v1330_v6 = vor.u32 %v1329_v25, %v1328_v23  ;;  %vm4057_vm2 = vcmp.lt.s32.totalorder %v4056_v39, 0 }
 0x19e   : > { %6887 = vst [vmem:[#allocation33_spill] sm:$0xff] %v5063_v57  ;;  %v1502_v2 = vsel %vm1496_vm15, %v1499_v22, %v1501_v63  ;;  %4378 = vcosq.f32 %v5011_v21  ;;  %v5068_v50 = vand.u32 3, %v5013_v36  ;;  %v5070_v54 = vsel %vm4057_vm2, 0, %v4056_v39 }
 0x19f   : > { %vm1578_vm3 = vcmp.gt.s32.totalorder %v1577_v46, 0  ;;  %v1236_v59 = vsel %vm1153_vm0, %v1235_v27, %v5017_v45  ;;  %v1335_v18 = vand.u32 2147483647, %v1334_v56  ;;  %v1344_v60 = vsel %vm5046_vm12, 0, %v1342_v12 }
 0x1a0   : > { %v1521_v25 = vadd.s32 1, %v5055_v3  ;;  %v1518_v48 = vmul.u32 %v1511_v1, %v1502_v2  ;;  %vm1520_vm4 = vc.u32 %v5059_v17, %v5054_v14  ;;  %v1574_v36 = vand.u32 8388607, %v6789_v8 }
 0x1a1   : > { %v1579_v23 = vsel %vm1578_vm3, %v1577_v46, 0  ;;  %v1337_v61 = vcvt.s32.f32 %v1330_v6  ;;  %vm1361_vm5 = vcmp.lt.s32.totalorder %v4773_v26, 0  ;;  %v1435_v15 = vsub.s32 4294967266, %v5070_v54 }
 0x1a2   : > { %v1522_v45 = vsel %vm1520_vm4, %v1521_v25, %v5055_v3  ;;  %v1674_v27 = vand.u32 2139095040, %v4779_v37  ;;  %4380 = vsinq.f32 %v5011_v21  ;;  %v5087_v12 = vadd.s32 3, %v1344_v60 }
 0x1a3   : > { %v1523_v1 = vadd.s32 %v1522_v45, %v1518_v48  ;;  %v1581_v56 = vand.u32 31, %v1579_v23  ;;  %v5092_v52 = vsel %vm4985_vm7, %v4762_v16, %v1236_v59  ;;  %v5094_v24 = vmul.f32 %v1337_v61, %v1335_v18  ;;  %v5111_v59 = vpop.f32.mrb[12].mxu0 }
 0x1a4   : > { %v1415_v31 = vadd.s32 %v4965_v62, %v4970_v20  ;;  %v1445_v44 = vsub.s32 4, %v5021_v49  ;;  %v1575_v21 = vor.u32 8388608, %v1574_v36  ;;  %v1431_v7 = vsub.s32 32, %v5070_v54 }
 0x1a5   : > { %v1524_v58 = vadd.s32 536870912, %v1523_v1  ;;  %v1582_v63 = vsub.s32 32, %v1581_v56  ;;  %v1436_v11 = vadd.s32 127, %v1435_v15  ;;  %v1584_v30 = vshll.u32 %v6796_v47, %v1581_v56 }
 0x1a6   : > { %v1675_v40 = vshrl.u32 %v1674_v27, 23  ;;  %v1587_v3 = vshll.u32 %v6794_v51, %v1581_v56  ;;  %v1590_v20 = vshll.u32 %v6792_v53, %v1581_v56  ;;  %v1593_v46 = vshll.u32 %v6790_v55, %v1581_v56 }
 0x1a7   : > { %v5102_v39 = vshrl.u32 %v1524_v58, 30  ;;  %v1585_v33 = vshrl.u32 %v6794_v51, %v1582_v63  ;;  %v1588_v62 = vshrl.u32 %v6792_v53, %v1582_v63  ;;  %v1591_v28 = vshrl.u32 %v6790_v55, %v1582_v63 }
 0x1a8   : > { %v6888_v6 = vmov 920167782   ;;  %v5113_v18 = vpop.eup %4378  ;;  %v1580_v25 = vshrl.u32 %v1579_v23, 5  ;;  %v6890_v27 = vmov 1326507024   ;;  %v1339_v8 = vxor.u32 2147483648, %v5094_v24 }
 0x1a9   : > { %v1594_v2 = vshrl.u32 %v6888_v6, %v1582_v63  ;;  %6889 = vst [vmem:[#allocation34_spill] sm:$0xff] %v5113_v18  ;;  %v1526_v60 = vshll.u32 %v5102_v39, 30  ;;  %v1586_v48 = vor.u32 %v1585_v33, %v1584_v30  ;;  %v1596_v36 = vshll.u32 %v6888_v6, %v1581_v56 }
 0x1aa   : > { %v1589_v61 = vor.u32 %v1588_v62, %v1587_v3  ;;  %v1592_v15 = vor.u32 %v1591_v28, %v1590_v20  ;;  %v1597_v58 = vshrl.u32 %v6890_v27, %v1582_v63  ;;  %v5122_v55 = vsel %vm1361_vm5, %v1445_v44, %v5021_v49 }
 0x1ab   : > { %v1595_v45 = vor.u32 %v1594_v2, %v1593_v46  ;;  %v5124_v53 = vsub.s32 %v1523_v1, %v1526_v60  ;;  %v1615_v51 = vshll.u32 %v1575_v21, 8  ;;  %v1432_v23 = vshll.u32 %v5035_v43, %v5070_v54 }
 0x1ac   : > { %v1433_v30 = vshrl.u32 %v1415_v31, %v1431_v7  ;;  %v1437_v56 = vshll.u32 %v1436_v11, 23  ;;  %v1598_v33 = vor.u32 %v1597_v58, %v1596_v36  ;;  %v5128_v3 = vpop.eup %4380  ;;  %v6892_v62 = vand.u32 2147483647, %v4773_v26 }
 0x1ad   : > { %6891 = vst [vmem:[#allocation35_spill] sm:$0xff] %v5128_v3  ;;  %v1529_v49 = vsub.s32 0, %v5124_v53  ;;  %vm1599_vm6 = vcmp.lt.s32.totalorder %v1580_v25, 1  ;;  %vm1602_vm7 = vcmp.lt.s32.totalorder %v1580_v25, 4  ;;  %v4066_v1 = vadd.s32 4294967169, %v1675_v40 }
 0x1ae   : > { %vm5132_vm0 = vcmp.le.f32.partialorder %v6892_v62, 0.7853982  ;;  %v1583_v44 = vshrl.u32 %v6796_v47, %v1582_v63  ;;  %v1604_v21 = vsel %vm1602_vm7, %v1592_v15, 2102212464  ;;  %v1607_v43 = vsel %vm1599_vm6, %v1586_v48, %v1589_v61 }
 0x1af   : > { %v1608_v54 = vsel %vm1602_vm7, %v1595_v45, 920167782  ;;  %v4059_v31 = vmin.u32 %v1529_v49, %v5124_v53  ;;  %vm1600_vm9 = vcmp.lt.s32.totalorder %v1580_v25, 2  ;;  %vm1601_vm10 = vcmp.lt.s32.totalorder %v1580_v25, 3 }
 0x1b0   : > { %v1611_v7 = vsel %vm1599_vm6, %v1589_v61, %v1592_v15  ;;  %v1438_v11 = vor.u32 4788187, %v1437_v56  ;;  %v1603_v28 = vsel %vm1599_vm6, %v1583_v44, %v1586_v48  ;;  %v1609_v46 = vsel %vm1601_vm10, %v1592_v15, %v1608_v54 }
 0x1b1   : > { %v1612_v2 = vsel %vm1602_vm7, %v1598_v33, 1326507024  ;;  %v1531_v60 = vclz %v4059_v31  ;;  %v1605_v36 = vsel %vm1601_vm10, %v1589_v61, %v1604_v21  ;;  %v1610_v58 = vsel %vm1600_vm9, %v1607_v43, %v1609_v46  ;;  %v5166_v43 = vpop.f32.mrb[13].mxu0 }
 0x1b2   : > { %v1613_v62 = vsel %vm1601_vm10, %v1595_v45, %v1612_v2  ;;  %v5141_v63 = vmul.u32.u64.low %v1615_v51, %v1610_v58  ;;  %v5142_v47 = vmul.u32.u64.high %v1615_v51, %v1610_v58, %v5141_v63  ;;  %v1681_v22 = vadd.s32 1, %v4066_v1 }
 0x1b3   : > { %v1614_v40 = vsel %vm1600_vm9, %v1611_v7, %v1613_v62  ;;  %v1434_v49 = vor.u32 %v1433_v30, %v1432_v23  ;;  %v4060_v0 = vadd.s32 4294967294, %v1531_v60  ;;  %4382 = vcosq.f32 %v5092_v52 }
 0x1b4   : > { %v5145_v18 = vmul.u32.u64.low %v1615_v51, %v1614_v40  ;;  %v5146_v57 = vmul.u32.u64.high %v1615_v51, %v1614_v40, %v5145_v18  ;;  %v5150_v48 = vand.u32 3, %v5087_v12  ;;  %v6896_v61 = vand.u32 2147483647, %v4779_v37 }
 0x1b5   : > { %vm1682_vm13 = vcmp.gt.s32.totalorder %v1681_v22, 0  ;;  %v1439_v45 = vand.u32 2147483647, %v1438_v11  ;;  %vm4061_vm14 = vcmp.lt.s32.totalorder %v4060_v0, 0  ;;  %v1606_v56 = vsel %vm1600_vm9, %v1603_v28, %v1605_v36 }
 0x1b6   : > { %6895 = vst [vmem:[#allocation36_spill] sm:$0xff] %v5150_v48  ;;  %v1678_v15 = vand.u32 8388607, %v6896_v61  ;;  %v1683_v33 = vsel %vm1682_vm13, %v1681_v22, 0  ;;  %v1534_v30 = vsel %vm4061_vm14, 0, %v4060_v0  ;;  %v1625_v18 = vadd.s32 1, %v5142_v47 }
 0x1b7   : > { %v1685_v1 = vand.u32 31, %v1683_v33  ;;  %v5162_v12 = vsel %vm1257_vm11, %v1339_v8, %v5094_v24  ;;  %v1441_v44 = vcvt.s32.f32 %v1434_v49  ;;  %v1519_v21 = vadd.s32 %v5054_v14, %v5059_v17 }
 0x1b8   : > { %v1539_v25 = vsub.s32 4294967266, %v1534_v30  ;;  %v1622_v22 = vmul.u32 %v1615_v51, %v1606_v56  ;;  %vm1624_vm15 = vc.u32 %v5146_v57, %v5141_v63  ;;  %v1679_v0 = vor.u32 8388608, %v1678_v15 }
 0x1b9   : > { %v1686_v54 = vsub.s32 32, %v1685_v1  ;;  %v5170_v31 = vmul.f32 %v1441_v44, %v1439_v45  ;;  %v1535_v7 = vsub.s32 32, %v1534_v30  ;;  %v1549_v11 = vsub.s32 4, %v5102_v39 }
 0x1ba   : > { %v1626_v8 = vsel %vm1624_vm15, %v1625_v18, %v5142_v47  ;;  %v6897_v28 = vmov 683565275   ;;  %v6898_v14 = vmov 2475754826   ;;  %v6899_v2 = vmov 2131351028  }
 0x1bb   : > { %v1627_v24 = vadd.s32 %v1626_v8, %v1622_v22  ;;  %v1688_v46 = vshll.u32 %v6897_v28, %v1685_v1  ;;  %v1689_v17 = vshrl.u32 %v6898_v14, %v1686_v54  ;;  %v1692_v60 = vshrl.u32 %v6899_v2, %v1686_v54 }
 0x1bc   : > { %v1540_v51 = vadd.s32 127, %v1539_v25  ;;  %v1691_v36 = vshll.u32 %v6898_v14, %v1685_v1  ;;  %v1694_v58 = vshll.u32 %v6899_v2, %v1685_v1  ;;  %v6900_v62 = vmov 2102212464  }
 0x1bd   : > { %v1695_v40 = vshrl.u32 %v6900_v62, %v1686_v54  ;;  %v1628_v49 = vadd.s32 536870912, %v1627_v24  ;;  %v1684_v61 = vshrl.u32 %v1683_v33, 5  ;;  %v1697_v15 = vshll.u32 %v6900_v62, %v1685_v1  ;;  %v5183_v22 = vpop.eup %4382 }
 0x1be   : > { %v1698_v47 = vshrl.u32 %v6888_v6, %v1686_v54  ;;  %v1443_v45 = vxor.u32 2147483648, %v5170_v31  ;;  %v1690_v56 = vor.u32 %v1689_v17, %v1688_v46  ;;  %v1693_v18 = vor.u32 %v1692_v60, %v1691_v36 }
 0x1bf   : > { %v1696_v44 = vor.u32 %v1695_v40, %v1694_v58  ;;  %vm1465_vm11 = vcmp.lt.s32.totalorder %v4775_v34, 0  ;;  %v5186_v25 = vshrl.u32 %v1628_v49, 30  ;;  %v1700_v23 = vshll.u32 %v6888_v6, %v1685_v1 }
 0x1c0   : > { %v1699_v8 = vor.u32 %v1698_v47, %v1697_v15  ;;  %v1701_v33 = vshrl.u32 %v6890_v27, %v1686_v54  ;;  %v1536_v48 = vshll.u32 %v5124_v53, %v1534_v30  ;;  %v1537_v3 = vshrl.u32 %v1519_v21, %v1535_v7 }
 0x1c1   : > { %v1541_v13 = vshll.u32 %v1540_v51, 23  ;;  %v1719_v16 = vshll.u32 %v1679_v0, 8  ;;  %v1630_v46 = vshll.u32 %v5186_v25, 30  ;;  %vm1703_vm1 = vcmp.lt.s32.totalorder %v1684_v61, 1 }
 0x1c2   : > { %v1702_v17 = vor.u32 %v1701_v33, %v1700_v23  ;;  %vm1706_vm2 = vcmp.lt.s32.totalorder %v1684_v61, 4  ;;  %v6901_v60 = vand.u32 2147483647, %v4775_v34  ;;  %v1687_v1 = vshrl.u32 %v6897_v28, %v1686_v54 }
 0x1c3   : > { %vm1705_vm4 = vcmp.lt.s32.totalorder %v1684_v61, 3  ;;  %v1711_v58 = vsel %vm1703_vm1, %v1690_v56, %v1693_v18  ;;  %v1712_v53 = vsel %vm1706_vm2, %v1699_v8, 920167782  ;;  %v5201_v30 = vsub.s32 %v1627_v24, %v1630_v46 }
 0x1c4   : > { %vm5194_vm3 = vcmp.le.f32.partialorder %v6901_v60, 0.7853982  ;;  %vm1704_vm6 = vcmp.lt.s32.totalorder %v1684_v61, 2  ;;  %v1708_v23 = vsel %vm1706_vm2, %v1696_v44, 2102212464  ;;  %v1713_v21 = vsel %vm1705_vm4, %v1696_v44, %v1712_v53 }
 0x1c5   : > { %v1538_v0 = vor.u32 %v1537_v3, %v1536_v48  ;;  %v1542_v7 = vor.u32 4788187, %v1541_v13  ;;  %v1714_v51 = vsel %vm1704_vm6, %v1711_v58, %v1713_v21  ;;  %v1778_v40 = vand.u32 2139095040, %v4781_v41 }
 0x1c6   : > { %v1633_v54 = vsub.s32 0, %v5201_v30  ;;  %v1707_v49 = vsel %vm1703_vm1, %v1687_v1, %v1690_v56  ;;  %v1715_v15 = vsel %vm1703_vm1, %v1693_v18, %v1696_v44  ;;  %v1716_v24 = vsel %vm1706_vm2, %v1702_v17, 1326507024 }
 0x1c7   : > { %v1709_v47 = vsel %vm1705_vm4, %v1693_v18, %v1708_v23  ;;  %v1717_v33 = vsel %vm1705_vm4, %v1699_v8, %v1716_v24  ;;  %v5213_v46 = vmul.u32.u64.low %v1719_v16, %v1714_v51  ;;  %v5214_v60 = vmul.u32.u64.high %v1719_v16, %v1714_v51, %v5213_v46 }
 0x1c8   : > { %4384 = vsinq.f32 %v5092_v52  ;;  %v1343_v13 = vsel %vm5046_vm12, %v4766_v19, %v5162_v12  ;;  %v4063_v3 = vmin.u32 %v1633_v54, %v5201_v30  ;;  %v1718_v48 = vsel %vm1704_vm6, %v1715_v15, %v1717_v33  ;;  %v5253_v15 = vpop.f32.mrb[14].mxu0 }
 0x1c9   : > { %v1543_v56 = vand.u32 2147483647, %v1542_v7  ;;  %v1550_v18 = vsel %vm1465_vm11, %v1549_v11, %v5102_v39  ;;  %v5227_v44 = vmul.u32.u64.low %v1719_v16, %v1718_v48  ;;  %v5228_v8 = vmul.u32.u64.high %v1719_v16, %v1718_v48, %v5227_v44 }
 0x1ca   : > { %v6904_v52 = vsel %vm5132_vm0, 0, %v5122_v55  ;;  %v1635_v1 = vclz %v4063_v3  ;;  %v1710_v29 = vsel %vm1704_vm6, %v1707_v49, %v1709_v47  ;;  %v1779_v12 = vshrl.u32 %v1778_v40, 23 }
 0x1cb   : > { %v1452_v17 = vadd.s32 3, %v6904_v52  ;;  %v1444_v58 = vsel %vm1361_vm5, %v1443_v45, %v5170_v31  ;;  %v1545_v53 = vcvt.s32.f32 %v1538_v0  ;;  %v1729_v23 = vadd.s32 1, %v5214_v60 }
 0x1cc   : > { %v1006_v39 = vadd.s32 32, %v4657_v4  ;;  %4386 = vcosq.f32 %v1343_v13  ;;  %v1552_v11 = vsel %vm5194_vm3, 0, %v1550_v18  ;;  %vm1569_vm12 = vcmp.lt.s32.totalorder %v4777_v35, 0 }
 0x1cd   : > { %v4064_v55 = vadd.s32 4294967294, %v1635_v1  ;;  %v4070_v21 = vadd.s32 4294967169, %v1779_v12  ;;  %v1546_v61 = vmul.f32 %v1545_v53, %v1543_v56  ;;  %v1726_v7 = vmul.u32 %v1719_v16, %v1710_v29 }
 0x1ce   : > { %vm1728_vm7 = vc.u32 %v5228_v8, %v5213_v46  ;;  %v6807_v31 = vand.u32 2147483647, %v4781_v41  ;;  %v5249_v45 = vsel %vm5132_vm0, %v4773_v26, %v1444_v58  ;;  %v1653_v40 = vsub.s32 4, %v5186_v25 }
 0x1cf   : > { %vm4065_vm5 = vcmp.lt.s32.totalorder %v4064_v55, 0  ;;  %v1730_v4 = vsel %vm1728_vm7, %v1729_v23, %v5214_v60  ;;  %v1785_v0 = vadd.s32 1, %v4070_v21  ;;  %vm1015_vm9 = vcmp.ge.s32.totalorder %v1006_v39, 36 }
 0x1d0   : > { %v1638_v51 = vsel %vm4065_vm5, 0, %v4064_v55  ;;  %v1731_v54 = vadd.s32 %v1730_v4, %v1726_v7  ;;  %v1547_v24 = vxor.u32 2147483648, %v1546_v61  ;;  %v1782_v20 = vand.u32 8388607, %v6807_v31 }
 0x1d1   : > { %v1639_v16 = vsub.s32 32, %v1638_v51  ;;  %v1643_v49 = vsub.s32 4294967266, %v1638_v51  ;;  %vm1786_vm10 = vcmp.gt.s32.totalorder %v1785_v0, 0  ;;  %v5259_v60 = vand.u32 3, %v1452_v17 }
 0x1d2   : > { %v1732_v47 = vadd.s32 536870912, %v1731_v54  ;;  %v1787_v33 = vsel %vm1786_vm10, %v1785_v0, 0  ;;  %v5257_v3 = vpop.eup %4384  ;;  %v1623_v48 = vadd.s32 %v5141_v63, %v5146_v57  ;;  %4388 = vsinq.f32 %v1343_v13 }
 0x1d3   : > { %6905 = vst [vmem:[#allocation37_spill] sm:$0xff] %v5259_v60  ;;  %v1644_v56 = vadd.s32 127, %v1643_v49  ;;  %v1789_v18 = vand.u32 31, %v1787_v33  ;;  %v5263_v44 = vadd.s32 3, %v1552_v11  ;;  %v4529_v1 = vmov 0.0  }
 0x1d4   : > { %v5265_v52 = vshrl.u32 %v1732_v47, 30  ;;  %v1024_v29 = vsel %vm1015_vm9, 1.5707964, %v4529_v1  ;;  %4390 = vcosq.f32 %v5249_v45  ;;  %v1641_v12 = vshrl.u32 %v1623_v48, %v1639_v16 }
 0x1d5   : > { %v1645_v58 = vshll.u32 %v1644_v56, 23  ;;  %v1790_v53 = vsub.s32 32, %v1789_v18  ;;  %v5271_v17 = vsel %vm1465_vm11, %v1547_v24, %v1546_v61  ;;  %v5276_v57 = vsel %vm1569_vm12, %v1653_v40, %v5186_v25 }
 0x1d6   : > { %v1734_v63 = vshll.u32 %v5265_v52, 30  ;;  %v1783_v13 = vor.u32 8388608, %v1782_v20  ;;  %v5279_v23 = vpop.eup %4386  ;;  %v1640_v39 = vshll.u32 %v5201_v30, %v1638_v51  ;;  %v1792_v11 = vshll.u32 %v6897_v28, %v1789_v18 }
 0x1d7   : > { %6906 = vst [vmem:[#allocation38_spill] sm:$0xff] %v5279_v23  ;;  %v1793_v55 = vshrl.u32 %v6898_v14, %v1790_v53  ;;  %v5285_v21 = vadd.f32 %v1024_v29, %v4832_v5  ;;  %v1795_v7 = vshll.u32 %v6898_v14, %v1789_v18  ;;  %v1796_v25 = vshrl.u32 %v6899_v2, %v1790_v53 }
 0x1d8   : > { %v5287_v61 = vsub.s32 %v1731_v54, %v1734_v63  ;;  %v1799_v4 = vshrl.u32 %v6900_v62, %v1790_v53  ;;  %v1642_v0 = vor.u32 %v1641_v12, %v1640_v39  ;;  %v1646_v40 = vor.u32 4788187, %v1645_v58 }
 0x1d9   : > { %6907 = vst [vmem:[#allocation39_spill] sm:$0xff] %v5285_v21  ;;  %v1788_v16 = vshrl.u32 %v1787_v33, 5  ;;  %v1798_v30 = vshll.u32 %v6899_v2, %v1789_v18  ;;  %v1794_v49 = vor.u32 %v1793_v55, %v1792_v11  ;;  %v1797_v24 = vor.u32 %v1796_v25, %v1795_v7 }
 0x1da   : > { %v1737_v51 = vsub.s32 0, %v5287_v61  ;;  %v1801_v5 = vshll.u32 %v6900_v62, %v1789_v18  ;;  %v6908_v54 = vand.u32 2147483647, %v4777_v35  ;;  %v1802_v48 = vshrl.u32 %v6888_v6, %v1790_v53 }
 0x1db   : > { %v1800_v20 = vor.u32 %v1799_v4, %v1798_v30  ;;  %v1804_v56 = vshll.u32 %v6888_v6, %v1789_v18  ;;  %v1805_v33 = vshrl.u32 %v6890_v27, %v1790_v53  ;;  %vm1673_vm13 = vcmp.lt.s32.totalorder %v4779_v37, 0 }
 0x1dc   : > { %vm5297_vm0 = vcmp.le.f32.partialorder %v6908_v54, 0.7853982  ;;  %v4067_v1 = vmin.u32 %v1737_v51, %v5287_v61  ;;  %v5306_v12 = vshll.u32 %v1783_v13, 8  ;;  %v1882_v58 = vand.u32 2139095040, %v5285_v21  ;;  %v5312_v7 = vpop.eup %4388 }
 0x1dd   : > { %v5310_v63 = vadd.f32 %v1024_v29, %v4886_v32  ;;  %v1647_v39 = vand.u32 2147483647, %v1646_v40  ;;  %v1803_v11 = vor.u32 %v1802_v48, %v1801_v5  ;;  %v1806_v55 = vor.u32 %v1805_v33, %v1804_v56  ;;  %6911 = vst [vmem:[#allocation40_spill] sm:$0xff] %v5312_v7 }
 0x1de   : > { %vm1807_vm14 = vcmp.lt.s32.totalorder %v1788_v16, 1  ;;  %v1649_v18 = vcvt.s32.f32 %v1642_v0  ;;  %v1739_v25 = vclz %v4067_v1  ;;  %vm1810_vm15 = vcmp.lt.s32.totalorder %v1788_v16, 4  ;;  %v5315_v30 = vpop.eup %4390 }
 0x1df   : > { %v1815_v4 = vsel %vm1807_vm14, %v1794_v49, %v1797_v24  ;;  %6912 = vst [vmem:[#allocation41_spill] sm:$0xff] %v5315_v30  ;;  %v1791_v13 = vshrl.u32 %v6897_v28, %v1790_v53  ;;  %vm1809_vm11 = vcmp.lt.s32.totalorder %v1788_v16, 3  ;;  %v1812_v51 = vsel %vm1810_vm15, %v1800_v20, 2102212464 }
 0x1e0   : > { %v1816_v54 = vsel %vm1810_vm15, %v1803_v11, 920167782  ;;  %v6913_v32 = vand.u32 2147483647, %v4779_v37  ;;  %v4068_v40 = vadd.s32 4294967294, %v1739_v25  ;;  %vm1808_vm2 = vcmp.lt.s32.totalorder %v1788_v16, 2 }
 0x1e1   : > { %v1817_v0 = vsel %vm1809_vm11, %v1800_v20, %v1816_v54  ;;  %v1819_v5 = vsel %vm1807_vm14, %v1797_v24, %v1800_v20  ;;  %v1650_v48 = vmul.f32 %v1649_v18, %v1647_v39  ;;  %v1757_v56 = vsub.s32 4, %v5265_v52 }
 0x1e2   : > { %vm5320_vm1 = vcmp.le.f32.partialorder %v6913_v32, 0.7853982  ;;  %v1818_v33 = vsel %vm1808_vm2, %v1815_v4, %v1817_v0  ;;  %v1820_v53 = vsel %vm1810_vm15, %v1806_v55, 1326507024  ;;  %vm4069_vm4 = vcmp.lt.s32.totalorder %v4068_v40, 0 }
 0x1e3   : > { %v1811_v1 = vsel %vm1807_vm14, %v1791_v13, %v1794_v49  ;;  %v1813_v31 = vsel %vm1809_vm11, %v1797_v24, %v1812_v51  ;;  %v1821_v23 = vsel %vm1809_vm11, %v1803_v11, %v1820_v53  ;;  %v1742_v32 = vsel %vm4069_vm4, 0, %v4068_v40 }
 0x1e4   : > { %v1822_v7 = vsel %vm1808_vm2, %v1819_v5, %v1821_v23  ;;  %v5330_v25 = vmul.u32.u64.low %v5306_v12, %v1818_v33  ;;  %v5331_v19 = vmul.u32.u64.high %v5306_v12, %v1818_v33, %v5330_v25  ;;  %4392 = vsinq.f32 %v5249_v45 }
 0x1e5   : > { %v1656_v20 = vsel %vm5297_vm0, 0, %v5276_v57  ;;  %v6813_v39 = vand.u32 2147483647, %v5285_v21  ;;  %v1883_v55 = vshrl.u32 %v1882_v58, 23  ;;  %v1551_v49 = vsel %vm5194_vm3, %v4775_v34, %v5271_v17  ;;  %v5353_v17 = vpop.f32.mrb[15].mxu0 }
 0x1e6   : > { %v1758_v23 = vsel %vm1673_vm13, %v1757_v56, %v5265_v52  ;;  %v5347_v24 = vmul.u32.u64.low %v5306_v12, %v1822_v7  ;;  %v5348_v11 = vmul.u32.u64.high %v5306_v12, %v1822_v7, %v5347_v24  ;;  %v1651_v45 = vxor.u32 2147483648, %v1650_v48 }
 0x1e7   : > { %v1743_v18 = vsub.s32 32, %v1742_v32  ;;  %v1814_v57 = vsel %vm1808_vm2, %v1811_v1, %v1813_v31  ;;  %v4074_v4 = vadd.s32 4294967169, %v1883_v55  ;;  %v1660_v13 = vadd.s32 3, %v1656_v20 }
 0x1e8   : > { %v1747_v58 = vsub.s32 4294967266, %v1742_v32  ;;  %v1833_v51 = vadd.s32 1, %v5331_v19  ;;  %v1986_v36 = vand.u32 2139095040, %v5310_v63  ;;  %4394 = vcosq.f32 %v1551_v49 }
 0x1e9   : > { %v1727_v52 = vadd.s32 %v5213_v46, %v5228_v8  ;;  %v1886_v7 = vand.u32 8388607, %v6813_v39  ;;  %v1889_v54 = vadd.s32 1, %v4074_v4  ;;  %v1760_v31 = vsel %vm5320_vm1, 0, %v1758_v23 }
 0x1ea   : > { %v1830_v16 = vmul.u32 %v5306_v12, %v1814_v57  ;;  %vm1832_vm3 = vc.u32 %v5348_v11, %v5330_v25  ;;  %v6812_v40 = vand.u32 2147483647, %v5310_v63  ;;  %v1652_v0 = vsel %vm1569_vm12, %v1651_v45, %v1650_v48 }
 0x1eb   : > { %v1745_v5 = vshrl.u32 %v1727_v52, %v1743_v18  ;;  %v1834_v46 = vsel %vm1832_vm3, %v1833_v51, %v5331_v19  ;;  %vm1890_vm6 = vcmp.gt.s32.totalorder %v1889_v54, 0  ;;  %v1748_v8 = vadd.s32 127, %v1747_v58 }
 0x1ec   : > { %v1835_v56 = vadd.s32 %v1834_v46, %v1830_v16  ;;  %v1891_v33 = vsel %vm1890_vm6, %v1889_v54, 0  ;;  %v1987_v53 = vshrl.u32 %v1986_v36, 23  ;;  %4396 = vsinq.f32 %v1551_v49 }
 0x1ed   : > { %v5369_v1 = vand.u32 3, %v5263_v44  ;;  %v5371_v12 = vand.u32 3, %v1660_v13  ;;  %v1893_v20 = vand.u32 31, %v1891_v33  ;;  %v1744_v55 = vshll.u32 %v5287_v61, %v1742_v32 }
 0x1ee   : > { %v5374_v23 = vadd.s32 3, %v1760_v31  ;;  %v1836_v48 = vadd.s32 536870912, %v1835_v56  ;;  %v5377_v24 = vadd.f32 1.5707964, %v4923_v42  ;;  %v5379_v19 = vpop.eup %4392  ;;  %v5384_v49 = vsel %vm5297_vm0, %v4777_v35, %v1652_v0 }
 0x1ef   : > { %6916 = vst [vmem:[#allocation42_spill] sm:$0xff] %v5369_v1  ;;  %6917 = vst [vmem:[#allocation43_spill] sm:$0xff] %v5371_v12  ;;  %v1887_v44 = vor.u32 8388608, %v1886_v7  ;;  %v1894_v45 = vsub.s32 32, %v1893_v20  ;;  %v1990_v18 = vand.u32 8388607, %v6812_v40  ;;  %v5388_v57 = vor.u32 %v1745_v5, %v1744_v55 }
 0x1f0   : > { %6918 = vst [vmem:[#allocation44_spill] sm:$0xff] %v5377_v24  ;;  %v1749_v61 = vshll.u32 %v1748_v8, 23  ;;  %v5390_v32 = vshrl.u32 %v1836_v48, 30  ;;  %v4078_v4 = vadd.s32 4294967169, %v1987_v53  ;;  %v1896_v42 = vshll.u32 %v6897_v28, %v1893_v20 }
 0x1f1   : > { %v1897_v13 = vshrl.u32 %v6898_v14, %v1894_v45  ;;  %v1899_v58 = vshll.u32 %v6898_v14, %v1893_v20  ;;  %v1900_v47 = vshrl.u32 %v6899_v2, %v1894_v45  ;;  %v1902_v36 = vshll.u32 %v6899_v2, %v1893_v20 }
 0x1f2   : > { %v1838_v51 = vshll.u32 %v5390_v32, 30  ;;  %v1903_v52 = vshrl.u32 %v6900_v62, %v1894_v45  ;;  %v1906_v7 = vshrl.u32 %v6888_v6, %v1894_v45  ;;  %v5400_v54 = vpop.eup %4394  ;;  %v1892_v31 = vshrl.u32 %v1891_v33, 5 }
 0x1f3   : > { %6919 = vst [vmem:[#allocation45_spill] sm:$0xff] %v5400_v54  ;;  %v1905_v16 = vshll.u32 %v6900_v62, %v1893_v20  ;;  %v1908_v0 = vshll.u32 %v6888_v6, %v1893_v20  ;;  %v1909_v5 = vshrl.u32 %v6890_v27, %v1894_v45  ;;  %v1898_v8 = vor.u32 %v1897_v13, %v1896_v42 }
 0x1f4   : > { %v5405_v46 = vsub.s32 %v1835_v56, %v1838_v51  ;;  %v1901_v53 = vor.u32 %v1900_v47, %v1899_v58  ;;  %v1904_v55 = vor.u32 %v1903_v52, %v1902_v36  ;;  %v5407_v39 = vshll.u32 %v1887_v44, 8 }
 0x1f5   : > { %v1907_v48 = vor.u32 %v1906_v7, %v1905_v16  ;;  %v1910_v40 = vor.u32 %v1909_v5, %v1908_v0  ;;  %v1991_v1 = vor.u32 8388608, %v1990_v18  ;;  %v1750_v34 = vor.u32 4788187, %v1749_v61 }
 0x1f6   : > { %v1753_v54 = vcvt.s32.f32 %v5388_v57  ;;  %v1841_v33 = vsub.s32 0, %v5405_v46  ;;  %v1993_v35 = vadd.s32 1, %v4078_v4  ;;  %v5411_v12 = vpop.eup %4396  ;;  %v1895_v20 = vshrl.u32 %v6897_v28, %v1894_v45 }
 0x1f7   : > { %6920 = vst [vmem:[#allocation46_spill] sm:$0xff] %v5411_v12  ;;  %vm1911_vm12 = vcmp.lt.s32.totalorder %v1892_v31, 1  ;;  %vm1912_vm7 = vcmp.lt.s32.totalorder %v1892_v31, 2  ;;  %vm1914_vm5 = vcmp.lt.s32.totalorder %v1892_v31, 4  ;;  %vm1913_vm9 = vcmp.lt.s32.totalorder %v1892_v31, 3 }
 0x1f8   : > { %v4071_v56 = vmin.u32 %v1841_v33, %v5405_v46  ;;  %v1916_v42 = vsel %vm1914_vm5, %v1904_v55, 2102212464  ;;  %v1919_v44 = vsel %vm1911_vm12, %v1898_v8, %v1901_v53  ;;  %v1915_v13 = vsel %vm1911_vm12, %v1895_v20, %v1898_v8 }
 0x1f9   : > { %v1920_v18 = vsel %vm1914_vm5, %v1907_v48, 920167782  ;;  %v1923_v61 = vsel %vm1911_vm12, %v1901_v53, %v1904_v55  ;;  %v1924_v58 = vsel %vm1914_vm5, %v1910_v40, 1326507024  ;;  %v1917_v47 = vsel %vm1913_vm9, %v1901_v53, %v1916_v42  ;;  %v5436_v42 = vpop.f32.mrb[20].mxu0 }
 0x1fa   : > { %v1843_v57 = vclz %v4071_v56  ;;  %v1921_v51 = vsel %vm1913_vm9, %v1904_v55, %v1920_v18  ;;  %v1925_v4 = vsel %vm1913_vm9, %v1907_v48, %v1924_v58  ;;  %v1751_v36 = vand.u32 2147483647, %v1750_v34 }
 0x1fb   : > { %v1922_v52 = vsel %vm1912_vm7, %v1919_v44, %v1921_v51  ;;  %v1926_v45 = vsel %vm1912_vm7, %v1923_v61, %v1925_v4  ;;  %vm1994_vm10 = vcmp.gt.s32.totalorder %v1993_v35, 0  ;;  %vm1777_vm0 = vcmp.lt.s32.totalorder %v4781_v41, 0 }
 0x1fc   : > { %v4072_v7 = vadd.s32 4294967294, %v1843_v57  ;;  %v5418_v16 = vmul.u32.u64.low %v5407_v39, %v1926_v45  ;;  %v5419_v0 = vmul.u32.u64.high %v5407_v39, %v1926_v45, %v5418_v16  ;;  %v1995_v5 = vsel %vm1994_vm10, %v1993_v35, 0 }
 0x1fd   : > { %v1918_v40 = vsel %vm1912_vm7, %v1915_v13, %v1917_v47  ;;  %v5424_v8 = vmul.u32.u64.low %v5407_v39, %v1922_v52  ;;  %v5425_v53 = vmul.u32.u64.high %v5407_v39, %v1922_v52, %v5424_v8  ;;  %v1997_v34 = vand.u32 31, %v1995_v5 }
 0x1fe   : > { %v1831_v55 = vadd.s32 %v5330_v25, %v5348_v11  ;;  %vm4073_vm14 = vcmp.lt.s32.totalorder %v4072_v7, 0  ;;  %v5430_v48 = vshll.u32 %v1991_v1, 8  ;;  %v5433_v20 = vmul.f32 %v1753_v54, %v1751_v36 }
 0x1ff   : > { %v1846_v35 = vsel %vm4073_vm14, 0, %v4072_v7  ;;  %v1998_v56 = vsub.s32 32, %v1997_v34  ;;  %v2090_v31 = vand.u32 2139095040, %v5377_v24  ;;  %v1861_v18 = vsub.s32 4, %v5390_v32 }
 0x200   : > { %v1847_v44 = vsub.s32 32, %v1846_v35  ;;  %v1851_v13 = vsub.s32 4294967266, %v1846_v35  ;;  %v1934_v61 = vmul.u32 %v5407_v39, %v1918_v40  ;;  %vm1936_vm15 = vc.u32 %v5419_v0, %v5424_v8 }
 0x201   : > { %v1937_v25 = vadd.s32 1, %v5425_v53  ;;  %v1996_v11 = vshrl.u32 %v1995_v5, 5  ;;  %v2001_v1 = vshrl.u32 %v6898_v14, %v1998_v56  ;;  %v2000_v58 = vshll.u32 %v6897_v28, %v1997_v34 }
 0x202   : > { %v1852_v54 = vadd.s32 127, %v1851_v13  ;;  %v2003_v57 = vshll.u32 %v6898_v14, %v1997_v34  ;;  %v2004_v47 = vshrl.u32 %v6899_v2, %v1998_v56  ;;  %v1849_v51 = vshrl.u32 %v1831_v55, %v1847_v44 }
 0x203   : > { %v1938_v4 = vsel %vm1936_vm15, %v1937_v25, %v5425_v53  ;;  %v2006_v39 = vshll.u32 %v6899_v2, %v1997_v34  ;;  %v2007_v36 = vshrl.u32 %v6900_v62, %v1998_v56  ;;  %v2002_v7 = vor.u32 %v2001_v1, %v2000_v58 }
 0x204   : > { %v1853_v52 = vshll.u32 %v1852_v54, 23  ;;  %v1939_v45 = vadd.s32 %v1938_v4, %v1934_v61  ;;  %v2009_v16 = vshll.u32 %v6900_v62, %v1997_v34  ;;  %v2005_v5 = vor.u32 %v2004_v47, %v2003_v57 }
 0x205   : > { %v2010_v40 = vshrl.u32 %v6888_v6, %v1998_v56  ;;  %v2012_v13 = vshll.u32 %v6888_v6, %v1997_v34  ;;  %v2013_v33 = vshrl.u32 %v6890_v27, %v1998_v56  ;;  %v1755_v55 = vxor.u32 2147483648, %v5433_v20 }
 0x206   : > { %v1862_v53 = vsel %vm1777_vm0, %v1861_v18, %v5390_v32  ;;  %v1940_v44 = vadd.s32 536870912, %v1939_v45  ;;  %v2008_v25 = vor.u32 %v2007_v36, %v2006_v39  ;;  %v6921_v61 = vand.u32 2147483647, %v4781_v41 }
 0x207   : > { %v1848_v54 = vshll.u32 %v5405_v46, %v1846_v35  ;;  %v1854_v58 = vor.u32 4788187, %v1853_v52  ;;  %v2011_v34 = vor.u32 %v2010_v40, %v2009_v16  ;;  %v2014_v57 = vor.u32 %v2013_v33, %v2012_v13 }
 0x208   : > { %vm5460_vm11 = vcmp.le.f32.partialorder %v6921_v61, 0.7853982  ;;  %v5465_v47 = vshrl.u32 %v1940_v44, 30  ;;  %vm2015_vm2 = vcmp.lt.s32.totalorder %v1996_v11, 1  ;;  %vm2018_vm4 = vcmp.lt.s32.totalorder %v1996_v11, 4 }
 0x209   : > { %v2091_v4 = vshrl.u32 %v2090_v31, 23  ;;  %v1850_v12 = vor.u32 %v1849_v51, %v1848_v54  ;;  %v1999_v32 = vshrl.u32 %v6897_v28, %v1998_v56  ;;  %v2023_v18 = vsel %vm2015_vm2, %v2002_v7, %v2005_v5 }
 0x20a   : > { %v2024_v39 = vsel %vm2018_vm4, %v2011_v34, 920167782  ;;  %v1942_v36 = vshll.u32 %v5465_v47, 30  ;;  %vm2016_vm3 = vcmp.lt.s32.totalorder %v1996_v11, 2  ;;  %vm2017_vm6 = vcmp.lt.s32.totalorder %v1996_v11, 3 }
 0x20b   : > { %v2020_v61 = vsel %vm2018_vm4, %v2008_v25, 2102212464  ;;  %v1855_v46 = vand.u32 2147483647, %v1854_v58  ;;  %v2025_v35 = vsel %vm2017_vm6, %v2008_v25, %v2024_v39  ;;  %v2027_v33 = vsel %vm2015_vm2, %v2005_v5, %v2008_v25  ;;  %v5497_v39 = vpop.f32.mrb[21].mxu0 }
 0x20c   : > { %v2028_v52 = vsel %vm2018_vm4, %v2014_v57, 1326507024  ;;  %v5471_v16 = vsub.s32 %v1939_v45, %v1942_v36  ;;  %v2019_v31 = vsel %vm2015_vm2, %v1999_v32, %v2002_v7  ;;  %v2026_v51 = vsel %vm2016_vm3, %v2023_v18, %v2025_v35  ;;  %v998_v35 = vpop.f32.mrb[22].mxu0 }
 0x20d   : > { %v4082_v56 = vadd.s32 4294967169, %v2091_v4  ;;  %v2021_v40 = vsel %vm2017_vm6, %v2005_v5, %v2020_v61  ;;  %v2029_v13 = vsel %vm2017_vm6, %v2011_v34, %v2028_v52  ;;  %4398 = vcosq.f32 %v5384_v49 }
 0x20e   : > { %v5476_v44 = vmul.u32.u64.low %v5430_v48, %v2026_v51  ;;  %v5477_v54 = vmul.u32.u64.high %v5430_v48, %v2026_v51, %v5476_v44  ;;  %v5482_v58 = vand.u32 3, %v5374_v23  ;;  %v1945_v45 = vsub.s32 0, %v5471_v16 }
 0x20f   : > { %v2030_v25 = vsel %vm2016_vm3, %v2027_v33, %v2029_v13  ;;  %v1756_v7 = vsel %vm1673_vm13, %v1755_v55, %v5433_v20  ;;  %v1857_v5 = vcvt.s32.f32 %v1850_v12  ;;  %v1864_v4 = vsel %vm5460_vm11, 0, %v1862_v53 }
 0x210   : > { %6924 = vst [vmem:[#allocation47_spill] sm:$0xff] %v5482_v58  ;;  %v5490_v34 = vmul.u32.u64.low %v5430_v48, %v2030_v25  ;;  %v5491_v57 = vmul.u32.u64.high %v5430_v48, %v2030_v25, %v5490_v34  ;;  %v4075_v32 = vmin.u32 %v1945_v45, %v5471_v16  ;;  %v2022_v23 = vsel %vm2016_vm3, %v2019_v31, %v2021_v40 }
 0x211   : > { %v2097_v18 = vadd.s32 1, %v4082_v56  ;;  %v5499_v36 = vmul.f32 %v1857_v5, %v1855_v46  ;;  %v2041_v61 = vadd.s32 1, %v5477_v54  ;;  %v6925_v12 = vand.u32 2147483647, %v5377_v24  ;;  %v999_v46 = vpop.f32.mrb[23].mxu0 }
 0x212   : > { %v5505_v55 = vadd.f32 1.5707964, %v5003_v38  ;;  %4400 = vsinq.f32 %v5384_v49  ;;  %v5511_v11 = vsel %vm5320_vm1, %v4779_v37, %v1756_v7  ;;  %v1947_v53 = vclz %v4075_v32 }
 0x213   : > { %v2094_v20 = vand.u32 8388607, %v6925_v12  ;;  %vm2098_vm13 = vcmp.gt.s32.totalorder %v2097_v18, 0  ;;  %v5513_v33 = vadd.s32 3, %v1864_v4  ;;  %v2038_v52 = vmul.u32 %v5430_v48, %v2022_v23 }
 0x214   : > { %vm2040_vm12 = vc.u32 %v5491_v57, %v5476_v44  ;;  %v2099_v38 = vsel %vm2098_vm13, %v2097_v18, 0  ;;  %v1935_v31 = vadd.s32 %v5424_v8, %v5419_v0  ;;  %v4076_v49 = vadd.s32 4294967294, %v1947_v53 }
 0x215   : > { %v2042_v51 = vsel %vm2040_vm12, %v2041_v61, %v5477_v54  ;;  %v2101_v29 = vand.u32 31, %v2099_v38  ;;  %v2095_v13 = vor.u32 8388608, %v2094_v20  ;;  %v2194_v45 = vand.u32 2139095040, %v5505_v55 }
 0x216   : > { %v2043_v40 = vadd.s32 %v2042_v51, %v2038_v52  ;;  %vm4077_vm1 = vcmp.lt.s32.totalorder %v4076_v49, 0  ;;  %v5523_v25 = vshrl.u32 %v2099_v38, 5  ;;  %vm1881_vm9 = vcmp.lt.s32.totalorder %v5285_v21, 0 }
 0x217   : > { %v2102_v48 = vsub.s32 32, %v2101_v29  ;;  %v2104_v7 = vshll.u32 %v6897_v28, %v2101_v29  ;;  %v1950_v5 = vsel %vm4077_vm1, 0, %v4076_v49  ;;  %v2107_v0 = vshll.u32 %v6898_v14, %v2101_v29  ;;  %v5528_v54 = vpop.eup %4398 }
 0x218   : > { %v2044_v34 = vadd.s32 536870912, %v2043_v40  ;;  %v2110_v8 = vshll.u32 %v6899_v2, %v2101_v29  ;;  %6926 = vst [vmem:[#allocation48_spill] sm:$0xff] %v5528_v54  ;;  %v1951_v4 = vsub.s32 32, %v1950_v5  ;;  %v1952_v32 = vshll.u32 %v5471_v16, %v1950_v5 }
 0x219   : > { %v1955_v23 = vsub.s32 4294967266, %v1950_v5  ;;  %v2113_v18 = vshll.u32 %v6900_v62, %v2101_v29  ;;  %v2105_v12 = vshrl.u32 %v6898_v14, %v2102_v48  ;;  %v2108_v20 = vshrl.u32 %v6899_v2, %v2102_v48 }
 0x21a   : > { %v5532_v61 = vshrl.u32 %v2044_v34, 30  ;;  %v2111_v35 = vshrl.u32 %v6900_v62, %v2102_v48  ;;  %v1953_v53 = vshrl.u32 %v1935_v31, %v1951_v4  ;;  %v2114_v52 = vshrl.u32 %v6888_v6, %v2102_v48 }
 0x21b   : > { %v1956_v46 = vadd.s32 127, %v1955_v23  ;;  %v2116_v38 = vshll.u32 %v6888_v6, %v2101_v29  ;;  %v2106_v16 = vor.u32 %v2105_v12, %v2104_v7  ;;  %v2109_v51 = vor.u32 %v2108_v20, %v2107_v0 }
 0x21c   : > { %6927 = vst [vmem:[#allocation49_spill] sm:$0xff] %v5532_v61  ;;  %v2046_v49 = vshll.u32 %v5532_v61, 30  ;;  %v2112_v5 = vor.u32 %v2111_v35, %v2110_v8  ;;  %v5540_v56 = vpop.eup %4400  ;;  %v1954_v34 = vor.u32 %v1953_v53, %v1952_v32  ;;  %v2115_v37 = vor.u32 %v2114_v52, %v2113_v18 }
 0x21d   : > { %v1957_v58 = vshll.u32 %v1956_v46, 23  ;;  %v2117_v54 = vshrl.u32 %v6890_v27, %v2102_v48  ;;  %v2103_v31 = vshrl.u32 %v6897_v28, %v2102_v48  ;;  %v2135_v4 = vshll.u32 %v2095_v13, 8 }
 0x21e   : > { %v5543_v30 = vsub.s32 %v2043_v40, %v2046_v49  ;;  %v2195_v23 = vshrl.u32 %v2194_v45, 23  ;;  %vm2119_vm7 = vcmp.lt.s32.totalorder %v5523_v25, 1  ;;  %vm2122_vm5 = vcmp.lt.s32.totalorder %v5523_v25, 4 }
 0x21f   : > { %v1958_v60 = vor.u32 4788187, %v1957_v58  ;;  %v2118_v29 = vor.u32 %v2117_v54, %v2116_v38  ;;  %vm2120_vm10 = vcmp.lt.s32.totalorder %v5523_v25, 2  ;;  %v2124_v0 = vsel %vm2122_vm5, %v2112_v5, 2102212464 }
 0x220   : > { %v2049_v7 = vsub.s32 0, %v5543_v30  ;;  %v2127_v8 = vsel %vm2119_vm7, %v2106_v16, %v2109_v51  ;;  %v1961_v40 = vcvt.s32.f32 %v1954_v34  ;;  %vm2121_vm14 = vcmp.lt.s32.totalorder %v5523_v25, 3 }
 0x221   : > { %v2128_v48 = vsel %vm2122_vm5, %v2115_v37, 920167782  ;;  %v2131_v13 = vsel %vm2119_vm7, %v2109_v51, %v2112_v5  ;;  %v1959_v45 = vand.u32 2147483647, %v1958_v60  ;;  %v2132_v32 = vsel %vm2122_vm5, %v2118_v29, 1326507024 }
 0x222   : > { %v4079_v58 = vmin.u32 %v2049_v7, %v5543_v30  ;;  %v2129_v54 = vsel %vm2121_vm14, %v2112_v5, %v2128_v48  ;;  %v2123_v18 = vsel %vm2119_vm7, %v2103_v31, %v2106_v16  ;;  %v2125_v12 = vsel %vm2121_vm14, %v2109_v51, %v2124_v0 }
 0x223   : > { %v2130_v20 = vsel %vm2120_vm10, %v2127_v8, %v2129_v54  ;;  %v2133_v35 = vsel %vm2121_vm14, %v2115_v37, %v2132_v32  ;;  %v6928_v53 = vand.u32 2147483647, %v5285_v21  ;;  %v1965_v16 = vsub.s32 4, %v5465_v47 }
 0x224   : > { %v2051_v52 = vclz %v4079_v58  ;;  %v2134_v60 = vsel %vm2120_vm10, %v2131_v13, %v2133_v35  ;;  %v5563_v38 = vmul.u32.u64.low %v2135_v4, %v2130_v20  ;;  %v5564_v49 = vmul.u32.u64.high %v2135_v4, %v2130_v20, %v5563_v38 }
 0x225   : > { %vm5557_vm15 = vcmp.le.f32.partialorder %v6928_v53, 0.7853982  ;;  %v5568_v51 = vmul.u32.u64.low %v2135_v4, %v2134_v60  ;;  %v5569_v5 = vmul.u32.u64.high %v2135_v4, %v2134_v60, %v5568_v51  ;;  %v4086_v37 = vadd.s32 4294967169, %v2195_v23 }
 0x226   : > { %v6931_v34 = vxor.u32 2147483648, %v5499_v36  ;;  %v1962_v29 = vmul.f32 %v1961_v40, %v1959_v45  ;;  %v4080_v7 = vadd.s32 4294967294, %v2051_v52  ;;  %v6827_v0 = vand.u32 2147483647, %v5505_v55 }
 0x227   : > { %4402 = vcosq.f32 %v5511_v11  ;;  %v2126_v8 = vsel %vm2120_vm10, %v2123_v18, %v2125_v12  ;;  %v2201_v48 = vadd.s32 1, %v4086_v37  ;;  %v5581_v13 = vadd.f32 1.5707964, %v5111_v59 }
 0x228   : > { %v1860_v31 = vsel %vm1777_vm0, %v6931_v34, %v5499_v36  ;;  %4404 = vsinq.f32 %v5511_v11  ;;  %v5585_v23 = vand.u32 3, %v5513_v33  ;;  %vm4081_vm2 = vcmp.lt.s32.totalorder %v4080_v7, 0 }
 0x229   : > { %6932 = vst [vmem:[#allocation50_spill] sm:$0xff] %v5581_v13  ;;  %v2145_v36 = vadd.s32 1, %v5564_v49  ;;  %v1863_v40 = vsel %vm5460_vm11, %v4781_v41, %v1860_v31  ;;  %v5594_v25 = vsel %vm1881_vm9, %v1965_v16, %v5465_v47  ;;  %v2054_v45 = vsel %vm4081_vm2, 0, %v4080_v7 }
 0x22a   : > { %vm2144_vm0 = vc.u32 %v5569_v5, %v5563_v38  ;;  %v1963_v59 = vxor.u32 2147483648, %v1962_v29  ;;  %v2059_v11 = vsub.s32 4294967266, %v2054_v45  ;;  %v2142_v33 = vmul.u32 %v2135_v4, %v2126_v8 }
 0x22b   : > { %v2198_v58 = vand.u32 8388607, %v6827_v0  ;;  %v2055_v54 = vsub.s32 32, %v2054_v45  ;;  %v2146_v32 = vsel %vm2144_vm0, %v2145_v36, %v5564_v49  ;;  %vm2202_vm4 = vcmp.gt.s32.totalorder %v2201_v48, 0 }
 0x22c   : > { %v2298_v1 = vand.u32 2139095040, %v5581_v13  ;;  %4406 = vcosq.f32 %v1863_v40  ;;  %v2060_v18 = vadd.s32 127, %v2059_v11  ;;  %v2147_v47 = vadd.s32 %v2146_v32, %v2142_v33 }
 0x22d   : > { %v2203_v12 = vsel %vm2202_vm4, %v2201_v48, 0  ;;  %4408 = vsinq.f32 %v1863_v40  ;;  %v2039_v4 = vadd.s32 %v5476_v44, %v5491_v57  ;;  %v1964_v53 = vsel %vm1881_vm9, %v1963_v59, %v1962_v29 }
 0x22e   : > { %v2205_v35 = vand.u32 31, %v2203_v12  ;;  %v2148_v52 = vadd.s32 536870912, %v2147_v47  ;;  %v2199_v60 = vor.u32 8388608, %v2198_v58  ;;  %v2299_v37 = vshrl.u32 %v2298_v1, 23 }
 0x22f   : > { %v2057_v16 = vshrl.u32 %v2039_v4, %v2055_v54  ;;  %v5611_v34 = vadd.f32 1.5707964, %v5166_v43  ;;  %v2061_v31 = vshll.u32 %v2060_v18, 23  ;;  %v5615_v8 = vshrl.u32 %v2203_v12, 5 }
 0x230   : > { %v2206_v51 = vsub.s32 32, %v2205_v35  ;;  %v5613_v7 = vshrl.u32 %v2148_v52, 30  ;;  %v2208_v44 = vshll.u32 %v6897_v28, %v2205_v35  ;;  %v2211_v48 = vshll.u32 %v6898_v14, %v2205_v35 }
 0x231   : > { %6933 = vst [vmem:[#allocation51_spill] sm:$0xff] %v5611_v34  ;;  %v5618_v57 = vpop.eup %4402  ;;  %v2214_v11 = vshll.u32 %v6899_v2, %v2205_v35  ;;  %v2217_v33 = vshll.u32 %v6900_v62, %v2205_v35  ;;  %v5633_v54 = vsel %vm5557_vm15, %v5285_v21, %v1964_v53  ;;  %v2056_v32 = vshll.u32 %v5543_v30, %v2054_v45 }
 0x232   : > { %6934 = vst [vmem:[#allocation52_spill] sm:$0xff] %v5618_v57  ;;  %v2209_v29 = vshrl.u32 %v6898_v14, %v2206_v51  ;;  %v2212_v36 = vshrl.u32 %v6899_v2, %v2206_v51  ;;  %v2215_v40 = vshrl.u32 %v6900_v62, %v2206_v51  ;;  %v5624_v59 = vpop.eup %4404  ;;  %v2150_v43 = vshll.u32 %v5613_v7, 30 }
 0x233   : > { %6935 = vst [vmem:[#allocation53_spill] sm:$0xff] %v5624_v59  ;;  %v2218_v58 = vshrl.u32 %v6888_v6, %v2206_v51  ;;  %v5638_v0 = vshll.u32 %v2199_v60, 8  ;;  %v2058_v20 = vor.u32 %v2057_v16, %v2056_v32  ;;  %v2062_v49 = vor.u32 4788187, %v2061_v31 }
 0x234   : > { %v2210_v1 = vor.u32 %v2209_v29, %v2208_v44  ;;  %v2213_v18 = vor.u32 %v2212_v36, %v2211_v48  ;;  %v5636_v12 = vsub.s32 %v2147_v47, %v2150_v43  ;;  %v2216_v4 = vor.u32 %v2215_v40, %v2214_v11 }
 0x235   : > { %v2219_v52 = vor.u32 %v2218_v58, %v2217_v33  ;;  %v2220_v61 = vshll.u32 %v6888_v6, %v2205_v35  ;;  %v2221_v57 = vshrl.u32 %v6890_v27, %v2206_v51  ;;  %vm2223_vm11 = vcmp.lt.s32.totalorder %v5615_v8, 1  ;;  %v4354_v58 = vld [vmem:[%s6765_s2] sm:$0xff]  }
 0x236   : > { %v5642_v59 = vpop.eup %4406  ;;  %v2153_v53 = vsub.s32 0, %v5636_v12  ;;  %v4090_v30 = vadd.s32 4294967169, %v2299_v37  ;;  %v6936_v45 = vand.u32 2147483647, %v5581_v13  ;;  %v2207_v60 = vshrl.u32 %v6897_v28, %v2206_v51  ;;  %4123 = vmatmul.mubr.msk.bf16.vlgmr.msra.gmra.mrb[0].mxu1 %vm810_vm8, %v4354_v58 }
 0x237   : > { %v5648_v44 = vpop.eup %4408  ;;  %v2222_v16 = vor.u32 %v2221_v57, %v2220_v61  ;;  %vm2226_vm3 = vcmp.lt.s32.totalorder %v5615_v8, 4  ;;  %v2231_v35 = vsel %vm2223_vm11, %v2210_v1, %v2213_v18  ;;  %vm2089_vm6 = vcmp.lt.s32.totalorder %v5377_v24, 0 }
 0x238   : > { %v2302_v47 = vand.u32 8388607, %v6936_v45  ;;  %v4083_v31 = vmin.u32 %v2153_v53, %v5636_v12  ;;  %vm2225_vm13 = vcmp.lt.s32.totalorder %v5615_v8, 3  ;;  %v2228_v37 = vsel %vm2226_vm3, %v2216_v4, 2102212464 }
 0x239   : > { %v2232_v29 = vsel %vm2226_vm3, %v2219_v52, 920167782  ;;  %v2063_v48 = vand.u32 2147483647, %v2062_v49  ;;  %v2065_v51 = vcvt.s32.f32 %v2058_v20  ;;  %vm2224_vm12 = vcmp.lt.s32.totalorder %v5615_v8, 2 }
 0x23a   : > { %v2233_v61 = vsel %vm2225_vm13, %v2216_v4, %v2232_v29  ;;  %v2155_v57 = vclz %v4083_v31  ;;  %v2227_v36 = vsel %vm2223_vm11, %v2207_v60, %v2210_v1  ;;  %v2235_v43 = vsel %vm2223_vm11, %v2213_v18, %v2216_v4 }
 0x23b   : > { %v2234_v40 = vsel %vm2224_vm12, %v2231_v35, %v2233_v61  ;;  %v2229_v11 = vsel %vm2225_vm13, %v2213_v18, %v2228_v37  ;;  %v2236_v20 = vsel %vm2226_vm3, %v2222_v16, 1326507024  ;;  %4410 = vcosq.f32 %v5633_v54 }
 0x23c   : > { %v5675_v49 = vmul.u32.u64.low %v5638_v0, %v2234_v40  ;;  %v5676_v33 = vmul.u32.u64.high %v5638_v0, %v2234_v40, %v5675_v49  ;;  %v2143_v32 = vadd.s32 %v5563_v38, %v5569_v5  ;;  %v4084_v1 = vadd.s32 4294967294, %v2155_v57 }
 0x23d   : > { %v2237_v18 = vsel %vm2225_vm13, %v2219_v52, %v2236_v20  ;;  %v5687_v4 = vmul.f32 %v2065_v51, %v2063_v48  ;;  %v2173_v53 = vsub.s32 4, %v5613_v7  ;;  %v2305_v60 = vadd.s32 1, %v4090_v30 }
 0x23e   : > { %v2238_v45 = vsel %vm2224_vm12, %v2235_v43, %v2237_v18  ;;  %vm4085_vm1 = vcmp.lt.s32.totalorder %v4084_v1, 0  ;;  %v2230_v16 = vsel %vm2224_vm12, %v2227_v36, %v2229_v11  ;;  %v6937_v35 = vmov 0  }
 0x23f   : > { %v5696_v38 = vmul.u32.u64.low %v5638_v0, %v2238_v45  ;;  %v5697_v5 = vmul.u32.u64.high %v5638_v0, %v2238_v45, %v5696_v38  ;;  %3067 = vmatprep.mubr.bf16.mxu1 %v6937_v35  ;;  %v2158_v52 = vsel %vm4085_vm1, 0, %v4084_v1  ;;  %v2249_v31 = vadd.s32 1, %v5676_v33 }
 0x240   : > { %v2303_v37 = vor.u32 8388608, %v2302_v47  ;;  %vm2306_vm7 = vcmp.gt.s32.totalorder %v2305_v60, 0  ;;  %v2159_v29 = vsub.s32 32, %v2158_v52  ;;  %v2163_v48 = vsub.s32 4294967266, %v2158_v52 }
 0x241   : > { %v2307_v30 = vsel %vm2306_vm7, %v2305_v60, 0  ;;  %v5706_v8 = vsel %vm2089_vm6, %v2173_v53, %v5613_v7  ;;  %v2246_v57 = vmul.u32 %v5638_v0, %v2230_v16  ;;  %v2160_v40 = vshll.u32 %v5636_v12, %v2158_v52  ;;  %v4355_v7 = vld [vmem:[%s6765_s2 + $0x8] sm:$0xff]  }
 0x242   : > { %v2309_v36 = vand.u32 31, %v2307_v30  ;;  %v2161_v43 = vshrl.u32 %v2143_v32, %v2159_v29  ;;  %v2164_v47 = vadd.s32 127, %v2163_v48  ;;  %vm2248_vm5 = vc.u32 %v5697_v5, %v5675_v49  ;;  %4124 = vmatmul.mubr.msk.bf16.gmra.mrb[4].mxu1 %vm810_vm8, %v4355_v7 }
 0x243   : > { %v2250_v11 = vsel %vm2248_vm5, %v2249_v31, %v5676_v33  ;;  %v5714_v1 = vshll.u32 %v2303_v37, 8  ;;  %vm1985_vm9 = vcmp.lt.s32.totalorder %v5310_v63, 0  ;;  %v2308_v31 = vshrl.u32 %v2307_v30, 5  ;;  %3077 = vmatprep.mubr.bf16.mxu1 %v6937_v35 }
 0x244   : > { %v2310_v20 = vsub.s32 32, %v2309_v36  ;;  %v2312_v58 = vshll.u32 %v6897_v28, %v2309_v36  ;;  %v2162_v0 = vor.u32 %v2161_v43, %v2160_v40  ;;  %v2165_v18 = vshll.u32 %v2164_v47, 23 }
 0x245   : > { %v2251_v53 = vadd.s32 %v2250_v11, %v2246_v57  ;;  %v2315_v12 = vshll.u32 %v6898_v14, %v2309_v36  ;;  %v2318_v33 = vshll.u32 %v6899_v2, %v2309_v36  ;;  %v5725_v16 = vpop.eup %4410  ;;  %v2321_v37 = vshll.u32 %v6900_v62, %v2309_v36 }
 0x246   : > { %v2313_v32 = vshrl.u32 %v6898_v14, %v2310_v20  ;;  %v2316_v45 = vshrl.u32 %v6899_v2, %v2310_v20  ;;  %v2319_v60 = vshrl.u32 %v6900_v62, %v2310_v20  ;;  %6938 = vst [vmem:[#allocation54_spill] sm:$0xff] %v5725_v16  ;;  %v2166_v38 = vor.u32 4788187, %v2165_v18 }
 0x247   : > { %v2252_v52 = vadd.s32 536870912, %v2251_v53  ;;  %v2322_v40 = vshrl.u32 %v6888_v6, %v2310_v20  ;;  %v2324_v11 = vshll.u32 %v6888_v6, %v2309_v36  ;;  %v2325_v7 = vshrl.u32 %v6890_v27, %v2310_v20 }
 0x248   : > { %v2314_v29 = vor.u32 %v2313_v32, %v2312_v58  ;;  %v2317_v48 = vor.u32 %v2316_v45, %v2315_v12  ;;  %v2320_v57 = vor.u32 %v2319_v60, %v2318_v33  ;;  %v2167_v43 = vand.u32 2147483647, %v2166_v38 }
 0x249   : > { %v5731_v47 = vshrl.u32 %v2252_v52, 30  ;;  %v6940_v18 = vand.u32 2147483647, %v5377_v24  ;;  %v2169_v51 = vcvt.s32.f32 %v2162_v0  ;;  %v2311_v58 = vshrl.u32 %v6897_v28, %v2310_v20  ;;  %v4356_v20 = vld [vmem:[%s6765_s2 + $0x10] sm:$0xff]  }
 0x24a   : > { %v2323_v12 = vor.u32 %v2322_v40, %v2321_v37  ;;  %v2402_v32 = vand.u32 2139095040, %v5611_v34  ;;  %v6943_v45 = vand.u32 2147483647, %v5310_v63  ;;  %v2326_v60 = vor.u32 %v2325_v7, %v2324_v11  ;;  %4125 = vmatmul.mubr.msk.bf16.gmra.mrb[8].mxu1 %vm810_vm8, %v4356_v20 }
 0x24b   : > { %6939 = vst [vmem:[#allocation55_spill] sm:$0xff] %v5731_v47  ;;  %vm5737_vm10 = vcmp.le.f32.partialorder %v6940_v18, 0.7853982  ;;  %v2254_v36 = vshll.u32 %v5731_v47, 30  ;;  %vm2327_vm2 = vcmp.lt.s32.totalorder %v2308_v31, 1  ;;  %vm2330_vm0 = vcmp.lt.s32.totalorder %v2308_v31, 4  ;;  %3087 = vmatprep.mubr.bf16.mxu1 %v6937_v35 }
 0x24c   : > { %vm5745_vm14 = vcmp.le.f32.partialorder %v6943_v45, 0.7853982  ;;  %vm2329_vm4 = vcmp.lt.s32.totalorder %v2308_v31, 3  ;;  %v2332_v38 = vsel %vm2330_vm0, %v2320_v57, 2102212464  ;;  %v2335_v0 = vsel %vm2327_vm2, %v2314_v29, %v2317_v48 }
 0x24d   : > { %v2336_v52 = vsel %vm2330_vm0, %v2323_v12, 920167782  ;;  %v2170_v37 = vmul.f32 %v2169_v51, %v2167_v43  ;;  %v5754_v40 = vsub.s32 %v2251_v53, %v2254_v36  ;;  %vm2328_vm11 = vcmp.lt.s32.totalorder %v2308_v31, 2 }
 0x24e   : > { %v2337_v18 = vsel %vm2329_vm4, %v2320_v57, %v2336_v52  ;;  %v2339_v11 = vsel %vm2327_vm2, %v2317_v48, %v2320_v57  ;;  %v2340_v7 = vsel %vm2330_vm0, %v2326_v60, 1326507024  ;;  %v2403_v61 = vshrl.u32 %v2402_v32, 23 }
 0x24f   : > { %v2338_v45 = vsel %vm2328_vm11, %v2335_v0, %v2337_v18  ;;  %v2257_v21 = vsub.s32 0, %v5754_v40  ;;  %v2331_v16 = vsel %vm2327_vm2, %v2311_v58, %v2314_v29  ;;  %v2333_v47 = vsel %vm2329_vm4, %v2317_v48, %v2332_v38 }
 0x250   : > { %v2341_v51 = vsel %vm2329_vm4, %v2323_v12, %v2340_v7  ;;  %v6946_v53 = vxor.u32 2147483648, %v5687_v4  ;;  %v5772_v32 = vmul.u32.u64.low %v5714_v1, %v2338_v45  ;;  %v5773_v36 = vmul.u32.u64.high %v5714_v1, %v2338_v45, %v5772_v32 }
 0x251   : > { %v2342_v43 = vsel %vm2328_vm11, %v2339_v11, %v2341_v51  ;;  %v2171_v29 = vxor.u32 2147483648, %v2170_v37  ;;  %v4087_v48 = vmin.u32 %v2257_v21, %v5754_v40  ;;  %4412 = vsinq.f32 %v5633_v54 }
 0x252   : > { %v2068_v57 = vsel %vm1985_vm9, %v6946_v53, %v5687_v4  ;;  %v5778_v58 = vmul.u32.u64.low %v5714_v1, %v2342_v43  ;;  %v5779_v12 = vmul.u32.u64.high %v5714_v1, %v2342_v43, %v5778_v58  ;;  %v6947_v4 = vsel %vm5557_vm15, 0, %v5594_v25 }
 0x253   : > { %v5786_v60 = vadd.s32 3, %v6947_v4  ;;  %v2334_v38 = vsel %vm2328_vm11, %v2331_v16, %v2333_v47  ;;  %v4094_v0 = vadd.s32 4294967169, %v2403_v61  ;;  %v2176_v52 = vsel %vm5737_vm10, 0, %v5706_v8 }
 0x254   : > { %v2259_v21 = vclz %v4087_v48  ;;  %v5794_v20 = vadd.f32 %v5436_v42, %v4754_v9  ;;  %v5798_v54 = vadd.f32 %v5497_v39, %v4756_v10  ;;  %v5803_v46 = vsel %vm5745_vm14, %v5310_v63, %v2068_v57  ;;  %v4357_v9 = vld [vmem:[%s6765_s2 + $0x18] sm:$0xff]  }
 0x255   : > { %6948 = vst [vmem:[#allocation56_spill] sm:$0xff] %v5786_v60  ;;  %v2353_v25 = vadd.s32 1, %v5773_v36  ;;  %v6949_v61 = vand.u32 2147483647, %v5611_v34  ;;  %v2409_v8 = vadd.s32 1, %v4094_v0  ;;  %v2172_v10 = vsel %vm2089_vm6, %v2171_v29, %v2170_v37  ;;  %4126 = vmatmul.mubr.msk.bf16.gmra.mrb[12].mxu1 %vm810_vm8, %v4357_v9 }
 0x256   : > { %v4088_v42 = vadd.s32 4294967294, %v2259_v21  ;;  %v2350_v39 = vmul.u32 %v5714_v1, %v2334_v38  ;;  %vm2352_vm15 = vc.u32 %v5779_v12, %v5772_v32  ;;  %v5818_v31 = vadd.s32 3, %v2176_v52  ;;  %3097 = vmatprep.mubr.bf16.mxu1 %v6937_v35 }
 0x257   : > { %v5808_v16 = vand.u32 8388607, %v6949_v61  ;;  %v2354_v47 = vsel %vm2352_vm15, %v2353_v25, %v5773_v36  ;;  %vm2410_vm3 = vcmp.gt.s32.totalorder %v2409_v8, 0  ;;  %v5822_v18 = vadd.f32 1.5707964, %v5253_v15 }
 0x258   : > { %6950 = vst [vmem:[#allocation57_spill] sm:$0xff] %v5818_v31  ;;  %4414 = vcosq.f32 %v5803_v46  ;;  %vm4089_vm13 = vcmp.lt.s32.totalorder %v4088_v42, 0  ;;  %v2355_v37 = vadd.s32 %v2354_v47, %v2350_v39  ;;  %v2411_v45 = vsel %vm2410_vm3, %v2409_v8, 0 }
 0x259   : > { %v5830_v1 = vsel %vm5737_vm10, %v5377_v24, %v2172_v10  ;;  %v2247_v11 = vadd.s32 %v5675_v49, %v5697_v5  ;;  %v2262_v7 = vsel %vm4089_vm13, 0, %v4088_v42  ;;  %v2413_v15 = vand.u32 31, %v2411_v45 }
 0x25a   : > { %v2263_v51 = vsub.s32 32, %v2262_v7  ;;  %v2267_v53 = vsub.s32 4294967266, %v2262_v7  ;;  %v2356_v57 = vadd.s32 536870912, %v2355_v37  ;;  %v2407_v43 = vor.u32 8388608, %v5808_v16 }
 0x25b   : > { %v2414_v36 = vsub.s32 32, %v2413_v15  ;;  %v2506_v48 = vand.u32 2139095040, %v5822_v18  ;;  %v5838_v58 = vadd.f32 1.5707964, %v5353_v17  ;;  %v2264_v30 = vshll.u32 %v5754_v40, %v2262_v7  ;;  %v5843_v5 = vpop.eup %4412 }
 0x25c   : > { %v2265_v4 = vshrl.u32 %v2247_v11, %v2263_v51  ;;  %v2268_v38 = vadd.s32 127, %v2267_v53  ;;  %v5841_v49 = vshrl.u32 %v2356_v57, 30  ;;  %6951 = vst [vmem:[#allocation58_spill] sm:$0xff] %v5843_v5  ;;  %v2416_v0 = vshll.u32 %v6897_v28, %v2413_v15 }
 0x25d   : > { %v2417_v52 = vshrl.u32 %v6898_v14, %v2414_v36  ;;  %v2420_v21 = vshrl.u32 %v6899_v2, %v2414_v36  ;;  %v2423_v25 = vshrl.u32 %v6900_v62, %v2414_v36  ;;  %v2422_v40 = vshll.u32 %v6899_v2, %v2413_v15 }
 0x25e   : > { %v2266_v61 = vor.u32 %v2265_v4, %v2264_v30  ;;  %v2269_v16 = vshll.u32 %v2268_v38, 23  ;;  %v2358_v17 = vshll.u32 %v5841_v49, 30  ;;  %v2412_v8 = vshrl.u32 %v2411_v45, 5 }
 0x25f   : > { %v2419_v9 = vshll.u32 %v6898_v14, %v2413_v15  ;;  %v2425_v10 = vshll.u32 %v6900_v62, %v2413_v15  ;;  %v2426_v42 = vshrl.u32 %v6888_v6, %v2414_v36  ;;  %v2418_v11 = vor.u32 %v2417_v52, %v2416_v0 }
 0x260   : > { %v2270_v39 = vor.u32 4788187, %v2269_v16  ;;  %v5854_v47 = vsub.s32 %v2355_v37, %v2358_v17  ;;  %v2424_v7 = vor.u32 %v2423_v25, %v2422_v40  ;;  %v2428_v57 = vshll.u32 %v6888_v6, %v2413_v15 }
 0x261   : > { %v2421_v51 = vor.u32 %v2420_v21, %v2419_v9  ;;  %v2427_v53 = vor.u32 %v2426_v42, %v2425_v10  ;;  %v2429_v30 = vshrl.u32 %v6890_v27, %v2414_v36  ;;  %v2273_v38 = vcvt.s32.f32 %v2266_v61 }
 0x262   : > { %v5858_v4 = vpop.eup %4414  ;;  %v2271_v45 = vand.u32 2147483647, %v2270_v39  ;;  %v2361_v29 = vsub.s32 0, %v5854_v47  ;;  %v2507_v31 = vshrl.u32 %v2506_v48, 23  ;;  %vm2193_vm6 = vcmp.lt.s32.totalorder %v5505_v55, 0 }
 0x263   : > { %v2415_v37 = vshrl.u32 %v6897_v28, %v2414_v36  ;;  %v2430_v16 = vor.u32 %v2429_v30, %v2428_v57  ;;  %vm2431_vm12 = vcmp.lt.s32.totalorder %v2412_v8, 1  ;;  %vm2434_vm1 = vcmp.lt.s32.totalorder %v2412_v8, 4 }
 0x264   : > { %v2274_v0 = vmul.f32 %v2273_v38, %v2271_v45  ;;  %v4091_v52 = vmin.u32 %v2361_v29, %v5854_v47  ;;  %vm2432_vm7 = vcmp.lt.s32.totalorder %v2412_v8, 2  ;;  %v2436_v15 = vsel %vm2434_vm1, %v2424_v7, 2102212464 }
 0x265   : > { %vm2433_vm5 = vcmp.lt.s32.totalorder %v2412_v8, 3  ;;  %v2435_v21 = vsel %vm2431_vm12, %v2415_v37, %v2418_v11  ;;  %v2439_v25 = vsel %vm2431_vm12, %v2418_v11, %v2421_v51  ;;  %v2440_v17 = vsel %vm2434_vm1, %v2427_v53, 920167782 }
 0x266   : > { %v2363_v61 = vclz %v4091_v52  ;;  %v2437_v40 = vsel %vm2433_vm5, %v2421_v51, %v2436_v15  ;;  %v2441_v9 = vsel %vm2433_vm5, %v2424_v7, %v2440_v17  ;;  %v2443_v48 = vsel %vm2431_vm12, %v2421_v51, %v2424_v7  ;;  %v4358_v7 = vld [vmem:[%s6765_s2 + $0x20] sm:$0xff]  }
 0x267   : > { %v2442_v10 = vsel %vm2432_vm7, %v2439_v25, %v2441_v9  ;;  %v2444_v42 = vsel %vm2434_vm1, %v2430_v16, 1326507024  ;;  %v2447_v36 = vshll.u32 %v2407_v43, 8  ;;  %v4098_v39 = vadd.s32 4294967169, %v2507_v31  ;;  %4127 = vmatmul.mubr.msk.bf16.gmra.mrb[16].mxu1 %vm810_vm8, %v4358_v7 }
 0x268   : > { %v6952_v57 = vand.u32 2147483647, %v5505_v55  ;;  %v6953_v30 = vmov 0  ;;  %v2275_v29 = vxor.u32 2147483648, %v2274_v0  ;;  %v4092_v45 = vadd.s32 4294967294, %v2363_v61  ;;  %3107 = vmatprep.mubr.bf16.mxu1 %v6937_v35 }
 0x269   : > { %v2445_v38 = vsel %vm2433_vm5, %v2427_v53, %v2444_v42  ;;  %v6956_v11 = vand.u32 2147483647, %v5822_v18  ;;  %v2438_v51 = vsel %vm2432_vm7, %v2435_v21, %v2437_v40  ;;  %4416 = vsinq.f32 %v5803_v46 }
 0x26a   : > { %vm5867_vm10 = vcmp.le.f32.partialorder %v6952_v57, 0.7853982  ;;  %v2446_v31 = vsel %vm2432_vm7, %v2443_v48, %v2445_v38  ;;  %v5878_v43 = vmul.u32.u64.low %v2447_v36, %v2442_v10  ;;  %v5879_v16 = vmul.u32.u64.high %v2447_v36, %v2442_v10, %v5878_v43 }
 0x26b   : > { %v6954_v30 = vsel %vm5867_vm10, 4294967295, %v6953_v30  ;;  %v2510_v37 = vand.u32 8388607, %v6956_v11  ;;  %vm4093_vm2 = vcmp.lt.s32.totalorder %v4092_v45, 0  ;;  %4418 = vcosq.f32 %v5830_v1 }
 0x26c   : > { %6955 = vst [vmem:[#allocation59_spill] sm:$0xff] %v6954_v30  ;;  %v5883_v52 = vmul.u32.u64.low %v2447_v36, %v2446_v31  ;;  %v5884_v53 = vmul.u32.u64.high %v2447_v36, %v2446_v31, %v5883_v52  ;;  %v2351_v15 = vadd.s32 %v5772_v32, %v5779_v12  ;;  %v2366_v21 = vsel %vm4093_vm2, 0, %v4092_v45  ;;  %v4359_v12 = vld [vmem:[%s6765_s2 + $0x28] sm:$0xff]  }
 0x26d   : > { %v2513_v8 = vadd.s32 1, %v4098_v39  ;;  %v2276_v25 = vsel %vm2193_vm6, %v2275_v29, %v2274_v0  ;;  %v2367_v17 = vsub.s32 32, %v2366_v21  ;;  %v2371_v46 = vsub.s32 4294967266, %v2366_v21 }
 0x26e   : > { %v2454_v61 = vmul.u32 %v2447_v36, %v2438_v51  ;;  %v2457_v40 = vadd.s32 1, %v5879_v16  ;;  %v2511_v9 = vor.u32 8388608, %v2510_v37  ;;  %v2610_v48 = vand.u32 2139095040, %v5838_v58 }
 0x26f   : > { %vm2514_vm0 = vcmp.gt.s32.totalorder %v2513_v8, 0  ;;  %v2368_v10 = vshll.u32 %v5854_v47, %v2366_v21  ;;  %v2369_v42 = vshrl.u32 %v2351_v15, %v2367_v17  ;;  %v2372_v32 = vadd.s32 127, %v2371_v46  ;;  %4128 = vmatmul.mubr.msk.bf16.gmra.mrb[20].mxu1 %vm810_vm8, %v4359_v12 }
 0x270   : > { %vm2456_vm4 = vc.u32 %v5884_v53, %v5878_v43  ;;  %v2515_v36 = vsel %vm2514_vm0, %v2513_v8, 0  ;;  %v6837_v39 = vand.u32 2147483647, %v5838_v58  ;;  %v2611_v57 = vshrl.u32 %v2610_v48, 23  ;;  %3117 = vmatprep.mubr.bf16.mxu1 %v6937_v35 }
 0x271   : > { %v2458_v0 = vsel %vm2456_vm4, %v2457_v40, %v5879_v16  ;;  %4420 = vsinq.f32 %v5830_v1  ;;  %v2370_v29 = vor.u32 %v2369_v42, %v2368_v10  ;;  %v2373_v45 = vshll.u32 %v2372_v32, 23 }
 0x272   : > { %v2459_v47 = vadd.s32 %v2458_v0, %v2454_v61  ;;  %v5907_v38 = vsel %vm5867_vm10, %v5505_v55, %v2276_v25  ;;  %v2381_v11 = vsub.s32 4, %v5841_v49  ;;  %v2517_v37 = vand.u32 31, %v2515_v36 }
 0x273   : > { %v5910_v7 = vshll.u32 %v2511_v9, 8  ;;  %vm2297_vm11 = vcmp.lt.s32.totalorder %v5581_v13, 0  ;;  %v2374_v51 = vor.u32 4788187, %v2373_v45  ;;  %v5913_v16 = vshrl.u32 %v2515_v36, 5  ;;  %v5924_v25 = vpop.eup %4416 }
 0x274   : > { %v2460_v31 = vadd.s32 536870912, %v2459_v47  ;;  %v5915_v1 = vadd.s32 4294967169, %v2611_v57  ;;  %v2377_v52 = vcvt.s32.f32 %v2370_v29  ;;  %v2518_v15 = vsub.s32 32, %v2517_v37 }
 0x275   : > { %v2520_v21 = vshll.u32 %v6897_v28, %v2517_v37  ;;  %v5921_v8 = vand.u32 8388607, %v6837_v39  ;;  %v2375_v17 = vand.u32 2147483647, %v2374_v51  ;;  %v2523_v61 = vshll.u32 %v6898_v14, %v2517_v37  ;;  %v5930_v9 = vpop.eup %4418  ;;  %v4360_v51 = vld [vmem:[%s6765_s2 + $0x30] sm:$0xff]  }
 0x276   : > { %v5926_v46 = vshrl.u32 %v2460_v31, 30  ;;  %v2526_v40 = vshll.u32 %v6899_v2, %v2517_v37  ;;  %6958 = vst [vmem:[#allocation61_spill] sm:$0xff] %v5930_v9  ;;  %v2521_v48 = vshrl.u32 %v6898_v14, %v2518_v15  ;;  %v2524_v10 = vshrl.u32 %v6899_v2, %v2518_v15 }
 0x277   : > { %v2527_v42 = vshrl.u32 %v6900_v62, %v2518_v15  ;;  %v2529_v32 = vshll.u32 %v6900_v62, %v2517_v37  ;;  %v6959_v12 = vand.u32 2147483647, %v5581_v13  ;;  %v2378_v36 = vmul.f32 %v2377_v52, %v2375_v17  ;;  %4129 = vmatmul.mubr.msk.bf16.gmra.mrb[24].mxu1 %vm810_vm8, %v4360_v51 }
 0x278   : > { %6957 = vst [vmem:[#allocation60_spill] sm:$0xff] %v5926_v46  ;;  %v2462_v57 = vshll.u32 %v5926_v46, 30  ;;  %v2530_v29 = vshrl.u32 %v6888_v6, %v2518_v15  ;;  %v2533_v45 = vshrl.u32 %v6890_v27, %v2518_v15  ;;  %v2522_v31 = vor.u32 %v2521_v48, %v2520_v21  ;;  %3127 = vmatprep.mubr.bf16.mxu1 %v6937_v35 }
 0x279   : > { %vm5938_vm15 = vcmp.le.f32.partialorder %v6959_v12, 0.7853982  ;;  %v2525_v39 = vor.u32 %v2524_v10, %v2523_v61  ;;  %v2528_v9 = vor.u32 %v2527_v42, %v2526_v40  ;;  %v2532_v24 = vshll.u32 %v6888_v6, %v2517_v37 }
 0x27a   : > { %v2379_v12 = vxor.u32 2147483648, %v2378_v36  ;;  %v5949_v5 = vsub.s32 %v2459_v47, %v2462_v57  ;;  %v2531_v60 = vor.u32 %v2530_v29, %v2529_v32  ;;  %vm2535_vm3 = vcmp.lt.s32.totalorder %v5913_v16, 1 }
 0x27b   : > { %v2519_v52 = vshrl.u32 %v6897_v28, %v2518_v15  ;;  %v2534_v17 = vor.u32 %v2533_v45, %v2532_v24  ;;  %vm2538_vm13 = vcmp.lt.s32.totalorder %v5913_v16, 4  ;;  %v2543_v46 = vsel %vm2535_vm3, %v2522_v31, %v2525_v39  ;;  %v5956_v30 = vpop.eup %4420 }
 0x27c   : > { %6962 = vst [vmem:[#allocation62_spill] sm:$0xff] %v5956_v30  ;;  %v2465_v21 = vsub.s32 0, %v5949_v5  ;;  %vm2537_vm12 = vcmp.lt.s32.totalorder %v5913_v16, 3  ;;  %v2540_v47 = vsel %vm2538_vm13, %v2528_v9, 2102212464  ;;  %v2380_v24 = vsel %vm2297_vm11, %v2379_v12, %v2378_v36 }
 0x27d   : > { %v2544_v37 = vsel %vm2538_vm13, %v2531_v60, 920167782  ;;  %vm2536_vm1 = vcmp.lt.s32.totalorder %v5913_v16, 2  ;;  %v2539_v15 = vsel %vm2535_vm3, %v2519_v52, %v2522_v31  ;;  %v2541_v48 = vsel %vm2537_vm12, %v2525_v39, %v2540_v47 }
 0x27e   : > { %v2545_v61 = vsel %vm2537_vm12, %v2528_v9, %v2544_v37  ;;  %v4095_v40 = vmin.u32 %v2465_v21, %v5949_v5  ;;  %v2547_v42 = vsel %vm2535_vm3, %v2525_v39, %v2528_v9  ;;  %v5983_v32 = vsel %vm2297_vm11, %v2381_v11, %v5841_v49  ;;  %v4361_v49 = vld [vmem:[%s6765_s2 + $0x38] sm:$0xff]  }
 0x27f   : > { %v2546_v10 = vsel %vm2536_vm1, %v2543_v46, %v2545_v61  ;;  %v2548_v36 = vsel %vm2538_vm13, %v2534_v17, 1326507024  ;;  %4422 = vcosq.f32 %v5907_v38  ;;  %v5996_v39 = vadd.f32 1.5707964, %v5794_v20  ;;  %4130 = vmatmul.mubr.msk.bf16.gmra.mrb[28].mxu1 %vm810_vm8, %v4361_v49 }
 0x280   : > { %v5988_v57 = vmul.u32.u64.low %v5910_v7, %v2546_v10  ;;  %v5989_v29 = vmul.u32.u64.high %v5910_v7, %v2546_v10, %v5988_v57  ;;  %v2467_v45 = vclz %v4095_v40  ;;  %v2549_v46 = vsel %vm2537_vm12, %v2531_v60, %v2548_v36  ;;  %3242 = vmatprep.mubr.bf16.mxu1 %v6937_v35 }
 0x281   : > { %v6004_v11 = vsel %vm5938_vm15, %v5581_v13, %v2380_v24  ;;  %v2542_v9 = vsel %vm2536_vm1, %v2539_v15, %v2541_v48  ;;  %v2550_v51 = vsel %vm2536_vm1, %v2547_v42, %v2549_v46  ;;  %v2617_v60 = vadd.s32 1, %v5915_v1 }
 0x282   : > { %v4096_v31 = vadd.s32 4294967294, %v2467_v45  ;;  %v6012_v20 = vmul.u32.u64.low %v5910_v7, %v2550_v51  ;;  %v6013_v12 = vmul.u32.u64.high %v5910_v7, %v2550_v51, %v6012_v20  ;;  %v2615_v52 = vor.u32 8388608, %v5921_v8 }
 0x283   : > { %4424 = vsinq.f32 %v5907_v38  ;;  %v2455_v21 = vadd.s32 %v5878_v43, %v5884_v53  ;;  %vm2618_vm7 = vcmp.gt.s32.totalorder %v2617_v60, 0  ;;  %v2561_v16 = vadd.s32 1, %v5989_v29 }
 0x284   : > { %4426 = vcosq.f32 %v6004_v11  ;;  %vm4097_vm5 = vcmp.lt.s32.totalorder %v4096_v31, 0  ;;  %v2619_v1 = vsel %vm2618_vm7, %v2617_v60, 0  ;;  %v2558_v8 = vmul.u32 %v5910_v7, %v2542_v9 }
 0x285   : > { %v2470_v47 = vsel %vm4097_vm5, 0, %v4096_v31  ;;  %v2621_v38 = vand.u32 31, %v2619_v1  ;;  %v6845_v37 = vand.u32 2147483647, %v5996_v39  ;;  %v6028_v43 = vshll.u32 %v2615_v52, 8 }
 0x286   : > { %v2471_v24 = vsub.s32 32, %v2470_v47  ;;  %v2475_v15 = vsub.s32 4294967266, %v2470_v47  ;;  %v2714_v53 = vand.u32 2139095040, %v5996_v39  ;;  %v2472_v61 = vshll.u32 %v5949_v5, %v2470_v47 }
 0x287   : > { %vm2560_vm2 = vc.u32 %v6013_v12, %v5988_v57  ;;  %v6034_v40 = vshrl.u32 %v2619_v1, 5  ;;  %v2622_v48 = vsub.s32 32, %v2621_v38  ;;  %v2624_v36 = vshll.u32 %v6897_v28, %v2621_v38 }
 0x288   : > { %v2473_v7 = vshrl.u32 %v2455_v21, %v2471_v24  ;;  %v2476_v10 = vadd.s32 127, %v2475_v15  ;;  %v2562_v42 = vsel %vm2560_vm2, %v2561_v16, %v5989_v29  ;;  %v2627_v49 = vshll.u32 %v6898_v14, %v2621_v38 }
 0x289   : > { %v2563_v45 = vadd.s32 %v2562_v42, %v2558_v8  ;;  %v2625_v46 = vshrl.u32 %v6898_v14, %v2622_v48  ;;  %v2628_v9 = vshrl.u32 %v6899_v2, %v2622_v48  ;;  %v6041_v5 = vpop.eup %4422  ;;  %v2630_v31 = vshll.u32 %v6899_v2, %v2621_v38 }
 0x28a   : > { %6963 = vst [vmem:[#allocation63_spill] sm:$0xff] %v6041_v5  ;;  %v2474_v51 = vor.u32 %v2473_v7, %v2472_v61  ;;  %v2477_v60 = vshll.u32 %v2476_v10, 23  ;;  %v2631_v20 = vshrl.u32 %v6900_v62, %v2622_v48  ;;  %v2633_v29 = vshll.u32 %v6900_v62, %v2621_v38 }
 0x28b   : > { %v2564_v52 = vadd.s32 536870912, %v2563_v45  ;;  %v2634_v21 = vshrl.u32 %v6888_v6, %v2622_v48  ;;  %v6049_v16 = vand.u32 8388607, %v6845_v37  ;;  %vm2505_vm8 = vcmp.lt.s32.totalorder %v5822_v18, 0 }
 0x28c   : > { %v2478_v1 = vor.u32 4788187, %v2477_v60  ;;  %v2626_v47 = vor.u32 %v2625_v46, %v2624_v36  ;;  %v2629_v8 = vor.u32 %v2628_v9, %v2627_v49  ;;  %v2632_v24 = vor.u32 %v2631_v20, %v2630_v31 }
 0x28d   : > { %v6052_v15 = vpop.eup %4424  ;;  %vm6861_vm0 = vcmp.lt.s32.totalorder %v5611_v34, 0  ;;  %v2565_v61 = vshrl.u32 %v2564_v52, 30  ;;  %v2635_v7 = vor.u32 %v2634_v21, %v2633_v29  ;;  %v2636_v10 = vshll.u32 %v6888_v6, %v2621_v38 }
 0x28e   : > { %6964 = vst [vmem:[#allocation64_spill] sm:$0xff] %v6052_v15  ;;  %v2637_v42 = vshrl.u32 %v6890_v27, %v2622_v48  ;;  %v6057_v17 = vpop.eup %4426  ;;  %v2479_v37 = vand.u32 2147483647, %v2478_v1  ;;  %v2481_v35 = vcvt.s32.f32 %v2474_v51  ;;  %v2623_v60 = vshrl.u32 %v6897_v28, %v2622_v48 }
 0x28f   : > { %6965 = vst [vmem:[#allocation65_spill] sm:$0xff] %v6057_v17  ;;  %vm2639_vm4 = vcmp.lt.s32.totalorder %v6034_v40, 1  ;;  %v2566_v36 = vshll.u32 %v2565_v61, 30  ;;  %vm2640_vm11 = vcmp.lt.s32.totalorder %v6034_v40, 2  ;;  %vm2642_vm3 = vcmp.lt.s32.totalorder %v6034_v40, 4 }
 0x290   : > { %v2638_v46 = vor.u32 %v2637_v42, %v2636_v10  ;;  %v6966_v49 = vand.u32 2147483647, %v5611_v34  ;;  %v6967_v38 = vmov 0  ;;  %v2482_v9 = vmul.f32 %v2481_v35, %v2479_v37 }
 0x291   : > { %v6970_v31 = vand.u32 2147483647, %v5822_v18  ;;  %vm2641_vm1 = vcmp.lt.s32.totalorder %v6034_v40, 3  ;;  %v2647_v48 = vsel %vm2639_vm4, %v2626_v47, %v2629_v8  ;;  %v2648_v20 = vsel %vm2642_vm3, %v2635_v7, 920167782 }
 0x292   : > { %vm6065_vm13 = vcmp.le.f32.partialorder %v6966_v49, 0.7853982  ;;  %v6080_v52 = vsub.s32 %v2563_v45, %v2566_v36  ;;  %v2589_v29 = vsub.s32 4, %v2565_v61  ;;  %v2644_v35 = vsel %vm2642_vm3, %v2632_v24, 2102212464 }
 0x293   : > { %v6968_v38 = vsel %vm6065_vm13, 4294967295, %v6967_v38  ;;  %vm6071_vm12 = vcmp.le.f32.partialorder %v6970_v31, 0.7853982  ;;  %v2649_v37 = vsel %vm2641_vm1, %v2632_v24, %v2648_v20  ;;  %v2483_v21 = vxor.u32 2147483648, %v2482_v9 }
 0x294   : > { %6969 = vst [vmem:[#allocation66_spill] sm:$0xff] %v6968_v38  ;;  %v2650_v1 = vsel %vm2640_vm11, %v2647_v48, %v2649_v37  ;;  %v2715_v10 = vshrl.u32 %v2714_v53, 23  ;;  %v6089_v42 = vadd.f32 1.5707964, %v5798_v54  ;;  %v2569_v49 = vsub.s32 0, %v6080_v52 }
 0x295   : > { %v2643_v45 = vsel %vm2639_vm4, %v2623_v60, %v2626_v47  ;;  %v2651_v36 = vsel %vm2639_vm4, %v2629_v8, %v2632_v24  ;;  %v2652_v31 = vsel %vm2642_vm3, %v2638_v46, 1326507024  ;;  %v2645_v20 = vsel %vm2641_vm1, %v2629_v8, %v2644_v35 }
 0x296   : > { %v2653_v53 = vsel %vm2641_vm1, %v2635_v7, %v2652_v31  ;;  %v6103_v54 = vmul.u32.u64.low %v6028_v43, %v2650_v1  ;;  %v6104_v48 = vmul.u32.u64.high %v6028_v43, %v2650_v1, %v6103_v54  ;;  %4428 = vsinq.f32 %v6004_v11 }
 0x297   : > { %v4099_v47 = vmin.u32 %v2569_v49, %v6080_v52  ;;  %v6111_v24 = vsel %vm2505_vm8, %v2589_v29, %v2565_v61  ;;  %v2654_v60 = vsel %vm2640_vm11, %v2651_v36, %v2653_v53  ;;  %v2484_v8 = vsel %vm6861_vm0, %v2483_v21, %v2482_v9 }
 0x298   : > { %v6118_v7 = vmul.u32.u64.low %v6028_v43, %v2654_v60  ;;  %v6119_v46 = vmul.u32.u64.high %v6028_v43, %v2654_v60, %v6118_v7  ;;  %v4106_v35 = vadd.s32 4294967169, %v2715_v10  ;;  %v2646_v11 = vsel %vm2640_vm11, %v2643_v45, %v2645_v20 }
 0x299   : > { %v2571_v37 = vclz %v4099_v47  ;;  %v2719_v1 = vor.u32 8388608, %v6049_v16  ;;  %v6847_v61 = vand.u32 2147483647, %v6089_v42  ;;  %v2559_v29 = vadd.s32 %v5988_v57, %v6013_v12 }
 0x29a   : > { %v2665_v49 = vadd.s32 1, %v6104_v48  ;;  %v2721_v36 = vadd.s32 1, %v4106_v35  ;;  %v2818_v9 = vand.u32 2139095040, %v6089_v42  ;;  %v6132_v21 = vsel %vm6065_vm13, %v5611_v34, %v2484_v8 }
 0x29b   : > { %v4100_v10 = vadd.s32 4294967294, %v2571_v37  ;;  %v6139_v16 = vand.u32 8388607, %v6847_v61  ;;  %v2662_v57 = vmul.u32 %v6028_v43, %v2646_v11  ;;  %vm2664_vm7 = vc.u32 %v6119_v46, %v6103_v54 }
 0x29c   : > { %vm2722_vm5 = vcmp.gt.s32.totalorder %v2721_v36, 0  ;;  %v2819_v12 = vshrl.u32 %v2818_v9, 23  ;;  %v2666_v45 = vsel %vm2664_vm7, %v2665_v49, %v6104_v48  ;;  %v6145_v20 = vshll.u32 %v2719_v1, 8 }
 0x29d   : > { %vm4101_vm2 = vcmp.lt.s32.totalorder %v4100_v10, 0  ;;  %v2723_v31 = vsel %vm2722_vm5, %v2721_v36, 0  ;;  %v2667_v47 = vadd.s32 %v2666_v45, %v2662_v57  ;;  %4430 = vcosq.f32 %v6132_v21 }
 0x29e   : > { %v2574_v53 = vsel %vm4101_vm2, 0, %v4100_v10  ;;  %v2725_v60 = vand.u32 31, %v2723_v31  ;;  %v2724_v37 = vshrl.u32 %v2723_v31, 5  ;;  %v4110_v40 = vadd.s32 4294967169, %v2819_v12 }
 0x29f   : > { %v2575_v7 = vsub.s32 32, %v2574_v53  ;;  %v2576_v35 = vshll.u32 %v6080_v52, %v2574_v53  ;;  %v2579_v43 = vsub.s32 4294967266, %v2574_v53  ;;  %v2668_v11 = vadd.s32 536870912, %v2667_v47 }
 0x2a0   : > { %v2726_v61 = vsub.s32 32, %v2725_v60  ;;  %v2728_v9 = vshll.u32 %v6897_v28, %v2725_v60  ;;  %v6150_v13 = vpop.eup %4428  ;;  %v2731_v49 = vshll.u32 %v6898_v14, %v2725_v60  ;;  %v2734_v36 = vshll.u32 %v6899_v2, %v2725_v60 }
 0x2a1   : > { %6973 = vst [vmem:[#allocation67_spill] sm:$0xff] %v6150_v13  ;;  %v2577_v48 = vshrl.u32 %v2559_v29, %v2575_v7  ;;  %v2580_v1 = vadd.s32 127, %v2579_v43  ;;  %v6154_v10 = vshrl.u32 %v2668_v11, 30  ;;  %v2737_v45 = vshll.u32 %v6900_v62, %v2725_v60 }
 0x2a2   : > { %v2729_v57 = vshrl.u32 %v6898_v14, %v2726_v61  ;;  %v2732_v52 = vshrl.u32 %v6899_v2, %v2726_v61  ;;  %v2735_v12 = vshrl.u32 %v6900_v62, %v2726_v61  ;;  %v2738_v8 = vshrl.u32 %v6888_v6, %v2726_v61 }
 0x2a3   : > { %6974 = vst [vmem:[#allocation68_spill] sm:$0xff] %v6154_v10  ;;  %v2578_v31 = vor.u32 %v2577_v48, %v2576_v35  ;;  %v2581_v53 = vshll.u32 %v2580_v1, 23  ;;  %v2670_v29 = vshll.u32 %v6154_v10, 30  ;;  %v2727_v7 = vshrl.u32 %v6897_v28, %v2726_v61 }
 0x2a4   : > { %v2730_v43 = vor.u32 %v2729_v57, %v2728_v9  ;;  %v2733_v17 = vor.u32 %v2732_v52, %v2731_v49  ;;  %v2736_v13 = vor.u32 %v2735_v12, %v2734_v36  ;;  %v2739_v38 = vor.u32 %v2738_v8, %v2737_v45 }
 0x2a5   : > { %v2582_v11 = vor.u32 4788187, %v2581_v53  ;;  %v2740_v34 = vshll.u32 %v6888_v6, %v2725_v60  ;;  %v2585_v30 = vcvt.s32.f32 %v2578_v31  ;;  %v6164_v5 = vsub.s32 %v2667_v47, %v2670_v29 }
 0x2a6   : > { %v2741_v35 = vshrl.u32 %v6890_v27, %v2726_v61  ;;  %vm2743_vm4 = vcmp.lt.s32.totalorder %v2724_v37, 1  ;;  %vm2745_vm11 = vcmp.lt.s32.totalorder %v2724_v37, 3  ;;  %vm2746_vm3 = vcmp.lt.s32.totalorder %v2724_v37, 4 }
 0x2a7   : > { %v2583_v48 = vand.u32 2147483647, %v2582_v11  ;;  %v2747_v1 = vsel %vm2743_vm4, %v2727_v7, %v2730_v43  ;;  %v2673_v10 = vsub.s32 0, %v6164_v5  ;;  %v2748_v9 = vsel %vm2746_vm3, %v2736_v13, 2102212464 }
 0x2a8   : > { %v2742_v15 = vor.u32 %v2741_v35, %v2740_v34  ;;  %v2751_v49 = vsel %vm2743_vm4, %v2730_v43, %v2733_v17  ;;  %v2749_v8 = vsel %vm2745_vm11, %v2733_v17, %v2748_v9  ;;  %v2752_v36 = vsel %vm2746_vm3, %v2739_v38, 920167782 }
 0x2a9   : > { %v2586_v57 = vmul.f32 %v2585_v30, %v2583_v48  ;;  %v2755_v60 = vsel %vm2743_vm4, %v2733_v17, %v2736_v13  ;;  %v4103_v47 = vmin.u32 %v2673_v10, %v6164_v5  ;;  %vm2744_vm1 = vcmp.lt.s32.totalorder %v2724_v37, 2 }
 0x2aa   : > { %v2753_v61 = vsel %vm2745_vm11, %v2736_v13, %v2752_v36  ;;  %v2756_v52 = vsel %vm2746_vm3, %v2742_v15, 1326507024  ;;  %v2750_v31 = vsel %vm2744_vm1, %v2747_v1, %v2749_v8  ;;  %v2825_v13 = vadd.s32 1, %v4110_v40 }
 0x2ab   : > { %v2587_v45 = vxor.u32 2147483648, %v2586_v57  ;;  %v2754_v53 = vsel %vm2744_vm1, %v2751_v49, %v2753_v61  ;;  %v2757_v12 = vsel %vm2745_vm11, %v2739_v38, %v2756_v52  ;;  %v2675_v29 = vclz %v4103_v47 }
 0x2ac   : > { %v2758_v34 = vsel %vm2744_vm1, %v2755_v60, %v2757_v12  ;;  %v6173_v7 = vmul.u32.u64.low %v6145_v20, %v2754_v53  ;;  %v6174_v30 = vmul.u32.u64.high %v6145_v20, %v2754_v53, %v6173_v7  ;;  %v6975_v15 = vsel %vm5938_vm15, 0, %v5983_v32 }
 0x2ad   : > { %v2588_v17 = vsel %vm2505_vm8, %v2587_v45, %v2586_v57  ;;  %v6180_v10 = vmul.u32.u64.low %v6145_v20, %v2758_v34  ;;  %v6181_v43 = vmul.u32.u64.high %v6145_v20, %v2758_v34, %v6180_v10  ;;  %v6187_v38 = vadd.s32 3, %v6975_v15 }
 0x2ae   : > { %v6976_v37 = vsel %vm6071_vm12, 0, %v6111_v24  ;;  %v4104_v35 = vadd.s32 4294967294, %v2675_v29  ;;  %4432 = vsinq.f32 %v6132_v21  ;;  %v6200_v40 = vsel %vm6071_vm12, %v5822_v18, %v2588_v17  ;;  %v6231_v17 = vpop.eup %4430 }
 0x2af   : > { %v6194_v11 = vadd.s32 3, %v6976_v37  ;;  %v2663_v0 = vadd.s32 %v6103_v54, %v6119_v46  ;;  %vm2826_vm15 = vcmp.gt.s32.totalorder %v2825_v13, 0  ;;  %v2766_v32 = vmul.u32 %v6145_v20, %v2750_v31 }
 0x2b0   : > { %vm4105_vm8 = vcmp.lt.s32.totalorder %v4104_v35, 0  ;;  %v2769_v48 = vadd.s32 1, %v6174_v30  ;;  %v2827_v24 = vsel %vm2826_vm15, %v2825_v13, 0  ;;  %vm2768_vm7 = vc.u32 %v6181_v43, %v6173_v7  ;;  %v3522_v13 = vld [vmem:[%s6768_s5 + $0x38] sm:$0xff] }
 0x2b1   : > { %v2678_v1 = vsel %vm4105_vm8, 0, %v4104_v35  ;;  %v6208_v21 = vshrl.u32 %v2827_v24, 5  ;;  %v6977_v51 = vor.u32 8388608, %v6139_v16  ;;  %4434 = vcosq.f32 %v6200_v40 }
 0x2b2   : > { %v2679_v54 = vsub.s32 32, %v2678_v1  ;;  %v2683_v46 = vsub.s32 4294967266, %v2678_v1  ;;  %v2770_v49 = vsel %vm2768_vm7, %v2769_v48, %v6174_v30  ;;  %v2680_v20 = vshll.u32 %v6164_v5, %v2678_v1 }
 0x2b3   : > { %v6212_v9 = vshll.u32 %v6977_v51, 8  ;;  %v2771_v57 = vadd.s32 %v2770_v49, %v2766_v32  ;;  %v2829_v8 = vand.u32 31, %v2827_v24  ;;  %vm2847_vm12 = vcmp.lt.s32.totalorder %v6208_v21, 1 }
 0x2b4   : > { %v2681_v36 = vshrl.u32 %v2663_v0, %v2679_v54  ;;  %v2684_v60 = vadd.s32 127, %v2683_v46  ;;  %vm2849_vm5 = vcmp.lt.s32.totalorder %v6208_v21, 3  ;;  %vm2850_vm2 = vcmp.lt.s32.totalorder %v6208_v21, 4 }
 0x2b5   : > { %v2772_v16 = vadd.s32 536870912, %v2771_v57  ;;  %v2830_v47 = vsub.s32 32, %v2829_v8  ;;  %v2832_v61 = vshll.u32 %v6897_v28, %v2829_v8  ;;  %v2835_v52 = vshll.u32 %v6898_v14, %v2829_v8 }
 0x2b6   : > { %vm2848_vm4 = vcmp.lt.s32.totalorder %v6208_v21, 2  ;;  %v2682_v45 = vor.u32 %v2681_v36, %v2680_v20  ;;  %v2685_v5 = vshll.u32 %v2684_v60, 23  ;;  %v2838_v31 = vshll.u32 %v6899_v2, %v2829_v8 }
 0x2b7   : > { %v2841_v53 = vshll.u32 %v6900_v62, %v2829_v8  ;;  %vm6860_vm11 = vcmp.lt.s32.totalorder %v5838_v58, 0  ;;  %v6226_v12 = vshrl.u32 %v2772_v16, 30  ;;  %v2831_v29 = vshrl.u32 %v6897_v28, %v2830_v47 }
 0x2b8   : > { %v2833_v34 = vshrl.u32 %v6898_v14, %v2830_v47  ;;  %v2836_v30 = vshrl.u32 %v6899_v2, %v2830_v47  ;;  %v6978_v10 = vand.u32 2147483647, %v5838_v58  ;;  %v2686_v15 = vor.u32 4788187, %v2685_v5  ;;  %v6241_v32 = vpop.eup %4432 }
 0x2b9   : > { %v2689_v37 = vcvt.s32.f32 %v2682_v45  ;;  %v2839_v35 = vshrl.u32 %v6900_v62, %v2830_v47  ;;  %v2842_v0 = vshrl.u32 %v6888_v6, %v2830_v47  ;;  %v2774_v28 = vshll.u32 %v6226_v12, 30 }
 0x2ba   : > { %vm6235_vm3 = vcmp.le.f32.partialorder %v6978_v10, 0.7853982  ;;  %v2834_v14 = vor.u32 %v2833_v34, %v2832_v61  ;;  %v2837_v2 = vor.u32 %v2836_v30, %v2835_v52  ;;  %v2844_v48 = vshll.u32 %v6888_v6, %v2829_v8 }
 0x2bb   : > { %v2687_v24 = vand.u32 2147483647, %v2686_v15  ;;  %v2840_v1 = vor.u32 %v2839_v35, %v2838_v31  ;;  %v2843_v51 = vor.u32 %v2842_v0, %v2841_v53  ;;  %v2845_v54 = vshrl.u32 %v6890_v27, %v2830_v47  ;;  %v6253_v36 = vpop.eup %4434 }
 0x2bc   : > { %v6246_v46 = vsub.s32 %v2771_v57, %v2774_v28  ;;  %v2851_v62 = vsel %vm2847_vm12, %v2831_v29, %v2834_v14  ;;  %v2855_v49 = vsel %vm2847_vm12, %v2834_v14, %v2837_v2  ;;  %v1248_v20 = vxor.u32 2147483648, %v5257_v3 }
 0x2bd   : > { %v2690_v60 = vmul.f32 %v2689_v37, %v2687_v24  ;;  %v2846_v16 = vor.u32 %v2845_v54, %v2844_v48  ;;  %v2852_v6 = vsel %vm2850_vm2, %v2840_v1, 2102212464  ;;  %v2856_v27 = vsel %vm2850_vm2, %v2843_v51, 920167782 }
 0x2be   : > { %v2777_v57 = vsub.s32 0, %v6246_v46  ;;  %v2853_v8 = vsel %vm2849_vm5, %v2837_v2, %v2852_v6  ;;  %v2857_v47 = vsel %vm2849_vm5, %v2840_v1, %v2856_v27  ;;  %v2859_v61 = vsel %vm2847_vm12, %v2837_v2, %v2840_v1  ;;  %v6981_v1 = vld [vmem:[#allocation28_spill] sm:$0xff] }
 0x2bf   : > { %v2691_v52 = vxor.u32 2147483648, %v2690_v60  ;;  %v2854_v45 = vsel %vm2848_vm4, %v2851_v62, %v2853_v8  ;;  %v2858_v5 = vsel %vm2848_vm4, %v2855_v49, %v2857_v47  ;;  %v2860_v31 = vsel %vm2850_vm2, %v2846_v16, 1326507024  ;;  %v6984_v16 = vld [vmem:[#allocation41_spill] sm:$0xff] }
 0x2c0   : > { %v4107_v53 = vmin.u32 %v2777_v57, %v6246_v46  ;;  %v2861_v29 = vsel %vm2849_vm5, %v2843_v51, %v2860_v31  ;;  %v6276_v34 = vmul.u32.u64.low %v6212_v9, %v2858_v5  ;;  %v6277_v30 = vmul.u32.u64.high %v6212_v9, %v2858_v5, %v6276_v34  ;;  %v6985_v57 = vld [vmem:[#allocation35_spill] sm:$0xff] }
 0x2c1   : > { %v2692_v10 = vsel %vm6860_vm11, %v2691_v52, %v2690_v60  ;;  %v2862_v15 = vsel %vm2848_vm4, %v2859_v61, %v2861_v29  ;;  %vm1246_vm1 = vcmp.lt.s32.totalorder %v5068_v50, 2  ;;  %vm1247_vm15 = vcmp.eq.s32.totalorder %v5068_v50, 0  ;;  %v3325_v29 = vld [vmem:[%s6766_s3 + $0x10] sm:$0xff] }
 0x2c2   : > { %v2695_v37 = vsel %vm6235_vm3, %v5838_v58, %v2692_v10  ;;  %v2779_v35 = vclz %v4107_v53  ;;  %v6290_v0 = vmul.u32.u64.low %v6212_v9, %v2862_v15  ;;  %v6291_v28 = vmul.u32.u64.high %v6212_v9, %v2862_v15, %v6290_v0  ;;  %3351 = vperm.xlu1 %4348, %v3325_v29  }
 0x2c3   : > { %4436 = vsinq.f32 %v6200_v40  ;;  %v2767_v14 = vadd.s32 %v6173_v7, %v6181_v43  ;;  %v2870_v21 = vmul.u32 %v6212_v9, %v2854_v45  ;;  %v1251_v2 = vxor.u32 2147483648, %v5183_v22  ;;  %v6982_v43 = vld [vmem:[#allocation37_spill] sm:$0xff] }
 0x2c4   : > { %v4108_v48 = vadd.s32 4294967294, %v2779_v35  ;;  %v2873_v24 = vadd.s32 1, %v6277_v30  ;;  %vm1243_vm8 = vweird.f32 %v6981_v1  ;;  %v1249_v51 = vsel %vm1247_vm15, %v5183_v22, %v1248_v20  ;;  %v6983_v20 = vld [vmem:[#allocation27_spill] sm:$0xff]  ;;  %v6986_v45 = vld [vmem:[#allocation33_spill] sm:$0xff] }
 0x2c5   : > { %vm1250_vm7 = vcmp.eq.s32.totalorder %v5068_v50, 2  ;;  %4438 = vcosq.f32 %v2695_v37  ;;  %vm1451_vm12 = vweird.f32 %v4773_v26  ;;  %v1456_v7 = vxor.u32 2147483648, %v5379_v19  ;;  %v3323_v50 = vld [vmem:[%s6766_s3] sm:$0xff] }
 0x2c6   : > { %v1252_v54 = vsel %vm1250_vm7, %v1251_v2, %v5257_v3  ;;  %4440 = vsinq.f32 %v2695_v37  ;;  %vm4109_vm5 = vcmp.lt.s32.totalorder %v4108_v48, 0  ;;  %vm2872_vm2 = vc.u32 %v6291_v28, %v6276_v34  ;;  %3341 = vperm.xlu0 %4347, %v3323_v50  }
 0x2c7   : > { %vm1454_vm4 = vcmp.lt.s32.totalorder %v6982_v43, 2  ;;  %v2782_v40 = vsel %vm4109_vm5, 0, %v4108_v48  ;;  %v2874_v9 = vsel %vm2872_vm2, %v2873_v24, %v6277_v30  ;;  %vm1455_vm15 = vcmp.eq.s32.totalorder %v6982_v43, 0  ;;  %v6988_v30 = vld [vmem:[#allocation29_spill] sm:$0xff]  ;;  %v6989_v48 = vld [vmem:[#allocation40_spill] sm:$0xff] }
 0x2c8   : > { %vm1458_vm11 = vcmp.eq.s32.totalorder %v6982_v43, 2  ;;  %v2783_v22 = vsub.s32 32, %v2782_v40  ;;  %v2787_v3 = vsub.s32 4294967266, %v2782_v40  ;;  %vm6863_vm7 = vcmp.lt.s32.totalorder %v6089_v42, 0 }
 0x2c9   : > { %v2875_v62 = vadd.s32 %v2874_v9, %v2870_v21  ;;  %v1253_v49 = vsel %vm1246_vm1, %v1249_v51, %v1252_v54  ;;  %vm1139_vm0 = vweird.f32 %v6983_v20  ;;  %v2784_v60 = vshll.u32 %v6246_v46, %v2782_v40  ;;  %v6987_v46 = vld [vmem:[#allocation34_spill] sm:$0xff]  ;;  %v3326_v51 = vld [vmem:[%s6766_s3 + $0x18] sm:$0xff] }
 0x2ca   : > { %v1457_v6 = vsel %vm1455_vm15, %v6984_v16, %v1456_v7  ;;  %v1459_v27 = vxor.u32 2147483648, %v6984_v16  ;;  %v1144_v8 = vxor.u32 2147483648, %v6985_v57  ;;  %v2785_v47 = vshrl.u32 %v2767_v14, %v2783_v22  ;;  %3356 = vperm.xlu1 %4348, %v3326_v51  }
 0x2cb   : > { %v2788_v61 = vadd.s32 127, %v2787_v3  ;;  %v2876_v52 = vadd.s32 536870912, %v2875_v62  ;;  %vm1143_vm5 = vcmp.eq.s32.totalorder %v6986_v45, 0  ;;  %vm1146_vm1 = vcmp.eq.s32.totalorder %v6986_v45, 2 }
 0x2cc   : > { %v1460_v5 = vsel %vm1458_vm11, %v1459_v27, %v5379_v19  ;;  %v1145_v31 = vsel %vm1143_vm5, %v6987_v46, %v1144_v8  ;;  %v1147_v53 = vxor.u32 2147483648, %v6987_v46  ;;  %vm1347_vm2 = vweird.f32 %v6988_v30  ;;  %v3324_v19 = vld [vmem:[%s6766_s3 + $0x8] sm:$0xff]  ;;  %v6995_v46 = vld [vmem:[#allocation43_spill] sm:$0xff] }
 0x2cd   : > { %v2786_v10 = vor.u32 %v2785_v47, %v2784_v60  ;;  %v2789_v15 = vshll.u32 %v2788_v61, 23  ;;  %v2877_v37 = vshrl.u32 %v2876_v52, 30  ;;  %v1461_v35 = vsel %vm1454_vm4, %v1457_v6, %v1460_v5  ;;  %v6338_v0 = vpop.eup %4436  ;;  %3346 = vperm.xlu0 %4347, %v3324_v19  }
 0x2ce   : > { %vm6862_vm11 = vcmp.lt.s32.totalorder %v5996_v39, 0  ;;  %v1254_v14 = vsel %vm1243_vm8, nan, %v1253_v49  ;;  %v1462_v21 = vsel %vm1451_vm12, nan, %v1461_v35  ;;  %v1148_v2 = vsel %vm1146_vm1, %v1147_v53, %v6985_v57  ;;  %v6993_v49 = vld [vmem:[#allocation36_spill] sm:$0xff] }
 0x2cf   : > { %v1352_v24 = vxor.u32 2147483648, %v6989_v48  ;;  %v6990_v54 = vand.u32 2147483647, %v5996_v39  ;;  %v2790_v43 = vor.u32 4788187, %v2789_v15  ;;  %v2878_v1 = vshll.u32 %v2877_v37, 30  ;;  %v6357_v26 = vpop.eup %4438 }
 0x2d0   : > { %v2901_v40 = vsub.s32 4, %v2877_v37  ;;  %vm1142_vm8 = vcmp.lt.s32.totalorder %v6986_v45, 2  ;;  %v6361_v9 = vadd.s32 %v6276_v34, %v6291_v28  ;;  %v2936_v22 = vpack.c.bf16 %v1462_v21, %v1254_v14  ;;  %v6364_v60 = vpop.eup %4440  ;;  %v3327_v57 = vld [vmem:[%s6766_s3 + $0x20] sm:$0xff]  ;;  %v6994_v28 = vld [vmem:[#allocation38_spill] sm:$0xff]  ;;  %v3330_v21 = vld [vmem:[%s6766_s3 + $0x38] sm:$0xff] }
 0x2d1   : > { %vm6352_vm4 = vcmp.le.f32.partialorder %v6990_v54, 0.7853982  ;;  %v1149_v3 = vsel %vm1142_vm8, %v1145_v31, %v1148_v2  ;;  %vm1350_vm12 = vcmp.lt.s32.totalorder %v6993_v49, 2  ;;  %v2791_v16 = vand.u32 2147483647, %v2790_v43  ;;  %v6996_v31 = vld [vmem:[#allocation48_spill] sm:$0xff]  ;;  %3361 = vperm.xlu0 %4347, %v3327_v57  }
 0x2d2   : > { %v2793_v6 = vcvt.s32.f32 %v2786_v10  ;;  %v6366_v27 = vsub.s32 %v2875_v62, %v2878_v1  ;;  %vm1351_vm15 = vcmp.eq.s32.totalorder %v6993_v49, 0  ;;  %v6374_v34 = vsel %vm6863_vm7, %v2901_v40, %v2877_v37  ;;  %3210 = vmatprep.subr.bf16.mxu1 %v2936_v22  ;;  %v3328_v62 = vld [vmem:[%s6766_s3 + $0x28] sm:$0xff]  ;;  %v3329_v37 = vld [vmem:[%s6766_s3 + $0x30] sm:$0xff]  ;;  %v6997_v54 = vld [vmem:[#allocation31_spill] sm:$0xff] }
 0x2d3   : > { %v1353_v8 = vsel %vm1351_vm15, %v6994_v28, %v1352_v24  ;;  %vm1354_vm5 = vcmp.eq.s32.totalorder %v6993_v49, 2  ;;  %v1355_v47 = vxor.u32 2147483648, %v6994_v28  ;;  %v1150_v45 = vsel %vm1139_vm0, nan, %v1149_v3  ;;  %3366 = vperm.xlu1 %4348, %v3328_v62   ;;  %v3331_v40 = vld [vmem:[%s6766_s3 + $0x40] sm:$0xff]  ;;  %v6998_v22 = vld [vmem:[#allocation30_spill] sm:$0xff]  ;;  %v3332_v57 = vld [vmem:[%s6766_s3 + $0x48] sm:$0xff] }
 0x2d4   : > { %v2794_v61 = vmul.f32 %v2793_v6, %v2791_v16  ;;  %v2881_v52 = vsub.s32 0, %v6366_v27  ;;  %v1664_v50 = vxor.u32 2147483648, %v5540_v56  ;;  %vm1663_vm1 = vcmp.eq.s32.totalorder %v6995_v46, 0  ;;  %v6999_v3 = vld [vmem:[#allocation32_spill] sm:$0xff]  ;;  %v7000_v16 = vld [vmem:[#allocation46_spill] sm:$0xff] }
 0x2d5   : > { %v1356_v5 = vsel %vm1354_vm5, %v1355_v47, %v6989_v48  ;;  %vm1666_vm8 = vcmp.eq.s32.totalorder %v6995_v46, 2  ;;  %v1667_v53 = vxor.u32 2147483648, %v6996_v31  ;;  %vm1662_vm0 = vcmp.lt.s32.totalorder %v6995_v46, 2  ;;  %3371 = vperm.xlu0 %4347, %v3329_v37   ;;  %v7001_v28 = vld [vmem:[#allocation42_spill] sm:$0xff]  ;;  %v7005_v37 = vld [vmem:[#allocation52_spill] sm:$0xff] }
 0x2d6   : > { %v2795_v29 = vxor.u32 2147483648, %v2794_v61  ;;  %v4111_v10 = vmin.u32 %v2881_v52, %v6366_v27  ;;  %v1357_v15 = vsel %vm1350_vm12, %v1353_v8, %v1356_v5  ;;  %v1665_v20 = vsel %vm1663_vm1, %v6996_v31, %v1664_v50  ;;  %v7002_v8 = vld [vmem:[#allocation45_spill] sm:$0xff]  ;;  %v3333_v5 = vld [vmem:[%s6766_s3 + $0x50] sm:$0xff]  ;;  %v7003_v31 = vld [vmem:[#allocation47_spill] sm:$0xff] }
 0x2d7   : > { %v1358_v35 = vsel %vm1347_vm2, nan, %v1357_v15  ;;  %v1668_v19 = vsel %vm1666_vm8, %v1667_v53, %v5540_v56  ;;  %v1872_v14 = vxor.u32 2147483648, %v5648_v44  ;;  %vm1659_vm2 = vweird.f32 %v6997_v54  ;;  %3376 = vperm.xlu1 %4348, %v3330_v21   ;;  %v7004_v53 = vld [vmem:[#allocation53_spill] sm:$0xff] }
 0x2d8   : > { %v2796_v2 = vsel %vm6862_vm11, %v2795_v29, %v2794_v61  ;;  %v2883_v48 = vclz %v4111_v10  ;;  %v2935_v24 = vpack.c.bf16 %v1358_v35, %v1150_v45  ;;  %v1669_v51 = vsel %vm1662_vm0, %v1665_v20, %v1668_v19  ;;  %v3334_v10 = vld [vmem:[%s6766_s3 + $0x58] sm:$0xff]  ;;  %v7006_v21 = vld [vmem:[#allocation49_spill] sm:$0xff] }
 0x2d9   : > { %v2799_v30 = vsel %vm6352_vm4, %v5996_v39, %v2796_v2  ;;  %vm1867_vm12 = vweird.f32 %v4781_v41  ;;  %vm1871_vm15 = vcmp.eq.s32.totalorder %v5585_v23, 0  ;;  %vm1870_vm5 = vcmp.lt.s32.totalorder %v5585_v23, 2  ;;  %3381 = vperm.xlu0 %4347, %v3331_v40  }
 0x2da   : > { %v4112_v56 = vadd.s32 4294967294, %v2883_v48  ;;  %3211 = vmatpush1.bf16.msra.mxu1 %v2935_v24  ;;  %v1873_v43 = vsel %vm1871_vm15, %v5642_v59, %v1872_v14  ;;  %v1875_v1 = vxor.u32 2147483648, %v5642_v59  ;;  %vm1555_vm1 = vweird.f32 %v6998_v22 }
 0x2db   : > { %vm1763_vm8 = vweird.f32 %v6999_v3  ;;  %4442 = vcosq.f32 %v2799_v30  ;;  %v1670_v49 = vsel %vm1659_vm2, nan, %v1669_v51  ;;  %vm1874_vm0 = vcmp.eq.s32.totalorder %v5585_v23, 2  ;;  %3386 = vperm.xlu1 %4348, %v3332_v57  }
 0x2dc   : > { %v1560_v6 = vxor.u32 2147483648, %v7000_v16  ;;  %vm4113_vm15 = vcmp.lt.s32.totalorder %v4112_v56, 0  ;;  %v1876_v59 = vsel %vm1874_vm0, %v1875_v1, %v5648_v44  ;;  %vm1558_vm11 = vcmp.lt.s32.totalorder %v7001_v28, 2  ;;  %v3336_v1 = vld [vmem:[%s6766_s3 + $0x68] sm:$0xff] }
 0x2dd   : > { %v1563_v47 = vxor.u32 2147483648, %v7002_v8  ;;  %v2886_v62 = vsel %vm4113_vm15, 0, %v4112_v56  ;;  %v1877_v61 = vsel %vm1870_vm5, %v1873_v43, %v1876_v59  ;;  %vm1559_vm2 = vcmp.eq.s32.totalorder %v7001_v28, 0  ;;  %3391 = vperm.xlu0 %4347, %v3333_v5   ;;  %v7007_v56 = vld [vmem:[#allocation55_spill] sm:$0xff]  ;;  %v7012_v5 = vld [vmem:[#allocation64_spill] sm:$0xff] }
 0x2de   : > { %vm1562_vm7 = vcmp.eq.s32.totalorder %v7001_v28, 2  ;;  %v2887_v52 = vsub.s32 32, %v2886_v62  ;;  %v2891_v45 = vsub.s32 4294967266, %v2886_v62  ;;  %v1878_v50 = vsel %vm1867_vm12, nan, %v1877_v61 }
 0x2df   : > { %v1561_v44 = vsel %vm1559_vm2, %v7002_v8, %v1560_v6  ;;  %v2938_v46 = vpack.c.bf16 %v1878_v50, %v1670_v49  ;;  %v1564_v23 = vsel %vm1562_vm7, %v1563_v47, %v7000_v16  ;;  %vm1767_vm5 = vcmp.eq.s32.totalorder %v7003_v31, 0  ;;  %3396 = vperm.xlu1 %4348, %v3334_v10   ;;  %v7014_v10 = vld [vmem:[#allocation56_spill] sm:$0xff] }
 0x2e0   : > { %v1768_v29 = vxor.u32 2147483648, %v7004_v53  ;;  %v2888_v41 = vshll.u32 %v6366_v27, %v2886_v62  ;;  %v2889_v15 = vshrl.u32 %v6361_v9, %v2887_v52  ;;  %v2892_v20 = vadd.s32 127, %v2891_v45  ;;  %v3335_v27 = vld [vmem:[%s6766_s3 + $0x60] sm:$0xff]  ;;  %v3337_v45 = vld [vmem:[%s6766_s3 + $0x70] sm:$0xff] }
 0x2e1   : > { %v1771_v35 = vxor.u32 2147483648, %v7005_v37  ;;  %3212 = vmatprep.subr.bf16.mxu1 %v2938_v46  ;;  %v1565_v19 = vsel %vm1558_vm11, %v1561_v44, %v1564_v23  ;;  %vm1770_vm7 = vcmp.eq.s32.totalorder %v7003_v31, 2  ;;  %v2069_v2 = vsub.s32 4, %v7006_v21  ;;  %3401 = vperm.xlu0 %4347, %v3335_v27   ;;  %v3338_v23 = vld [vmem:[%s6766_s3 + $0x78] sm:$0xff] }
 0x2e2   : > { %v1769_v14 = vsel %vm1767_vm5, %v7005_v37, %v1768_v29  ;;  %v2890_v48 = vor.u32 %v2889_v15, %v2888_v41  ;;  %v2893_v24 = vshll.u32 %v2892_v20, 23  ;;  %vm1766_vm12 = vcmp.lt.s32.totalorder %v7003_v31, 2  ;;  %v7015_v15 = vld [vmem:[#allocation58_spill] sm:$0xff] }
 0x2e3   : > { %v1772_v9 = vsel %vm1770_vm7, %v1771_v35, %v7004_v53  ;;  %4444 = vsinq.f32 %v2799_v30  ;;  %v2070_v54 = vsel %vm1985_vm9, %v2069_v2, %v7006_v21  ;;  %v2277_v43 = vsub.s32 4, %v7007_v56  ;;  %3406 = vperm.xlu1 %4348, %v3336_v1   ;;  %v7013_v53 = vld [vmem:[#allocation63_spill] sm:$0xff]  ;;  %v7016_v35 = vld [vmem:[#allocation54_spill] sm:$0xff] }
 0x2e4   : > { %v1773_v51 = vsel %vm1766_vm12, %v1769_v14, %v1772_v9  ;;  %v2894_v40 = vor.u32 4788187, %v2893_v24  ;;  %v1566_v49 = vsel %vm1555_vm1, nan, %v1565_v19  ;;  %v2072_v30 = vsel %vm5745_vm14, 0, %v2070_v54  ;;  %v3516_v9 = vld [vmem:[%s6768_s5 + $0x8] sm:$0xff] }
 0x2e5   : > { %v1774_v16 = vsel %vm1763_vm8, nan, %v1773_v51  ;;  %v6471_v6 = vpop.eup %4442  ;;  %v7008_v57 = vand.u32 2147483647, %v6089_v42  ;;  %v2076_v8 = vadd.s32 3, %v2072_v30  ;;  %v2080_v47 = vxor.u32 2147483648, %v5924_v25  ;;  %3411 = vperm.xlu0 %4347, %v3337_v45   ;;  %v7019_v30 = vld [vmem:[#allocation44_spill] sm:$0xff] }
 0x2e6   : > { %v2937_v28 = vpack.c.bf16 %v1774_v16, %v1566_v49  ;;  %v2278_v22 = vsel %vm2193_vm6, %v2277_v43, %v7007_v56  ;;  %v2895_v3 = vand.u32 2147483647, %v2894_v40  ;;  %v2897_v33 = vcvt.s32.f32 %v2890_v48  ;;  %v3515_v48 = vld [vmem:[%s6768_s5] sm:$0xff]  ;;  %v3517_v49 = vld [vmem:[%s6768_s5 + $0x10] sm:$0xff]  ;;  %v7018_v16 = vld [vmem:[#allocation39_spill] sm:$0xff] }
 0x2e7   : > { %vm6475_vm9 = vcmp.le.f32.partialorder %v7008_v57, 0.7853982  ;;  %v2083_v62 = vxor.u32 2147483648, %v5858_v4  ;;  %v2280_v52 = vsel %vm5867_vm10, 0, %v2278_v22  ;;  %vm2075_vm14 = vweird.f32 %v5310_v63  ;;  %3416 = vperm.xlu1 %4348, %v3338_v23   ;;  %v7020_v57 = vld [vmem:[#allocation57_spill] sm:$0xff] }
 0x2e8   : > { %3213 = vmatpush1.bf16.msra.mxu1 %v2937_v28  ;;  %v2077_v50 = vand.u32 3, %v2076_v8  ;;  %v2284_v44 = vadd.s32 3, %v2280_v52  ;;  %v2288_v46 = vxor.u32 2147483648, %v7012_v5  ;;  %v2898_v31 = vmul.f32 %v2897_v33, %v2895_v3  ;;  %v3518_v8 = vld [vmem:[%s6768_s5 + $0x18] sm:$0xff]  ;;  %v7022_v3 = vld [vmem:[#allocation61_spill] sm:$0xff] }
 0x2e9   : > { %v2291_v29 = vxor.u32 2147483648, %v7013_v53  ;;  %v1973_v41 = vand.u32 3, %v7014_v10  ;;  %v1976_v20 = vxor.u32 2147483648, %v7015_v15  ;;  %v1979_v19 = vxor.u32 2147483648, %v7016_v35  ;;  %3533 = vperm.xlu0 %4347, %v3515_v48  }
 0x2ea   : > { %vm2079_vm6 = vcmp.eq.s32.totalorder %v2077_v50, 0  ;;  %vm2082_vm10 = vcmp.eq.s32.totalorder %v2077_v50, 2  ;;  %v2285_v37 = vand.u32 3, %v2284_v44  ;;  %v2899_v14 = vxor.u32 2147483648, %v2898_v31  ;;  %v7024_v44 = vld [vmem:[#allocation51_spill] sm:$0xff] }
 0x2eb   : > { %vm2078_vm11 = vcmp.lt.s32.totalorder %v2077_v50, 2  ;;  %v2081_v21 = vsel %vm2079_vm6, %v5858_v4, %v2080_v47  ;;  %v2084_v2 = vsel %vm2082_vm10, %v2083_v62, %v5924_v25  ;;  %vm2283_vm1 = vweird.f32 %v5505_v55  ;;  %3538 = vperm.xlu1 %4348, %v3516_v9   ;;  %v7021_v47 = vld [vmem:[#allocation62_spill] sm:$0xff]  ;;  %v7023_v62 = vld [vmem:[#allocation60_spill] sm:$0xff] }
 0x2ec   : > { %v2085_v24 = vsel %vm2078_vm11, %v2081_v21, %v2084_v2  ;;  %vm2287_vm8 = vcmp.eq.s32.totalorder %v2285_v37, 0  ;;  %vm2290_vm0 = vcmp.eq.s32.totalorder %v2285_v37, 2  ;;  %vm7017_vm15 = vcmp.lt.s32.totalorder %v6089_v42, 0  ;;  %v3521_v9 = vld [vmem:[%s6768_s5 + $0x30] sm:$0xff] }
 0x2ed   : > { %v2900_v27 = vsel %vm7017_vm15, %v2899_v14, %v2898_v31  ;;  %vm2286_vm2 = vcmp.lt.s32.totalorder %v2285_v37, 2  ;;  %v2289_v4 = vsel %vm2287_vm8, %v7013_v53, %v2288_v46  ;;  %v2292_v25 = vsel %vm2290_vm0, %v2291_v29, %v7012_v5  ;;  %v6511_v51 = vpop.eup %4444  ;;  %3543 = vperm.xlu0 %4347, %v3517_v49   ;;  %v3519_v46 = vld [vmem:[%s6768_s5 + $0x20] sm:$0xff] }
 0x2ee   : > { %v2086_v54 = vsel %vm2075_vm14, nan, %v2085_v24  ;;  %v2293_v55 = vsel %vm2286_vm2, %v2289_v4, %v2292_v25  ;;  %vm1975_vm5 = vcmp.eq.s32.totalorder %v1973_v41, 0  ;;  %vm1978_vm7 = vcmp.eq.s32.totalorder %v1973_v41, 2  ;;  %v7027_v29 = vld [vmem:[#allocation68_spill] sm:$0xff] }
 0x2ef   : > { %v2903_v56 = vsel %vm6475_vm9, %v6089_v42, %v2900_v27  ;;  %v2294_v43 = vsel %vm2283_vm1, nan, %v2293_v55  ;;  %v1977_v1 = vsel %vm1975_vm5, %v7016_v35, %v1976_v20  ;;  %v1980_v40 = vsel %vm1978_vm7, %v1979_v19, %v7015_v15  ;;  %3548 = vperm.xlu1 %4348, %v3518_v8  }
 0x2f0   : > { %v2940_v63 = vpack.c.bf16 %v2294_v43, %v2086_v54  ;;  %vm1971_vm12 = vweird.f32 %v7018_v16  ;;  %vm2179_vm14 = vweird.f32 %v7019_v30  ;;  %v2181_v28 = vand.u32 3, %v7020_v57  ;;  %v7029_v54 = vld [vmem:[#allocation67_spill] sm:$0xff]  ;;  %v7031_v16 = vld [vmem:[#allocation50_spill] sm:$0xff]  ;;  %v3523_v30 = vld [vmem:[%s6768_s5 + $0x40] sm:$0xff] }
 0x2f1   : > { %vm1974_vm6 = vcmp.lt.s32.totalorder %v1973_v41, 2  ;;  %v2184_v22 = vxor.u32 2147483648, %v7021_v47  ;;  %v2187_v33 = vxor.u32 2147483648, %v7022_v3  ;;  %v2485_v61 = vsub.s32 4, %v7023_v62  ;;  %v3520_v41 = vld [vmem:[%s6768_s5 + $0x28] sm:$0xff]  ;;  %3553 = vperm.xlu0 %4347, %v3519_v46  }
 0x2f2   : > { %4446 = vcosq.f32 %v2903_v56  ;;  %3214 = vmatprep.subr.bf16.mxu1 %v2940_v63  ;;  %v1981_v52 = vsel %vm1974_vm6, %v1977_v1, %v1980_v40  ;;  %vm2183_vm10 = vcmp.eq.s32.totalorder %v2181_v28, 0  ;;  %vm2186_vm11 = vcmp.eq.s32.totalorder %v2181_v28, 2 }
 0x2f3   : > { %vm2182_vm1 = vcmp.lt.s32.totalorder %v2181_v28, 2  ;;  %v2185_v45 = vsel %vm2183_vm10, %v7022_v3, %v2184_v22  ;;  %v2188_v50 = vsel %vm2186_vm11, %v2187_v33, %v7021_v47  ;;  %vm7025_vm8 = vcmp.lt.s32.totalorder %v7024_v44, 0  ;;  %3558 = vperm.xlu1 %4348, %v3520_v41  }
 0x2f4   : > { %v2486_v5 = vsel %vm7025_vm8, %v2485_v61, %v7023_v62  ;;  %4448 = vsinq.f32 %v2903_v56  ;;  %v2189_v23 = vsel %vm2182_vm1, %v2185_v45, %v2188_v50  ;;  %v2693_v10 = vsub.s32 4, %v7027_v29 }
 0x2f5   : > { %v2488_v53 = vsel %vm6065_vm13, 0, %v2486_v5  ;;  %v1982_v15 = vsel %vm1971_vm12, nan, %v1981_v52  ;;  %v2190_v20 = vsel %vm2179_vm14, nan, %v2189_v23  ;;  %vm2491_vm0 = vweird.f32 %v7024_v44  ;;  %3563 = vperm.xlu0 %4347, %v3521_v9   ;;  %v3525_v52 = vld [vmem:[%s6768_s5 + $0x50] sm:$0xff] }
 0x2f6   : > { %v2492_v37 = vadd.s32 3, %v2488_v53  ;;  %v2939_v35 = vpack.c.bf16 %v2190_v20, %v1982_v15  ;;  %v2496_v19 = vxor.u32 2147483648, %v6241_v32  ;;  %v2499_v14 = vxor.u32 2147483648, %v6231_v17 }
 0x2f7   : > { %vm7028_vm13 = vcmp.lt.s32.totalorder %v5838_v58, 0  ;;  %vm2699_vm15 = vweird.f32 %v5838_v58  ;;  %v2389_v24 = vand.u32 3, %v6187_v38  ;;  %v2704_v4 = vxor.u32 2147483648, %v6364_v60  ;;  %v7030_v38 = vld [vmem:[#allocation65_spill] sm:$0xff]  ;;  %3568 = vperm.xlu1 %4348, %v3522_v13   ;;  %v3526_v58 = vld [vmem:[%s6768_s5 + $0x58] sm:$0xff] }
 0x2f8   : > { %v2694_v21 = vsel %vm7028_vm13, %v2693_v10, %v7027_v29  ;;  %v2493_v2 = vand.u32 3, %v2492_v37  ;;  %3215 = vmatpush1.bf16.msra.mxu1 %v2939_v35  ;;  %v2707_v25 = vxor.u32 2147483648, %v6357_v26  ;;  %v2392_v55 = vxor.u32 2147483648, %v7029_v54  ;;  %v3527_v29 = vld [vmem:[%s6768_s5 + $0x60] sm:$0xff] }
 0x2f9   : > { %v2696_v48 = vsel %vm6235_vm3, 0, %v2694_v21  ;;  %v2395_v56 = vxor.u32 2147483648, %v7030_v38  ;;  %v2597_v43 = vand.u32 3, %v6194_v11  ;;  %vm2387_vm7 = vweird.f32 %v7031_v16  ;;  %3573 = vperm.xlu0 %4347, %v3523_v30  }
 0x2fa   : > { %v2700_v27 = vadd.s32 3, %v2696_v48  ;;  %vm2495_vm3 = vcmp.eq.s32.totalorder %v2493_v2, 0  ;;  %vm2498_vm2 = vcmp.eq.s32.totalorder %v2493_v2, 2  ;;  %vm2494_vm5 = vcmp.lt.s32.totalorder %v2493_v2, 2  ;;  %v3821_v48 = vld [vmem:[%s6770_s7] sm:$0x7] }
 0x2fb   : > { %v2497_v1 = vsel %vm2495_vm3, %v6231_v17, %v2496_v19  ;;  %v2500_v40 = vsel %vm2498_vm2, %v2499_v14, %v6241_v32  ;;  %vm2390_vm12 = vcmp.lt.s32.totalorder %v2389_v24, 2  ;;  %vm2391_vm14 = vcmp.eq.s32.totalorder %v2389_v24, 0  ;;  %v3524_v17 = vld [vmem:[%s6768_s5 + $0x48] sm:$0xff]  ;;  %v3529_v14 = vld [vmem:[%s6768_s5 + $0x70] sm:$0xff] }
 0x2fc   : > { %v2701_v49 = vand.u32 3, %v2700_v27  ;;  %v2501_v63 = vsel %vm2494_vm5, %v2497_v1, %v2500_v40  ;;  %v4447_v57 = vpop.eup %4446  ;;  %v2393_v11 = vsel %vm2391_vm14, %v7030_v38, %v2392_v55  ;;  %vm2394_vm11 = vcmp.eq.s32.totalorder %v2389_v24, 2  ;;  %3578 = vperm.xlu1 %4348, %v3524_v17   ;;  %v4362_v55 = vld [vmem:[%s6764_s1] sm:$0xff]   ;;  %v4369_v1 = vld [vmem:[%s6764_s1 + $0x38] sm:$0xff]  }
 0x2fd   : > { %v2396_v8 = vsel %vm2394_vm11, %v2395_v56, %v7029_v54  ;;  %v2502_v22 = vsel %vm2491_vm0, nan, %v2501_v63  ;;  %vm2599_vm8 = vcmp.eq.s32.totalorder %v2597_v43, 0  ;;  %v2600_v33 = vxor.u32 2147483648, %v6338_v0  ;;  %3583 = vperm.xlu0 %4347, %v3525_v52   ;;  %v4366_v38 = vld [vmem:[%s6764_s1 + $0x20] sm:$0xff]   ;;  %v4367_v56 = vld [vmem:[%s6764_s1 + $0x28] sm:$0xff]  }
 0x2fe   : > { %vm2703_vm6 = vcmp.eq.s32.totalorder %v2701_v49, 0  ;;  %vm2706_vm10 = vcmp.eq.s32.totalorder %v2701_v49, 2  ;;  %vm2702_vm1 = vcmp.lt.s32.totalorder %v2701_v49, 2  ;;  %v4449_v47 = vpop.eup %4448  ;;  %v2397_v61 = vsel %vm2390_vm12, %v2393_v11, %v2396_v8 }
 0x2ff   : > { %v2705_v32 = vsel %vm2703_vm6, %v6357_v26, %v2704_v4  ;;  %v2708_v28 = vsel %vm2706_vm10, %v2707_v25, %v6364_v60  ;;  %v2603_v26 = vxor.u32 2147483648, %v6253_v36  ;;  %v2904_v60 = vsel %vm6475_vm9, 0, %v6374_v34 }
 0x300   : > { %v2709_v3 = vsel %vm2702_vm1, %v2705_v32, %v2708_v28  ;;  %v2601_v50 = vsel %vm2599_vm8, %v6253_v36, %v2600_v33  ;;  %vm2602_vm0 = vcmp.eq.s32.totalorder %v2597_v43, 2  ;;  %v2908_v44 = vadd.s32 3, %v2904_v60  ;;  %3588 = vperm.xlu1 %4348, %v3526_v58  }
 0x301   : > { %v2710_v62 = vsel %vm2699_vm15, nan, %v2709_v3  ;;  %vm2598_vm13 = vcmp.lt.s32.totalorder %v2597_v43, 2  ;;  %v2604_v5 = vsel %vm2602_vm0, %v2603_v26, %v6338_v0  ;;  %v2912_v46 = vxor.u32 2147483648, %v4449_v47  ;;  %3593 = vperm.xlu0 %4347, %v3527_v29   ;;  %v4368_v43 = vld [vmem:[%s6764_s1 + $0x30] sm:$0xff]  }
 0x302   : > { %v2942_v45 = vpack.c.bf16 %v2710_v62, %v2502_v22  ;;  %v2915_v59 = vxor.u32 2147483648, %v4447_v57  ;;  %vm2595_vm9 = vweird.f32 %v5822_v18  ;;  %v2605_v34 = vsel %vm2598_vm13, %v2601_v50, %v2604_v5  ;;  %v3528_v18 = vld [vmem:[%s6768_s5 + $0x68] sm:$0xff] }
 0x303   : > { %v2909_v23 = vand.u32 3, %v2908_v44  ;;  %v2797_v31 = vsub.s32 4, %v6226_v12  ;;  %v2398_v36 = vsel %vm2387_vm7, nan, %v2397_v61  ;;  %v2606_v53 = vsel %vm2595_vm9, nan, %v2605_v34 }
 0x304   : > { %3216 = vmatprep.subr.bf16.mxu1 %v2942_v45  ;;  %v2941_v0 = vpack.c.bf16 %v2606_v53, %v2398_v36  ;;  %vm7032_vm5 = vcmp.lt.s32.totalorder %v5996_v39, 0  ;;  %vm2907_vm7 = vweird.f32 %v6089_v42  ;;  %vm3203_vm12 = vcmask 1043456   ;;  %3598 = vperm.xlu1 %4348, %v3528_v18   ;;  %v3530_v42 = vld [vmem:[%s6768_s5 + $0x78] sm:$0xff] }
 0x305   : > { %vm2911_vm15 = vcmp.eq.s32.totalorder %v2909_v23, 0  ;;  %vm2914_vm3 = vcmp.eq.s32.totalorder %v2909_v23, 2  ;;  %vm2910_vm2 = vcmp.lt.s32.totalorder %v2909_v23, 2  ;;  %v2798_v15 = vsel %vm7032_vm5, %v2797_v31, %v6226_v12  ;;  %3603 = vperm.xlu0 %4347, %v3529_v14  }
 0x306   : > { %v2913_v10 = vsel %vm2911_vm15, %v4447_v57, %v2912_v46  ;;  %v2916_v41 = vsel %vm2914_vm3, %v2915_v59, %v4449_v47  ;;  %3217 = vmatpush1.bf16.msra.mxu1 %v2941_v0  ;;  %v2800_v37 = vsel %vm6352_vm4, 0, %v2798_v15  ;;  %v2808_v2 = vxor.u32 2147483648, %v6511_v51 }
 0x307   : > { %v2917_v20 = vsel %vm2910_vm2, %v2913_v10, %v2916_v41  ;;  %v2804_v19 = vadd.s32 3, %v2800_v37  ;;  %v2811_v12 = vxor.u32 2147483648, %v6471_v6  ;;  %vm2803_vm10 = vweird.f32 %v5996_v39  ;;  %v4363_v39 = vld [vmem:[%s6764_s1 + $0x8] sm:$0xff]  }
 0x308   : > { %v2918_v35 = vsel %vm2907_vm7, nan, %v2917_v20  ;;  %3608 = vperm.xlu1 %4348, %v3530_v42   ;;  %vm3178_vm11 = vcmask 588800   ;;  %v7033_v13 = vmov 0  }
 0x309   : > { %v2944_v21 = vpack.c.bf16 %v2918_v35, %v2918_v35  ;;  %v2805_v7 = vand.u32 3, %v2804_v19  ;;  %3824 = vperm.xlu0 %4347, %v3821_v48  }
 0x30b   : > { %4139 = vmatprep.subr.msk.bf16.mxu1 %vm3203_vm12, %v2944_v21  ;;  %vm2807_vm4 = vcmp.eq.s32.totalorder %v2805_v7, 0  ;;  %vm2810_vm14 = vcmp.eq.s32.totalorder %v2805_v7, 2  ;;  %vm2806_vm6 = vcmp.lt.s32.totalorder %v2805_v7, 2 }
 0x30c   : > { %v2809_v24 = vsel %vm2807_vm4, %v6471_v6, %v2808_v2  ;;  %v2812_v9 = vsel %vm2810_vm14, %v2811_v12, %v6511_v51  ;;  %v4364_v6 = vld [vmem:[%s6764_s1 + $0x10] sm:$0xff]   ;;  %v4365_v51 = vld [vmem:[%s6764_s1 + $0x18] sm:$0xff]  }
 0x30d   : > { %v2813_v27 = vsel %vm2806_vm6, %v2809_v24, %v2812_v9 }
 0x30e   : > { %v2814_v4 = vsel %vm2803_vm10, nan, %v2813_v27 }
 0x30f   : > { %v2943_v25 = vpack.c.bf16 %v2814_v4, %v2814_v4 }
 0x311   : > { %v3205_v54 = vsel %vm3203_vm12, %v2943_v25, 0 }
 0x312   : > { %3219 = vmatpush1.bf16.msra.mxu1 %v3205_v54 }
 0x315   : > { %4140 = vmatmul.mubr.msk.bf16.vlgmr.msra.gmra.mrb[0].mxu1 %vm3178_vm11, %v4362_v55 }
 0x316   : > { %3252 = vmatprep.mubr.bf16.mxu1 %v7033_v13 }
 0x31d   : > { %4141 = vmatmul.mubr.msk.bf16.gmra.mrb[4].mxu1 %vm3178_vm11, %v4363_v39 }
 0x31e   : > { %3262 = vmatprep.mubr.bf16.mxu1 %v7033_v13 }
 0x325   : > { %4142 = vmatmul.mubr.msk.bf16.gmra.mrb[8].mxu1 %vm3178_vm11, %v4364_v6 }
 0x326   : > { %3272 = vmatprep.mubr.bf16.mxu1 %v7033_v13 }
 0x32d   : > { %4143 = vmatmul.mubr.msk.bf16.gmra.mrb[12].mxu1 %vm3178_vm11, %v4365_v51 }
 0x32e   : > { %3282 = vmatprep.mubr.bf16.mxu1 %v7033_v13 }
 0x335   : > { %4144 = vmatmul.mubr.msk.bf16.gmra.mrb[16].mxu1 %vm3178_vm11, %v4366_v38 }
 0x336   : > { %3292 = vmatprep.mubr.bf16.mxu1 %v7033_v13 }
 0x33d   : > { %4145 = vmatmul.mubr.msk.bf16.gmra.mrb[20].mxu1 %vm3178_vm11, %v4367_v56 }
 0x33e   : > { %3302 = vmatprep.mubr.bf16.mxu1 %v7033_v13 }
 0x341   : > { %v3352_v28 = vpop.permute.xlu1 %3351 }
 0x345   : > { %4146 = vmatmul.mubr.msk.bf16.gmra.mrb[24].mxu1 %vm3178_vm11, %v4368_v43  ;;  %v3342_v40 = vpop.permute.xlu0 %3341 }
 0x346   : > { %3312 = vmatprep.mubr.bf16.mxu1 %v7033_v13 }
 0x349   : > { %v3357_v45 = vpop.permute.xlu1 %3356 }
 0x34c   : > { %v3347_v30 = vpop.permute.xlu0 %3346 }
 0x34d   : > { %4147 = vmatmul.mubr.msk.bf16.gmra.mrb[28].mxu1 %vm3178_vm11, %v4369_v1 }
 0x34e   : > { %3859 = vmatprep.mubr.bf16.mxu1 %v7033_v13 }
 0x350   : > { %v3362_v53 = vpop.permute.xlu0 %3361 }
 0x352   : > { %v3367_v41 = vpop.permute.xlu1 %3366 }
 0x354   : > { %v3372_v7 = vpop.permute.xlu0 %3371 }
 0x356   : > { %v3377_v4 = vpop.permute.xlu1 %3376 }
 0x3e8   : > { %v3244_v49 = vpop.f32.mrb[0].mxu1 }
 0x3e9   : > { %v3419_v63 = vadd.f32 %v3342_v40, %v3244_v49  ;;  %v3246_v16 = vpop.f32.mrb[1].mxu1 }
 0x3ea   : > { %v3420_v57 = vadd.f32 %v3342_v40, %v3246_v16  ;;  %v3248_v11 = vpop.f32.mrb[2].mxu1  ;;  %v3382_v40 = vpop.permute.xlu0 %3381 }
 0x3eb   : > { %v3421_v17 = vadd.f32 %v3347_v30, %v3248_v11  ;;  %v3250_v32 = vpop.f32.mrb[3].mxu1  ;;  %v3451_v47 = vmax.f32 %v3419_v63, 0.0 }
 0x3ec   : > { %v3422_v8 = vadd.f32 %v3347_v30, %v3250_v32  ;;  %v3452_v3 = vmax.f32 %v3420_v57, 0.0  ;;  %v3387_v57 = vpop.permute.xlu1 %3386 }
 0x3ed   : > { %v3453_v22 = vmax.f32 %v3421_v17, 0.0 }
 0x3ee   : > { %v3454_v33 = vmax.f32 %v3422_v8, 0.0 }
 0x3ef   : > { %v3499_v62 = vpack.c.bf16 %v3453_v22, %v3451_v47 }
 0x3f0   : > { %v3500_v61 = vpack.c.bf16 %v3454_v33, %v3452_v3  ;;  %v3254_v26 = vpop.f32.mrb[4].mxu1 }
 0x3f1   : > { %v3423_v60 = vadd.f32 %v3352_v28, %v3254_v26  ;;  %v3256_v52 = vpop.f32.mrb[5].mxu1 }
 0x3f2   : > { %v3424_v50 = vadd.f32 %v3352_v28, %v3256_v52  ;;  %v3258_v44 = vpop.f32.mrb[6].mxu1  ;;  %3659 = vmatprep.subr.bf16.mxu0 %v3500_v61  ;;  %v3392_v61 = vpop.permute.xlu0 %3391 }
 0x3f3   : > { %v3425_v58 = vadd.f32 %v3357_v45, %v3258_v44  ;;  %v3260_v5 = vpop.f32.mrb[7].mxu1  ;;  %3660 = vmatpush1.bf16.msra.mxu0 %v3499_v62  ;;  %v3455_v59 = vmax.f32 %v3423_v60, 0.0 }
 0x3f4   : > { %v3426_v46 = vadd.f32 %v3357_v45, %v3260_v5  ;;  %v3456_v23 = vmax.f32 %v3424_v50, 0.0  ;;  %v3397_v50 = vpop.permute.xlu1 %3396 }
 0x3f5   : > { %v3457_v34 = vmax.f32 %v3425_v58, 0.0 }
 0x3f6   : > { %v3458_v31 = vmax.f32 %v3426_v46, 0.0 }
 0x3f7   : > { %v3501_v36 = vpack.c.bf16 %v3457_v34, %v3455_v59 }
 0x3f8   : > { %v3502_v29 = vpack.c.bf16 %v3458_v31, %v3456_v23  ;;  %v3264_v0 = vpop.f32.mrb[8].mxu1 }
 0x3f9   : > { %v3427_v18 = vadd.f32 %v3362_v53, %v3264_v0  ;;  %v3266_v10 = vpop.f32.mrb[9].mxu1 }
 0x3fa   : > { %v3428_v15 = vadd.f32 %v3362_v53, %v3266_v10  ;;  %v3268_v20 = vpop.f32.mrb[10].mxu1  ;;  %3661 = vmatprep.subr.bf16.mxu0 %v3502_v29  ;;  %v3402_v29 = vpop.permute.xlu0 %3401 }
 0x3fb   : > { %v3429_v37 = vadd.f32 %v3367_v41, %v3268_v20  ;;  %v3270_v35 = vpop.f32.mrb[11].mxu1  ;;  %3662 = vmatpush1.bf16.msra.mxu0 %v3501_v36  ;;  %v3459_v14 = vmax.f32 %v3427_v18, 0.0 }
 0x3fc   : > { %v3430_v19 = vadd.f32 %v3367_v41, %v3270_v35  ;;  %v3460_v2 = vmax.f32 %v3428_v15, 0.0  ;;  %v3407_v15 = vpop.permute.xlu1 %3406 }
 0x3fd   : > { %v3461_v21 = vmax.f32 %v3429_v37, 0.0 }
 0x3fe   : > { %v3462_v12 = vmax.f32 %v3430_v19, 0.0 }
 0x3ff   : > { %v3503_v42 = vpack.c.bf16 %v3461_v21, %v3459_v14 }
 0x400   : > { %v3504_v48 = vpack.c.bf16 %v3462_v12, %v3460_v2  ;;  %v3274_v24 = vpop.f32.mrb[12].mxu1 }
 0x401   : > { %v3431_v9 = vadd.f32 %v3372_v7, %v3274_v24  ;;  %v3276_v27 = vpop.f32.mrb[13].mxu1 }
 0x402   : > { %v3432_v25 = vadd.f32 %v3372_v7, %v3276_v27  ;;  %v3278_v54 = vpop.f32.mrb[14].mxu1  ;;  %3663 = vmatprep.subr.bf16.mxu0 %v3504_v48  ;;  %v3412_v48 = vpop.permute.xlu0 %3411 }
 0x403   : > { %v3433_v55 = vadd.f32 %v3377_v4, %v3278_v54  ;;  %v3280_v39 = vpop.f32.mrb[15].mxu1  ;;  %3664 = vmatpush1.bf16.msra.mxu0 %v3503_v42  ;;  %v3463_v51 = vmax.f32 %v3431_v9, 0.0 }
 0x404   : > { %v3434_v6 = vadd.f32 %v3377_v4, %v3280_v39  ;;  %v3464_v56 = vmax.f32 %v3432_v25, 0.0  ;;  %v3417_v25 = vpop.permute.xlu1 %3416 }
 0x405   : > { %v3465_v38 = vmax.f32 %v3433_v55, 0.0 }
 0x406   : > { %v3466_v43 = vmax.f32 %v3434_v6, 0.0 }
 0x407   : > { %v3505_v1 = vpack.c.bf16 %v3465_v38, %v3463_v51 }
 0x408   : > { %v3506_v49 = vpack.c.bf16 %v3466_v43, %v3464_v56  ;;  %v3284_v63 = vpop.f32.mrb[16].mxu1 }
 0x409   : > { %v3435_v16 = vadd.f32 %v3382_v40, %v3284_v63  ;;  %v3286_v30 = vpop.f32.mrb[17].mxu1  ;;  %v4370_v63 = vld [vmem:[%s6767_s4] sm:$0xff]  }
 0x40a   : > { %v3436_v11 = vadd.f32 %v3382_v40, %v3286_v30  ;;  %v3288_v17 = vpop.f32.mrb[18].mxu1  ;;  %3665 = vmatprep.subr.bf16.mxu0 %v3506_v49  ;;  %v4372_v30 = vld [vmem:[%s6767_s4 + $0x10] sm:$0xff]  }
 0x40b   : > { %v3437_v32 = vadd.f32 %v3387_v57, %v3288_v17  ;;  %v3290_v28 = vpop.f32.mrb[19].mxu1  ;;  %3666 = vmatpush1.bf16.msra.mxu0 %v3505_v1  ;;  %v3467_v47 = vmax.f32 %v3435_v16, 0.0  ;;  %v4371_v16 = vld [vmem:[%s6767_s4 + $0x8] sm:$0xff]  }
 0x40c   : > { %v3438_v8 = vadd.f32 %v3387_v57, %v3290_v28  ;;  %v3468_v3 = vmax.f32 %v3436_v11, 0.0  ;;  %v4373_v57 = vld [vmem:[%s6767_s4 + $0x18] sm:$0xff]   ;;  %v4374_v11 = vld [vmem:[%s6767_s4 + $0x20] sm:$0xff]   ;;  %v4375_v17 = vld [vmem:[%s6767_s4 + $0x28] sm:$0xff]  }
 0x40d   : > { %v3469_v22 = vmax.f32 %v3437_v32, 0.0  ;;  %v4376_v32 = vld [vmem:[%s6767_s4 + $0x30] sm:$0xff]   ;;  %v4377_v28 = vld [vmem:[%s6767_s4 + $0x38] sm:$0xff]  }
 0x40e   : > { %v3470_v33 = vmax.f32 %v3438_v8, 0.0  ;;  %v3534_v8 = vpop.permute.xlu0 %3533 }
 0x40f   : > { %v3507_v62 = vpack.c.bf16 %v3469_v22, %v3467_v47 }
 0x410   : > { %v3508_v26 = vpack.c.bf16 %v3470_v33, %v3468_v3  ;;  %v3294_v60 = vpop.f32.mrb[20].mxu1  ;;  %v3539_v33 = vpop.permute.xlu1 %3538 }
 0x411   : > { %v3439_v52 = vadd.f32 %v3392_v61, %v3294_v60  ;;  %v3296_v45 = vpop.f32.mrb[21].mxu1 }
 0x412   : > { %v3440_v44 = vadd.f32 %v3392_v61, %v3296_v45  ;;  %v3298_v58 = vpop.f32.mrb[22].mxu1  ;;  %3667 = vmatprep.subr.bf16.mxu0 %v3508_v26 }
 0x413   : > { %v3441_v5 = vadd.f32 %v3397_v50, %v3298_v58  ;;  %v3300_v46 = vpop.f32.mrb[23].mxu1  ;;  %3668 = vmatpush1.bf16.msra.mxu0 %v3507_v62  ;;  %v3471_v34 = vmax.f32 %v3439_v52, 0.0 }
 0x414   : > { %v3442_v59 = vadd.f32 %v3397_v50, %v3300_v46  ;;  %v3472_v31 = vmax.f32 %v3440_v44, 0.0 }
 0x415   : > { %v3473_v23 = vmax.f32 %v3441_v5, 0.0  ;;  %v3544_v5 = vpop.permute.xlu0 %3543 }
 0x416   : > { %v3474_v36 = vmax.f32 %v3442_v59, 0.0 }
 0x417   : > { %v3509_v53 = vpack.c.bf16 %v3473_v23, %v3471_v34 }
 0x418   : > { %v3510_v0 = vpack.c.bf16 %v3474_v36, %v3472_v31  ;;  %v3304_v18 = vpop.f32.mrb[24].mxu1  ;;  %v3549_v31 = vpop.permute.xlu1 %3548 }
 0x419   : > { %v3443_v10 = vadd.f32 %v3402_v29, %v3304_v18  ;;  %v3306_v41 = vpop.f32.mrb[25].mxu1 }
 0x41a   : > { %v3444_v20 = vadd.f32 %v3402_v29, %v3306_v41  ;;  %v3308_v37 = vpop.f32.mrb[26].mxu1  ;;  %3669 = vmatprep.subr.bf16.mxu0 %v3510_v0 }
 0x41b   : > { %v3445_v35 = vadd.f32 %v3407_v15, %v3308_v37  ;;  %v3310_v19 = vpop.f32.mrb[27].mxu1  ;;  %3670 = vmatpush1.bf16.msra.mxu0 %v3509_v53  ;;  %v3475_v21 = vmax.f32 %v3443_v10, 0.0 }
 0x41c   : > { %v3446_v14 = vadd.f32 %v3407_v15, %v3310_v19  ;;  %v3476_v12 = vmax.f32 %v3444_v20, 0.0 }
 0x41d   : > { %v3477_v2 = vmax.f32 %v3445_v35, 0.0  ;;  %v3554_v35 = vpop.permute.xlu0 %3553 }
 0x41e   : > { %v3478_v42 = vmax.f32 %v3446_v14, 0.0 }
 0x41f   : > { %v3511_v7 = vpack.c.bf16 %v3477_v2, %v3475_v21 }
 0x420   : > { %v3512_v24 = vpack.c.bf16 %v3478_v42, %v3476_v12  ;;  %v3314_v9 = vpop.f32.mrb[28].mxu1  ;;  %v3559_v12 = vpop.permute.xlu1 %3558 }
 0x421   : > { %v3447_v27 = vadd.f32 %v3412_v48, %v3314_v9  ;;  %v3316_v4 = vpop.f32.mrb[29].mxu1 }
 0x422   : > { %v3448_v54 = vadd.f32 %v3412_v48, %v3316_v4  ;;  %v3318_v55 = vpop.f32.mrb[30].mxu1  ;;  %3671 = vmatprep.subr.bf16.mxu0 %v3512_v24 }
 0x423   : > { %v3449_v39 = vadd.f32 %v3417_v25, %v3318_v55  ;;  %v3320_v6 = vpop.f32.mrb[31].mxu1  ;;  %3672 = vmatpush1.bf16.msra.mxu0 %v3511_v7  ;;  %v3479_v38 = vmax.f32 %v3447_v27, 0.0 }
 0x424   : > { %v3450_v51 = vadd.f32 %v3417_v25, %v3320_v6  ;;  %v3480_v43 = vmax.f32 %v3448_v54, 0.0 }
 0x425   : > { %v3481_v56 = vmax.f32 %v3449_v39, 0.0  ;;  %v3564_v39 = vpop.permute.xlu0 %3563 }
 0x426   : > { %v3482_v1 = vmax.f32 %v3450_v51, 0.0 }
 0x427   : > { %v3513_v40 = vpack.c.bf16 %v3481_v56, %v3479_v38 }
 0x428   : > { %v3514_v49 = vpack.c.bf16 %v3482_v1, %v3480_v43  ;;  %v3569_v43 = vpop.permute.xlu1 %3568 }
 0x42a   : > { %3673 = vmatprep.subr.bf16.mxu0 %v3514_v49 }
 0x42b   : > { %3674 = vmatpush1.bf16.msra.mxu0 %v3513_v40 }
 0x42e   : > { %3692 = vmatmul.mubr.bf16.vlgmr.msra.gmra.mrb[24].mxu0 %v4370_v63 }
 0x42f   : > { %3701 = vmatprep.mubr.bf16.mxu0 %v7033_v13 }
 0x436   : > { %3702 = vmatmul.mubr.bf16.gmra.mrb[28].mxu0 %v4371_v16 }
 0x437   : > { %3711 = vmatprep.mubr.bf16.mxu0 %v7033_v13 }
 0x43e   : > { %3712 = vmatmul.mubr.bf16.gmra.mrb[32].mxu0 %v4372_v30 }
 0x43f   : > { %3721 = vmatprep.mubr.bf16.mxu0 %v7033_v13 }
 0x446   : > { %3722 = vmatmul.mubr.bf16.gmra.mrb[36].mxu0 %v4373_v57 }
 0x447   : > { %3731 = vmatprep.mubr.bf16.mxu0 %v7033_v13 }
 0x44e   : > { %3732 = vmatmul.mubr.bf16.gmra.mrb[40].mxu0 %v4374_v11 }
 0x44f   : > { %3741 = vmatprep.mubr.bf16.mxu0 %v7033_v13 }
 0x456   : > { %3742 = vmatmul.mubr.bf16.gmra.mrb[44].mxu0 %v4375_v17 }
 0x457   : > { %3751 = vmatprep.mubr.bf16.mxu0 %v7033_v13 }
 0x45e   : > { %3752 = vmatmul.mubr.bf16.gmra.mrb[48].mxu0 %v4376_v32 }
 0x45f   : > { %3761 = vmatprep.mubr.bf16.mxu0 %v7033_v13 }
 0x466   : > { %3762 = vmatmul.mubr.bf16.gmra.mrb[52].mxu0 %v4377_v28  ;;  %v3574_v28 = vpop.permute.xlu0 %3573 }
 0x501   : > { %v3693_v47 = vpop.f32.mrb[24].mxu0 }
 0x502   : > { %v3694_v22 = vadd.f32 %v3693_v47, %v3534_v8  ;;  %v3695_v3 = vpop.f32.mrb[25].mxu0 }
 0x503   : > { %v3696_v62 = vadd.f32 %v3695_v3, %v3534_v8  ;;  %v3697_v61 = vpop.f32.mrb[26].mxu0 }
 0x504   : > { %v3698_v26 = vadd.f32 %v3697_v61, %v3539_v33  ;;  %v3699_v60 = vpop.f32.mrb[27].mxu0  ;;  %v3772_v45 = vmax.f32 %v3694_v22, 0.0 }
 0x505   : > { %v3700_v52 = vadd.f32 %v3699_v60, %v3539_v33  ;;  %v3773_v44 = vmax.f32 %v3696_v62, 0.0  ;;  %v3579_v33 = vpop.permute.xlu1 %3578 }
 0x506   : > { %v3774_v50 = vmax.f32 %v3698_v26, 0.0 }
 0x507   : > { %v3775_v58 = vmax.f32 %v3700_v52, 0.0 }
 0x508   : > { %v3805_v13 = vpack.c.bf16 %v3774_v50, %v3772_v45 }
 0x509   : > { %v3806_v46 = vpack.c.bf16 %v3775_v58, %v3773_v44  ;;  %v3703_v59 = vpop.f32.mrb[28].mxu0 }
 0x50a   : > { %v3704_v34 = vadd.f32 %v3703_v59, %v3544_v5  ;;  %v3705_v23 = vpop.f32.mrb[29].mxu0 }
 0x50b   : > { %v3706_v36 = vadd.f32 %v3705_v23, %v3544_v5  ;;  %v3707_v53 = vpop.f32.mrb[30].mxu0  ;;  %3827 = vmatprep.subr.bf16.mxu1 %v3806_v46  ;;  %v3584_v5 = vpop.permute.xlu0 %3583 }
 0x50c   : > { %v3708_v29 = vadd.f32 %v3707_v53, %v3549_v31  ;;  %v3709_v0 = vpop.f32.mrb[31].mxu0  ;;  %3828 = vmatpush1.bf16.msra.mxu1 %v3805_v13  ;;  %v3776_v10 = vmax.f32 %v3704_v34, 0.0 }
 0x50d   : > { %v3710_v18 = vadd.f32 %v3709_v0, %v3549_v31  ;;  %v3777_v15 = vmax.f32 %v3706_v36, 0.0  ;;  %v3589_v31 = vpop.permute.xlu1 %3588 }
 0x50e   : > { %v3778_v41 = vmax.f32 %v3708_v29, 0.0 }
 0x50f   : > { %v3779_v20 = vmax.f32 %v3710_v18, 0.0 }
 0x510   : > { %v3807_v37 = vpack.c.bf16 %v3778_v41, %v3776_v10 }
 0x511   : > { %v3808_v19 = vpack.c.bf16 %v3779_v20, %v3777_v15  ;;  %v3713_v14 = vpop.f32.mrb[32].mxu0 }
 0x512   : > { %v3714_v21 = vadd.f32 %v3713_v14, %v3554_v35  ;;  %v3715_v2 = vpop.f32.mrb[33].mxu0 }
 0x513   : > { %v3716_v42 = vadd.f32 %v3715_v2, %v3554_v35  ;;  %v3717_v7 = vpop.f32.mrb[34].mxu0  ;;  %3829 = vmatprep.subr.bf16.mxu1 %v3808_v19  ;;  %v3594_v35 = vpop.permute.xlu0 %3593 }
 0x514   : > { %v3718_v48 = vadd.f32 %v3717_v7, %v3559_v12  ;;  %v3719_v24 = vpop.f32.mrb[35].mxu0  ;;  %3830 = vmatpush1.bf16.msra.mxu1 %v3807_v37  ;;  %v3780_v27 = vmax.f32 %v3714_v21, 0.0 }
 0x515   : > { %v3720_v9 = vadd.f32 %v3719_v24, %v3559_v12  ;;  %v3781_v25 = vmax.f32 %v3716_v42, 0.0  ;;  %v3599_v12 = vpop.permute.xlu1 %3598 }
 0x516   : > { %v3782_v4 = vmax.f32 %v3718_v48, 0.0 }
 0x517   : > { %v3783_v54 = vmax.f32 %v3720_v9, 0.0 }
 0x518   : > { %v3809_v55 = vpack.c.bf16 %v3782_v4, %v3780_v27 }
 0x519   : > { %v3810_v6 = vpack.c.bf16 %v3783_v54, %v3781_v25  ;;  %v3723_v51 = vpop.f32.mrb[36].mxu0 }
 0x51a   : > { %v3724_v38 = vadd.f32 %v3723_v51, %v3564_v39  ;;  %v3725_v56 = vpop.f32.mrb[37].mxu0 }
 0x51b   : > { %v3726_v1 = vadd.f32 %v3725_v56, %v3564_v39  ;;  %v3727_v40 = vpop.f32.mrb[38].mxu0  ;;  %3831 = vmatprep.subr.bf16.mxu1 %v3810_v6  ;;  %v3604_v39 = vpop.permute.xlu0 %3603 }
 0x51c   : > { %v3728_v49 = vadd.f32 %v3727_v40, %v3569_v43  ;;  %v3729_v63 = vpop.f32.mrb[39].mxu0  ;;  %3832 = vmatpush1.bf16.msra.mxu1 %v3809_v55  ;;  %v3784_v30 = vmax.f32 %v3724_v38, 0.0 }
 0x51d   : > { %v3730_v16 = vadd.f32 %v3729_v63, %v3569_v43  ;;  %v3785_v11 = vmax.f32 %v3726_v1, 0.0  ;;  %v3609_v43 = vpop.permute.xlu1 %3608 }
 0x51e   : > { %v3786_v57 = vmax.f32 %v3728_v49, 0.0 }
 0x51f   : > { %v3787_v17 = vmax.f32 %v3730_v16, 0.0 }
 0x520   : > { %v3811_v32 = vpack.c.bf16 %v3786_v57, %v3784_v30 }
 0x521   : > { %v3812_v8 = vpack.c.bf16 %v3787_v17, %v3785_v11  ;;  %v3733_v47 = vpop.f32.mrb[40].mxu0 }
 0x522   : > { %v3734_v22 = vadd.f32 %v3733_v47, %v3574_v28  ;;  %v3735_v3 = vpop.f32.mrb[41].mxu0  ;;  %v3825_v47 = vpop.permute.xlu0 %3824 }
 0x523   : > { %v3736_v62 = vadd.f32 %v3735_v3, %v3574_v28  ;;  %v3737_v61 = vpop.f32.mrb[42].mxu0  ;;  %3833 = vmatprep.subr.bf16.mxu1 %v3812_v8  ;;  %v3804_v8 = vld [vmem:[%s6769_s6] sm:$0x3] }
 0x524   : > { %v3738_v26 = vadd.f32 %v3737_v61, %v3579_v33  ;;  %v3739_v60 = vpop.f32.mrb[43].mxu0  ;;  %3834 = vmatpush1.bf16.msra.mxu1 %v3811_v32  ;;  %v3788_v45 = vmax.f32 %v3734_v22, 0.0 }
 0x525   : > { %v3740_v52 = vadd.f32 %v3739_v60, %v3579_v33  ;;  %v3789_v44 = vmax.f32 %v3736_v62, 0.0 }
 0x526   : > { %v3790_v50 = vmax.f32 %v3738_v26, 0.0 }
 0x527   : > { %v3791_v58 = vmax.f32 %v3740_v52, 0.0 }
 0x528   : > { %v3813_v13 = vpack.c.bf16 %v3790_v50, %v3788_v45 }
 0x529   : > { %v3814_v46 = vpack.c.bf16 %v3791_v58, %v3789_v44  ;;  %v3743_v59 = vpop.f32.mrb[44].mxu0 }
 0x52a   : > { %v3744_v34 = vadd.f32 %v3743_v59, %v3584_v5  ;;  %v3745_v23 = vpop.f32.mrb[45].mxu0 }
 0x52b   : > { %v3746_v36 = vadd.f32 %v3745_v23, %v3584_v5  ;;  %v3747_v53 = vpop.f32.mrb[46].mxu0  ;;  %3835 = vmatprep.subr.bf16.mxu1 %v3814_v46 }
 0x52c   : > { %v3748_v29 = vadd.f32 %v3747_v53, %v3589_v31  ;;  %v3749_v0 = vpop.f32.mrb[47].mxu0  ;;  %3836 = vmatpush1.bf16.msra.mxu1 %v3813_v13  ;;  %v3792_v10 = vmax.f32 %v3744_v34, 0.0 }
 0x52d   : > { %v3750_v18 = vadd.f32 %v3749_v0, %v3589_v31  ;;  %v3793_v15 = vmax.f32 %v3746_v36, 0.0 }
 0x52e   : > { %v3794_v41 = vmax.f32 %v3748_v29, 0.0 }
 0x52f   : > { %v3795_v20 = vmax.f32 %v3750_v18, 0.0 }
 0x530   : > { %v3815_v37 = vpack.c.bf16 %v3794_v41, %v3792_v10 }
 0x531   : > { %v3816_v19 = vpack.c.bf16 %v3795_v20, %v3793_v15  ;;  %v3753_v14 = vpop.f32.mrb[48].mxu0 }
 0x532   : > { %v3754_v21 = vadd.f32 %v3753_v14, %v3594_v35  ;;  %v3755_v2 = vpop.f32.mrb[49].mxu0 }
 0x533   : > { %v3756_v42 = vadd.f32 %v3755_v2, %v3594_v35  ;;  %v3757_v7 = vpop.f32.mrb[50].mxu0  ;;  %3837 = vmatprep.subr.bf16.mxu1 %v3816_v19 }
 0x534   : > { %v3758_v48 = vadd.f32 %v3757_v7, %v3599_v12  ;;  %v3759_v24 = vpop.f32.mrb[51].mxu0  ;;  %3838 = vmatpush1.bf16.msra.mxu1 %v3815_v37  ;;  %v3796_v27 = vmax.f32 %v3754_v21, 0.0 }
 0x535   : > { %v3760_v9 = vadd.f32 %v3759_v24, %v3599_v12  ;;  %v3797_v25 = vmax.f32 %v3756_v42, 0.0 }
 0x536   : > { %v3798_v4 = vmax.f32 %v3758_v48, 0.0 }
 0x537   : > { %v3799_v54 = vmax.f32 %v3760_v9, 0.0 }
 0x538   : > { %v3817_v55 = vpack.c.bf16 %v3798_v4, %v3796_v27 }
 0x539   : > { %v3818_v6 = vpack.c.bf16 %v3799_v54, %v3797_v25  ;;  %v3763_v51 = vpop.f32.mrb[52].mxu0 }
 0x53a   : > { %v3764_v38 = vadd.f32 %v3763_v51, %v3604_v39  ;;  %v3765_v56 = vpop.f32.mrb[53].mxu0 }
 0x53b   : > { %v3766_v1 = vadd.f32 %v3765_v56, %v3604_v39  ;;  %v3767_v40 = vpop.f32.mrb[54].mxu0  ;;  %3839 = vmatprep.subr.bf16.mxu1 %v3818_v6 }
 0x53c   : > { %v3768_v49 = vadd.f32 %v3767_v40, %v3609_v43  ;;  %v3769_v63 = vpop.f32.mrb[55].mxu0  ;;  %3840 = vmatpush1.bf16.msra.mxu1 %v3817_v55  ;;  %v3800_v30 = vmax.f32 %v3764_v38, 0.0 }
 0x53d   : > { %v3770_v16 = vadd.f32 %v3769_v63, %v3609_v43  ;;  %v3801_v11 = vmax.f32 %v3766_v1, 0.0 }
 0x53e   : > { %v3802_v57 = vmax.f32 %v3768_v49, 0.0 }
 0x53f   : > { %v3803_v17 = vmax.f32 %v3770_v16, 0.0 }
 0x540   : > { %v3819_v32 = vpack.c.bf16 %v3802_v57, %v3800_v30 }
 0x541   : > { %v3820_v28 = vpack.c.bf16 %v3803_v17, %v3801_v11 }
 0x543   : > { %3841 = vmatprep.subr.bf16.mxu1 %v3820_v28 }
 0x544   : > { %3842 = vmatpush1.bf16.msra.mxu1 %v3819_v32 }
 0x547   : > { %3860 = vmatmul.mubr.bf16.vlgmr.msra.gmra.mrb[32].mxu1 %v3804_v8 }
 0x61a   : > { %v3861_v22 = vpop.f32.mrb[32].mxu1 }
 0x61b   : > { %v3862_v3 = vadd.f32 %v3861_v22, %v3825_v47  ;;  %v3863_v33 = vpop.f32.mrb[33].mxu1 }
 0x61c   : > { %v3864_v62 = vadd.f32 %v3863_v33, %v3825_v47  ;;  %v3865_v61 = vpop.f32.mrb[34].mxu1 }
 0x61d   : > { %v3868_v26 = vsub.f32 0.0, %v3862_v3  ;;  %v3866_v60 = vpop.f32.mrb[35].mxu1 }
 0x61e   : > { %v3869_v52 = vsub.f32 0.0, %v3864_v62 }
 0x61f   : > { %v3870_v45 = vmul.f32 1.442695, %v3868_v26 }
 0x620   : > { %v3872_v50 = vmul.f32 1.442695, %v3869_v52 }
 0x621   : > { %4450 = vpow2.f32 %v3870_v45 }
 0x622   : > { %4452 = vpow2.f32 %v3872_v50 }
 0x62b   : > { %v4451_v44 = vpop.eup %4450 }
 0x62c   : > { %v4453_v58 = vpop.eup %4452  ;;  %v3874_v13 = vadd.f32 1.0, %v4451_v44 }
 0x62d   : > { %v3875_v5 = vadd.f32 1.0, %v4453_v58 }
 0x62e   : > { %4454 = vrcp.f32 %v3874_v13 }
 0x62f   : > { %4456 = vrcp.f32 %v3875_v5 }
 0x636   : > { %3890 = sbr.rel (!%p4639_p5) target bundleno = 1624 (0x658), region = 68 }
 0x638   : > { %v4455_v46 = vpop.eup %4454 }
 0x639   : > { %v4457_v59 = vpop.eup %4456 }
 0x63a   : > { %v3880_v34 = vcombine.low %v4455_v46, %v4457_v59 }
 0x63c   : > { %3882 = vst [vmem:[%s494_s15] sm:$0x77] %v3880_v34 }
 0x63d   : > { %s7042_s22 = smov (!%p3893_p12, %s3892_s22), 2 }
 0x63e   : > { %s6714_s27 = sshll.u32 %s7042_s22, 6 }
 0x63f   : > { %s3897_s29 = ssub.s32 128, %s6714_s27 }
 0x640   : > { %3898 = vsyncadd %s6709_s19, %s3897_s29  ;;  %p4159_p13 = scmp.ne.s32.totalorder %s6714_s27, 0  ;;  %s4176_s30 = sshll.u32 %s4622_s9, 7 }
 0x641   : > { %s6723_s14 = scalar_lea.hbm %s6775_s12, %s4176_s30  ;;  %s3904_s20 = sshll.u32 %s494_s15, 4  ;;  %s3905_s20 = int_to_ptr.vmem [resolvable:$true] %s3904_s20 }
 0x642   : > { %s4458_s16 = scalar_lea.vmem %s3905_s20, %s6714_s27  ;;  %s4530_s21 = smov [#allocation17]  }
 0x643   : > { %p4459_p0 = scmp.ne.s32.totalorder %s3905_s20, %s4458_s16  ;;  %s4462_s25 = sshll.u32 %s4530_s21, 4  ;;  %s4463_s25 = int_to_ptr.vmem [resolvable:$false] %s4462_s25 }
 0x644   : > { %s4464_s28 = scalar_lea.vmem %s4463_s25, 256  ;;  %p4465_p3 = scmp.lt.s32.totalorder %s3905_s20, %s4463_s25 }
 0x645   : > { %p4460_p1 = pnand %p4459_p0, %p4159_p13  ;;  %p4466_p4 = scmp.lt.s32.totalorder %s4464_s28, %s4458_s16 }
 0x647   : > { %p4461_p2 = pneg %p4460_p1  ;;  %p4467_p5 = por %p4466_p4, %p4465_p3 }
 0x649   : > { %p4468_p7 = pnand %p4467_p5, %p4461_p2 }
 0x64b   : > { %4471 = shalt.err (!%p4468_p7)
}
 0x64c   : > { %s4472_s9 = scalar_lea.hbm %s6723_s14, %s6714_s27  ;;  %s4476_s15 = scalar_lea.hbm %s6775_s12, 192 }
 0x64d   : > { %p4473_p8 = scmp.ne.s32.totalorder %s6723_s14, %s4472_s9  ;;  %p4477_p11 = scmp.lt.u32.totalorder %s6723_s14, %s6775_s12 }
 0x64e   : > { %p4478_p12 = scmp.lt.u32.totalorder %s4476_s15, %s4472_s9  ;;  %p4480_p1 = scmp.lt.u32.totalorder %s4472_s9, %s6723_s14 }
 0x64f   : > { %p4474_p9 = pnand %p4473_p8, %p4159_p13 }
 0x650   : > { %p4479_p0 = por %p4478_p12, %p4477_p11 }
 0x651   : > { %p4475_p10 = pneg %p4474_p9 }
 0x652   : > { %p4481_p2 = por %p4480_p1, %p4479_p0 }
 0x654   : > { %p4482_p3 = pnand %p4481_p2, %p4475_p10 }
 0x656   : > { %4485 = shalt.err (!%p4482_p3)
}
 0x657   : > { %3907 = dma.vmem_to_hbm [thread:$0]  (%p4159_p13), %s3905_s20, %s6714_s27, %s6723_s14, %s6709_s19  }
 0x658 PF: > { %s7034_s30 = sld [smem:[#allocation22_spill]]  ;;  %p4306_p4 = scmp.ge.s32.totalorder %s4520_s26, 2 }
 0x65a   : > { %p4303_p5 = pnand %p4306_p4, %p4643_p6 }
 0x65e   : > { %s3916_s18 = sand.u32 1, %s7034_s30  }
 0x65f   : > { %s3917_s16 = scalar_lea.sflag [#allocation18], %s3916_s18 }
 0x660   : > { %4503 = dma.done.wait (!%p4303_p5), %s3917_s16, 128  }
 0x661   : > { %4505 = vsyncadd (!%p4303_p5), %s3917_s16, 4294967168  ;;  %s7036_s26 = sld [smem:[#allocation24_spill]]  ;;  %s7037_s21 = sld [smem:[#allocation23_spill]] }
 0x662   : > { %s7038_s25 = sld [smem:[#allocation25_spill]]  ;;  %s7039_s23 = smov %s4512_s24 }
 0x667   : > { %p25_p7 = scmp.ge.s32.totalorder %s7036_s26, 4   ;;  %s7040_s24 = smov %s7037_s21 }
 0x669   :  { %27 = sbr.rel (!%p25_p7) target bundleno = 6 (0x6), region = 114 }
 0x670   :  { %3922 = vsyncpa [#allocation18], 1 }
 0x671   :  { %3924 = vsyncpa [#allocation18 + $0x1], 1 }

</bundles_post_ra>
